<compile_context>
chip_gen: v7x
topology: tpu7x:2x2x1
jax: 0.10.0
libtpu: 0.0.40
codegen_flags: <defaults>
</compile_context>

<pallas_src>
import jax
import jax.numpy as jnp
from jax.experimental import pallas as pl
from jax.experimental.pallas import tpu as pltpu

# ----------------------------- model config ---------------------------------
IMG = 32          # input resolution
PATCH = 8         # patch size -> 4x4 = 16 patches
WIDTH_V = 32      # vision transformer width
WIDTH_T = 32      # text transformer width
EMBED = 32        # joint embedding dim
HEADS = 4         # attention heads (head dim = 8)
CTX = 8           # text context length
VOCAB = 64        # vocab size
B_IMG = 2         # number of images
B_TXT = 3         # number of text labels

NP = (IMG // PATCH) ** 2          # 16 patches
S_V = NP + 1                      # 17 visual tokens (cls + patches)

_VMEM = pltpu.MemorySpace.VMEM


# --------------------------- fused forward kernel ----------------------------
def _fused_clip_kernel(
    # ---- vision tower inputs ----
    patches_ref, v_patch_w, v_cls, v_pos, v_lnpre_g, v_lnpre_b,
    v_ln1g, v_ln1b, v_wqkv, v_bqkv, v_wout, v_bout,
    v_ln2g, v_ln2b, v_wfc, v_bfc, v_wproj, v_bproj,
    v_lnpost_g, v_lnpost_b, v_proj, cls_sel_ref,
    # ---- text tower inputs ----
    tok_ref,
    t_ln1g, t_ln1b, t_wqkv, t_bqkv, t_wout, t_bout,
    t_ln2g, t_ln2b, t_wfc, t_bfc, t_wproj, t_bproj,
    t_lnfg, t_lnfb, t_proj, eot_ref,
    # ---- output ----
    logits_ref,
    # ---- scratch ----
    xv_scratch, attn_v_scratch, attn_t_scratch,
):
    f32 = jnp.float32
    bf16 = jnp.bfloat16

    # ---- helpers (pure jnp on VMEM-resident values) ----
    def mm(x, w):                               # x @ w, bf16 MXU, f32 acc
        return jax.lax.dot_general(
            x.astype(bf16), w.astype(bf16),
            (((1,), (0,)), ((), ())), preferred_element_type=f32)

    def mm_nt(x, y):                            # x @ y.T, bf16 MXU, f32 acc
        return jax.lax.dot_general(
            x.astype(bf16), y.astype(bf16),
            (((1,), (1,)), ((), ())), preferred_element_type=f32)

    def layernorm(x, g_ref, b_ref, eps=1e-5):   # f32 row-wise LN
        mu = jnp.mean(x, axis=-1, keepdims=True)
        var = jnp.mean(jnp.square(x - mu), axis=-1, keepdims=True)
        return (x - mu) * jax.lax.rsqrt(var + eps) * g_ref[...] + b_ref[...]

    def softmax(s):                             # f32, EUP reciprocal
        s = s - jnp.max(s, axis=-1, keepdims=True)
        e = jnp.exp(s)
        return e * pl.reciprocal(jnp.sum(e, axis=-1, keepdims=True), approx=True)

    def quickgelu(x):
        return x * jax.nn.sigmoid(1.702 * x)

    def resblock(x, B, S, D, heads, mask, attn_ref,
                 ln1g, ln1b, wqkv, bqkv, wout, bout,
                 ln2g, ln2b, wfc, bfc, wproj, bproj):
        """CLIP ResidualAttentionBlock, fully in-VMEM.  x: (B*S, D) f32."""
        Dh = D // heads
        scale = Dh ** -0.5
        h = layernorm(x, ln1g, ln1b)
        qkv = mm(h, wqkv[...]) + bqkv[...]                  # (B*S, 3D)
        for b in range(B):
            qkv_b = qkv[b * S:(b + 1) * S]                  # (S, 3D)
            q = qkv_b[:, 0:D]
            k = qkv_b[:, D:2 * D]
            v = qkv_b[:, 2 * D:3 * D]
            for hh in range(heads):
                qh = q[:, hh * Dh:(hh + 1) * Dh]
                kh = k[:, hh * Dh:(hh + 1) * Dh]
                vh = v[:, hh * Dh:(hh + 1) * Dh]
                s = mm_nt(qh, kh) * scale                   # (S, S)
                if mask is not None:
                    s = s + mask
                p = softmax(s)
                # assemble per-head outputs directly into VMEM scratch
                attn_ref[b * S:(b + 1) * S, hh * Dh:(hh + 1) * Dh] = mm(p, vh)
        a = mm(attn_ref[...], wout[...]) + bout[...]
        x = x + a
        h = layernorm(x, ln2g, ln2b)
        h = quickgelu(mm(h, wfc[...]) + bfc[...])
        h = mm(h, wproj[...]) + bproj[...]
        return x + h

    # =========================== vision tower ===============================
    # Conv2d(3, WIDTH_V, kernel=PATCH, stride=PATCH, bias=False) as matmul
    x_patch = mm(patches_ref[...], v_patch_w[...])          # (B_IMG*NP, Wv)
    pos = v_pos[...]                                        # (S_V, Wv)
    cls = v_cls[...]                                        # (1, Wv)
    for b in range(B_IMG):
        xv_scratch[b * S_V:b * S_V + 1, :] = cls + pos[0:1]
        xv_scratch[b * S_V + 1:(b + 1) * S_V, :] = (
            x_patch[b * NP:(b + 1) * NP] + pos[1:S_V])

    xv = layernorm(xv_scratch[...], v_lnpre_g, v_lnpre_b)   # (B_IMG*S_V, Wv)
    xv = resblock(xv, B_IMG, S_V, WIDTH_V, HEADS, None, attn_v_scratch,
                  v_ln1g, v_ln1b, v_wqkv, v_bqkv, v_wout, v_bout,
                  v_ln2g, v_ln2b, v_wfc, v_bfc, v_wproj, v_bproj)

    # ln_post + projection applied row-wise; class-token selection and the
    # batch-mean of image features are fused into a single one-hot matmul.
    xv_post = layernorm(xv, v_lnpost_g, v_lnpost_b)
    feats_all = mm(xv_post, v_proj[...])                    # (B_IMG*S_V, E)
    mean_img = jnp.dot(cls_sel_ref[...], feats_all,
                       preferred_element_type=f32)          # (1, E)

    # ============================ text tower =================================
    S = CTX
    rows = jax.lax.broadcasted_iota(jnp.int32, (S, S), 0)
    cols = jax.lax.broadcasted_iota(jnp.int32, (S, S), 1)
    causal = jnp.where(cols > rows, -1e30, 0.0).astype(f32)

    xt = resblock(tok_ref[...], B_TXT, CTX, WIDTH_T, HEADS, causal,
                  attn_t_scratch,
                  t_ln1g, t_ln1b, t_wqkv, t_bqkv, t_wout, t_bout,
                  t_ln2g, t_ln2b, t_wfc, t_bfc, t_wproj, t_bproj)
    xt = layernorm(xt, t_lnfg, t_lnfb)                      # (B_TXT*CTX, Wt)
    eot_feats = jnp.dot(eot_ref[...], xt,
                        preferred_element_type=f32)         # (B_TXT, Wt)
    txt_feats = mm(eot_feats, t_proj[...])                  # (B_TXT, E)

    # ===================== mean-pool + logits (hot path) =====================
    logits_ref[...] = jax.lax.dot_general(
        mean_img, txt_feats, (((1,), (1,)), ((), ())),
        preferred_element_type=f32)                         # (1, B_TXT)


# ------------------------------- wrapper --------------------------------------
def clip_benchmark_forward(text_tokens, images_u8, params):
    """Matches CLIPBenchmark.forward: preprocess -> encode -> mean -> logits."""
    # preprocess (normalize + HWC->CHW + patchify) -- layout plumbing in JAX.
    # TODO(synk): the PIL bicubic resize / center-crop of clip.load's preprocess
    # has no clean Pallas equivalent; inputs are assumed at model resolution.
    x = images_u8.astype(jnp.float32) / 255.0
    mean = jnp.array([0.48145466, 0.4578275, 0.40821073], jnp.float32)
    std = jnp.array([0.26862954, 0.26130258, 0.27577711], jnp.float32)
    x = (x - mean) / std
    x = x.transpose(0, 3, 1, 2)                             # NCHW
    B, C, H, W = x.shape
    Gh, Gw = H // PATCH, W // PATCH
    patches = x.reshape(B, C, Gh, PATCH, Gw, PATCH)
    patches = patches.transpose(0, 2, 4, 1, 3, 5).reshape(
        B * Gh * Gw, C * PATCH * PATCH).astype(jnp.float32)

    vp, tp = params["visual"], params["text"]
    vb, tb = vp["block"], tp["block"]

    # token embedding gather (no clean Pallas equivalent) + positional emb
    tok_x = (tp["tok_emb"][text_tokens] + tp["pos_emb"][None]).reshape(
        B_TXT * CTX, WIDTH_T).astype(jnp.float32)

    # EOT-token selection as a one-hot matmul operand
    eot = jnp.argmax(text_tokens, axis=-1)
    flat_eot = jnp.arange(B_TXT) * CTX + eot
    eot_onehot = jax.nn.one_hot(flat_eot, B_TXT * CTX, dtype=jnp.float32)

    # class-token selection + image-batch mean as a single one-hot row
    cls_sel = jnp.zeros((1, B_IMG * S_V), jnp.float32)
    cls_sel = cls_sel.at[0, jnp.arange(B_IMG) * S_V].set(1.0 / B_IMG)

    def w(a):                                   # matmul weights -> bf16 (MXU)
        return a.astype(jnp.bfloat16)

    def r(a):                                   # 1-D params -> (1, N) f32
        return a.reshape(1, -1).astype(jnp.float32)

    inputs = [
        # vision
        patches, w(vp["patch_w"]), r(vp["class_emb"]),
        vp["pos_emb"].astype(jnp.float32),
        r(vp["ln_pre_g"]), r(vp["ln_pre_b"]),
        r(vb["ln1_g"]), r(vb["ln1_b"]),
        w(vb["w_qkv"]), r(vb["b_qkv"]),
        w(vb["w_out"]), r(vb["b_out"]),
        r(vb["ln2_g"]), r(vb["ln2_b"]),
        w(vb["w_fc"]), r(vb["b_fc"]),
        w(vb["w_proj"]), r(vb["b_proj"]),
        r(vp["ln_post_g"]), r(vp["ln_post_b"]),
        w(vp["proj"]), cls_sel,
        # text
        tok_x,
        r(tb["ln1_g"]), r(tb["ln1_b"]),
        w(tb["w_qkv"]), r(tb["b_qkv"]),
        w(tb["w_out"]), r(tb["b_out"]),
        r(tb["ln2_g"]), r(tb["ln2_b"]),
        w(tb["w_fc"]), r(tb["b_fc"]),
        w(tb["w_proj"]), r(tb["b_proj"]),
        r(tp["ln_f_g"]), r(tp["ln_f_b"]),
        w(tp["text_proj"]), eot_onehot,
    ]

    # TODO(synk): on v7x the independent image / text towers could be split
    # across the two TensorCores (pl.core_map / 2-point parallel grid); here
    # they run back-to-back inside one fused call (optimal for v5e/v6e).
    out = pl.pallas_call(
        _fused_clip_kernel,
        out_shape=jax.ShapeDtypeStruct((1, B_TXT), jnp.float32),
        in_specs=[pl.BlockSpec(memory_space=_VMEM)] * len(inputs),
        out_specs=pl.BlockSpec(memory_space=_VMEM),
        scratch_shapes=[
            pltpu.VMEM((B_IMG * S_V, WIDTH_V), jnp.float32),   # vision seq build
            pltpu.VMEM((B_IMG * S_V, WIDTH_V), jnp.float32),   # vision attn out
            pltpu.VMEM((B_TXT * CTX, WIDTH_T), jnp.float32),   # text attn out
        ],
        compiler_params=pltpu.CompilerParams(
            vmem_limit_bytes=32 * 1024 * 1024),
    )(*inputs)
    return out[0]                                            # (B_TXT,)


# ------------------------------ parameters -----------------------------------
def _nrm(key, shape, std=0.02):
    return (std * jax.random.normal(key, shape)).astype(jnp.float32)


def _init_block(key, d):
    ks = jax.random.split(key, 4)
    return dict(
        ln1_g=jnp.ones((d,), jnp.float32), ln1_b=jnp.zeros((d,), jnp.float32),
        w_qkv=_nrm(ks[0], (d, 3 * d)), b_qkv=jnp.zeros((3 * d,), jnp.float32),
        w_out=_nrm(ks[1], (d, d)), b_out=jnp.zeros((d,), jnp.float32),
        ln2_g=jnp.ones((d,), jnp.float32), ln2_b=jnp.zeros((d,), jnp.float32),
        w_fc=_nrm(ks[2], (d, 4 * d)), b_fc=jnp.zeros((4 * d,), jnp.float32),
        w_proj=_nrm(ks[3], (4 * d, d)), b_proj=jnp.zeros((d,), jnp.float32),
    )


def init_params(key):
    kv, kt = jax.random.split(key)
    kvs = jax.random.split(kv, 5)
    kts = jax.random.split(kt, 4)
    visual = dict(
        patch_w=_nrm(kvs[0], (3 * PATCH * PATCH, WIDTH_V)),
        class_emb=_nrm(kvs[1], (WIDTH_V,)),
        pos_emb=_nrm(kvs[2], (S_V, WIDTH_V)),
        ln_pre_g=jnp.ones((WIDTH_V,), jnp.float32),
        ln_pre_b=jnp.zeros((WIDTH_V,), jnp.float32),
        block=_init_block(kvs[3], WIDTH_V),
        ln_post_g=jnp.ones((WIDTH_V,), jnp.float32),
        ln_post_b=jnp.zeros((WIDTH_V,), jnp.float32),
        proj=_nrm(kvs[4], (WIDTH_V, EMBED)),
    )
    text = dict(
        tok_emb=_nrm(kts[0], (VOCAB, WIDTH_T)),
        pos_emb=_nrm(kts[1], (CTX, WIDTH_T)),
        block=_init_block(kts[2], WIDTH_T),
        ln_f_g=jnp.ones((WIDTH_T,), jnp.float32),
        ln_f_b=jnp.zeros((WIDTH_T,), jnp.float32),
        text_proj=_nrm(kts[3], (WIDTH_T, EMBED)),
    )
    return dict(visual=visual, text=text)


# --------------------------------- main ---------------------------------------
if __name__ == "__main__":
    key = jax.random.PRNGKey(0)
    pkey, ikey, tkey = jax.random.split(key, 3)

    params = init_params(pkey)
    # Raw uint8 HWC images (what Image.fromarray(img) expects in the reference).
    images = jax.random.randint(ikey, (B_IMG, IMG, IMG, 3), 0, 256, dtype=jnp.int32)
    images = images.astype(jnp.uint8)
    # Tokenized text labels.
    text_labels = jax.random.randint(tkey, (B_TXT, CTX), 1, VOCAB, dtype=jnp.int32)

    logits = jax.jit(clip_benchmark_forward)(text_labels, images, params)
    jax.block_until_ready(logits)
    assert logits.shape == (B_TXT,), logits.shape
    assert bool(jnp.all(jnp.isfinite(logits)))
    print("KERNEL_OK")
</pallas_src>

<mosaic_0001>
module attributes {stable_mosaic.version = 11 : i64} {
  func.func @_fused_clip_kernel(%arg0: memref<32x192xf32, #tpu.memory_space<vmem>>, %arg1: memref<192x32xbf16, #tpu.memory_space<vmem>>, %arg2: memref<1x32xf32, #tpu.memory_space<vmem>>, %arg3: memref<17x32xf32, #tpu.memory_space<vmem>>, %arg4: memref<1x32xf32, #tpu.memory_space<vmem>>, %arg5: memref<1x32xf32, #tpu.memory_space<vmem>>, %arg6: memref<1x32xf32, #tpu.memory_space<vmem>>, %arg7: memref<1x32xf32, #tpu.memory_space<vmem>>, %arg8: memref<32x96xbf16, #tpu.memory_space<vmem>>, %arg9: memref<1x96xf32, #tpu.memory_space<vmem>>, %arg10: memref<32x32xbf16, #tpu.memory_space<vmem>>, %arg11: memref<1x32xf32, #tpu.memory_space<vmem>>, %arg12: memref<1x32xf32, #tpu.memory_space<vmem>>, %arg13: memref<1x32xf32, #tpu.memory_space<vmem>>, %arg14: memref<32x128xbf16, #tpu.memory_space<vmem>>, %arg15: memref<1x128xf32, #tpu.memory_space<vmem>>, %arg16: memref<128x32xbf16, #tpu.memory_space<vmem>>, %arg17: memref<1x32xf32, #tpu.memory_space<vmem>>, %arg18: memref<1x32xf32, #tpu.memory_space<vmem>>, %arg19: memref<1x32xf32, #tpu.memory_space<vmem>>, %arg20: memref<32x32xbf16, #tpu.memory_space<vmem>>, %arg21: memref<1x34xf32, #tpu.memory_space<vmem>>, %arg22: memref<24x32xf32, #tpu.memory_space<vmem>>, %arg23: memref<1x32xf32, #tpu.memory_space<vmem>>, %arg24: memref<1x32xf32, #tpu.memory_space<vmem>>, %arg25: memref<32x96xbf16, #tpu.memory_space<vmem>>, %arg26: memref<1x96xf32, #tpu.memory_space<vmem>>, %arg27: memref<32x32xbf16, #tpu.memory_space<vmem>>, %arg28: memref<1x32xf32, #tpu.memory_space<vmem>>, %arg29: memref<1x32xf32, #tpu.memory_space<vmem>>, %arg30: memref<1x32xf32, #tpu.memory_space<vmem>>, %arg31: memref<32x128xbf16, #tpu.memory_space<vmem>>, %arg32: memref<1x128xf32, #tpu.memory_space<vmem>>, %arg33: memref<128x32xbf16, #tpu.memory_space<vmem>>, %arg34: memref<1x32xf32, #tpu.memory_space<vmem>>, %arg35: memref<1x32xf32, #tpu.memory_space<vmem>>, %arg36: memref<1x32xf32, #tpu.memory_space<vmem>>, %arg37: memref<32x32xbf16, #tpu.memory_space<vmem>>, %arg38: memref<3x24xf32, #tpu.memory_space<vmem>>, %arg39: memref<1x3xf32, #tpu.memory_space<vmem>>, %arg40: memref<34x32xf32, #tpu.memory_space<vmem>>, %arg41: memref<34x32xf32, #tpu.memory_space<vmem>>, %arg42: memref<24x32xf32, #tpu.memory_space<vmem>>) attributes {dimension_semantics = [], scalar_prefetch = 0 : i64, scratch_operands = 3 : i64, tpu.core_type = #tpu.core_type<tc>} {
    %c0 = arith.constant 0 : index
    %c0_0 = arith.constant 0 : index
    %0 = vector.load %arg0[%c0, %c0_0] : memref<32x192xf32, #tpu.memory_space<vmem>>, vector<32x192xf32>
    %c0_1 = arith.constant 0 : index
    %c0_2 = arith.constant 0 : index
    %1 = vector.load %arg1[%c0_1, %c0_2] : memref<192x32xbf16, #tpu.memory_space<vmem>>, vector<192x32xbf16>
    %2 = arith.truncf %0 : vector<32x192xf32> to vector<32x192xbf16>
    %cst = arith.constant dense<0.000000e+00> : vector<32x32xf32>
    %3 = tpu.matmul %2, %1, %cst {dimension_numbers = #tpu.dot_dimension_numbers<[1], [0], [0], [1], [0, 0, 1, 1], [], []>} : vector<32x192xbf16>, vector<192x32xbf16>, vector<32x32xf32> -> vector<32x32xf32>
    %c0_3 = arith.constant 0 : index
    %c0_4 = arith.constant 0 : index
    %4 = vector.load %arg3[%c0_3, %c0_4] : memref<17x32xf32, #tpu.memory_space<vmem>>, vector<17x32xf32>
    %c0_5 = arith.constant 0 : index
    %c0_6 = arith.constant 0 : index
    %5 = vector.load %arg2[%c0_5, %c0_6] : memref<1x32xf32, #tpu.memory_space<vmem>>, vector<1x32xf32>
    %6 = vector.extract_strided_slice %4 {offsets = [0, 0], sizes = [1, 32], strides = [1, 1]} : vector<17x32xf32> to vector<1x32xf32>
    %7 = arith.addf %5, %6 : vector<1x32xf32>
    %c0_7 = arith.constant 0 : index
    %c0_8 = arith.constant 0 : index
    %8 = vector.load %arg40[%c0_7, %c0_8] : memref<34x32xf32, #tpu.memory_space<vmem>>, vector<1x32xf32>
    tpu.vector_store %arg40[%c0_7, %c0_8], %7 {strides = array<i32>} : memref<34x32xf32, #tpu.memory_space<vmem>>, vector<1x32xf32>,
    %9 = vector.extract_strided_slice %3 {offsets = [0, 0], sizes = [16, 32], strides = [1, 1]} : vector<32x32xf32> to vector<16x32xf32>
    %10 = vector.extract_strided_slice %4 {offsets = [1, 0], sizes = [16, 32], strides = [1, 1]} : vector<17x32xf32> to vector<16x32xf32>
    %11 = arith.addf %9, %10 : vector<16x32xf32>
    %c1 = arith.constant 1 : index
    %c0_9 = arith.constant 0 : index
    %12 = vector.load %arg40[%c1, %c0_9] : memref<34x32xf32, #tpu.memory_space<vmem>>, vector<16x32xf32>
    tpu.vector_store %arg40[%c1, %c0_9], %11 {strides = array<i32>} : memref<34x32xf32, #tpu.memory_space<vmem>>, vector<16x32xf32>,
    %13 = vector.extract_strided_slice %4 {offsets = [0, 0], sizes = [1, 32], strides = [1, 1]} : vector<17x32xf32> to vector<1x32xf32>
    %14 = arith.addf %5, %13 : vector<1x32xf32>
    %c17 = arith.constant 17 : index
    %c0_10 = arith.constant 0 : index
    %15 = vector.load %arg40[%c17, %c0_10] : memref<34x32xf32, #tpu.memory_space<vmem>>, vector<1x32xf32>
    tpu.vector_store %arg40[%c17, %c0_10], %14 {strides = array<i32>} : memref<34x32xf32, #tpu.memory_space<vmem>>, vector<1x32xf32>,
    %16 = vector.extract_strided_slice %3 {offsets = [16, 0], sizes = [16, 32], strides = [1, 1]} : vector<32x32xf32> to vector<16x32xf32>
    %17 = vector.extract_strided_slice %4 {offsets = [1, 0], sizes = [16, 32], strides = [1, 1]} : vector<17x32xf32> to vector<16x32xf32>
    %18 = arith.addf %16, %17 : vector<16x32xf32>
    %c18 = arith.constant 18 : index
    %c0_11 = arith.constant 0 : index
    %19 = vector.load %arg40[%c18, %c0_11] : memref<34x32xf32, #tpu.memory_space<vmem>>, vector<16x32xf32>
    tpu.vector_store %arg40[%c18, %c0_11], %18 {strides = array<i32>} : memref<34x32xf32, #tpu.memory_space<vmem>>, vector<16x32xf32>,
    %c0_12 = arith.constant 0 : index
    %c0_13 = arith.constant 0 : index
    %20 = vector.load %arg40[%c0_12, %c0_13] : memref<34x32xf32, #tpu.memory_space<vmem>>, vector<34x32xf32>
    %cst_14 = arith.constant dense<0.000000e+00> : vector<34xf32>
    %21 = vector.multi_reduction <add>, %20, %cst_14 [1] : vector<34x32xf32> to vector<34xf32>
    %22 = vector.shape_cast %21 : vector<34xf32> to vector<34x1xf32>
    %cst_15 = arith.constant 3.200000e+01 : f32
    %23 = vector.broadcast %cst_15 : f32 to vector<34x1xf32>
    %24 = arith.divf %22, %23 : vector<34x1xf32>
    %25 = vector.broadcast %24 : vector<34x1xf32> to vector<34x32xf32>
    %26 = arith.subf %20, %25 : vector<34x32xf32>
    %27 = arith.mulf %26, %26 : vector<34x32xf32>
    %cst_16 = arith.constant dense<0.000000e+00> : vector<34xf32>
    %28 = vector.multi_reduction <add>, %27, %cst_16 [1] : vector<34x32xf32> to vector<34xf32>
    %29 = vector.shape_cast %28 : vector<34xf32> to vector<34x1xf32>
    %cst_17 = arith.constant 3.200000e+01 : f32
    %30 = vector.broadcast %cst_17 : f32 to vector<34x1xf32>
    %31 = arith.divf %29, %30 : vector<34x1xf32>
    %32 = vector.broadcast %24 : vector<34x1xf32> to vector<34x32xf32>
    %33 = arith.subf %20, %32 : vector<34x32xf32>
    %cst_18 = arith.constant 9.99999974E-6 : f32
    %34 = vector.broadcast %cst_18 : f32 to vector<34x1xf32>
    %35 = arith.addf %31, %34 : vector<34x1xf32>
    %36 = math.rsqrt %35 : vector<34x1xf32>
    %37 = vector.broadcast %36 : vector<34x1xf32> to vector<34x32xf32>
    %38 = arith.mulf %33, %37 : vector<34x32xf32>
    %c0_19 = arith.constant 0 : index
    %c0_20 = arith.constant 0 : index
    %39 = vector.load %arg4[%c0_19, %c0_20] : memref<1x32xf32, #tpu.memory_space<vmem>>, vector<1x32xf32>
    %40 = vector.broadcast %39 : vector<1x32xf32> to vector<34x32xf32>
    %41 = arith.mulf %38, %40 : vector<34x32xf32>
    %c0_21 = arith.constant 0 : index
    %c0_22 = arith.constant 0 : index
    %42 = vector.load %arg5[%c0_21, %c0_22] : memref<1x32xf32, #tpu.memory_space<vmem>>, vector<1x32xf32>
    %43 = vector.broadcast %42 : vector<1x32xf32> to vector<34x32xf32>
    %44 = arith.addf %41, %43 : vector<34x32xf32>
    %cst_23 = arith.constant dense<0.000000e+00> : vector<34xf32>
    %45 = vector.multi_reduction <add>, %44, %cst_23 [1] : vector<34x32xf32> to vector<34xf32>
    %46 = vector.shape_cast %45 : vector<34xf32> to vector<34x1xf32>
    %cst_24 = arith.constant 3.200000e+01 : f32
    %47 = vector.broadcast %cst_24 : f32 to vector<34x1xf32>
    %48 = arith.divf %46, %47 : vector<34x1xf32>
    %49 = vector.broadcast %48 : vector<34x1xf32> to vector<34x32xf32>
    %50 = arith.subf %44, %49 : vector<34x32xf32>
    %51 = arith.mulf %50, %50 : vector<34x32xf32>
    %cst_25 = arith.constant dense<0.000000e+00> : vector<34xf32>
    %52 = vector.multi_reduction <add>, %51, %cst_25 [1] : vector<34x32xf32> to vector<34xf32>
    %53 = vector.shape_cast %52 : vector<34xf32> to vector<34x1xf32>
    %cst_26 = arith.constant 3.200000e+01 : f32
    %54 = vector.broadcast %cst_26 : f32 to vector<34x1xf32>
    %55 = arith.divf %53, %54 : vector<34x1xf32>
    %56 = vector.broadcast %48 : vector<34x1xf32> to vector<34x32xf32>
    %57 = arith.subf %44, %56 : vector<34x32xf32>
    %cst_27 = arith.constant 9.99999974E-6 : f32
    %58 = vector.broadcast %cst_27 : f32 to vector<34x1xf32>
    %59 = arith.addf %55, %58 : vector<34x1xf32>
    %60 = math.rsqrt %59 : vector<34x1xf32>
    %61 = vector.broadcast %60 : vector<34x1xf32> to vector<34x32xf32>
    %62 = arith.mulf %57, %61 : vector<34x32xf32>
    %c0_28 = arith.constant 0 : index
    %c0_29 = arith.constant 0 : index
    %63 = vector.load %arg6[%c0_28, %c0_29] : memref<1x32xf32, #tpu.memory_space<vmem>>, vector<1x32xf32>
    %64 = vector.broadcast %63 : vector<1x32xf32> to vector<34x32xf32>
    %65 = arith.mulf %62, %64 : vector<34x32xf32>
    %c0_30 = arith.constant 0 : index
    %c0_31 = arith.constant 0 : index
    %66 = vector.load %arg7[%c0_30, %c0_31] : memref<1x32xf32, #tpu.memory_space<vmem>>, vector<1x32xf32>
    %67 = vector.broadcast %66 : vector<1x32xf32> to vector<34x32xf32>
    %68 = arith.addf %65, %67 : vector<34x32xf32>
    %c0_32 = arith.constant 0 : index
    %c0_33 = arith.constant 0 : index
    %69 = vector.load %arg8[%c0_32, %c0_33] : memref<32x96xbf16, #tpu.memory_space<vmem>>, vector<32x96xbf16>
    %70 = arith.truncf %68 : vector<34x32xf32> to vector<34x32xbf16>
    %cst_34 = arith.constant dense<0.000000e+00> : vector<34x96xf32>
    %71 = tpu.matmul %70, %69, %cst_34 {dimension_numbers = #tpu.dot_dimension_numbers<[1], [0], [0], [1], [0, 0, 1, 1], [], []>} : vector<34x32xbf16>, vector<32x96xbf16>, vector<34x96xf32> -> vector<34x96xf32>
    %c0_35 = arith.constant 0 : index
    %c0_36 = arith.constant 0 : index
    %72 = vector.load %arg9[%c0_35, %c0_36] : memref<1x96xf32, #tpu.memory_space<vmem>>, vector<1x96xf32>
    %73 = vector.broadcast %72 : vector<1x96xf32> to vector<34x96xf32>
    %74 = arith.addf %71, %73 : vector<34x96xf32>
    %75 = vector.extract_strided_slice %74 {offsets = [0, 0], sizes = [17, 96], strides = [1, 1]} : vector<34x96xf32> to vector<17x96xf32>
    %76 = vector.extract_strided_slice %75 {offsets = [0, 0], sizes = [17, 32], strides = [1, 1]} : vector<17x96xf32> to vector<17x32xf32>
    %77 = vector.extract_strided_slice %75 {offsets = [0, 32], sizes = [17, 32], strides = [1, 1]} : vector<17x96xf32> to vector<17x32xf32>
    %78 = vector.extract_strided_slice %75 {offsets = [0, 64], sizes = [17, 32], strides = [1, 1]} : vector<17x96xf32> to vector<17x32xf32>
    %79 = vector.extract_strided_slice %76 {offsets = [0, 0], sizes = [17, 8], strides = [1, 1]} : vector<17x32xf32> to vector<17x8xf32>
    %80 = vector.extract_strided_slice %77 {offsets = [0, 0], sizes = [17, 8], strides = [1, 1]} : vector<17x32xf32> to vector<17x8xf32>
    %81 = vector.extract_strided_slice %78 {offsets = [0, 0], sizes = [17, 8], strides = [1, 1]} : vector<17x32xf32> to vector<17x8xf32>
    %82 = arith.truncf %79 : vector<17x8xf32> to vector<17x8xbf16>
    %83 = arith.truncf %80 : vector<17x8xf32> to vector<17x8xbf16>
    %cst_37 = arith.constant dense<0.000000e+00> : vector<17x17xf32>
    %84 = tpu.matmul %82, %83, %cst_37 {dimension_numbers = #tpu.dot_dimension_numbers<[1], [1], [0], [0], [0, 0, 1, 0], [], []>} : vector<17x8xbf16>, vector<17x8xbf16>, vector<17x17xf32> -> vector<17x17xf32>
    %cst_38 = arith.constant 0.353553385 : f32
    %85 = vector.broadcast %cst_38 : f32 to vector<17x17xf32>
    %86 = arith.mulf %84, %85 : vector<17x17xf32>
    %cst_39 = arith.constant dense<0xFF800000> : vector<17xf32>
    %87 = vector.multi_reduction <maximumf>, %86, %cst_39 [1] : vector<17x17xf32> to vector<17xf32>
    %88 = vector.shape_cast %87 : vector<17xf32> to vector<17x1xf32>
    %89 = vector.broadcast %88 : vector<17x1xf32> to vector<17x17xf32>
    %90 = arith.subf %86, %89 : vector<17x17xf32>
    %91 = math.exp %90 : vector<17x17xf32>
    %cst_40 = arith.constant dense<0.000000e+00> : vector<17xf32>
    %92 = vector.multi_reduction <add>, %91, %cst_40 [1] : vector<17x17xf32> to vector<17xf32>
    %93 = vector.shape_cast %92 : vector<17xf32> to vector<17x1xf32>
    %94 = tpu.reciprocal %93 {approx = true} : vector<17x1xf32> -> vector<17x1xf32>
    %95 = vector.broadcast %94 : vector<17x1xf32> to vector<17x17xf32>
    %96 = arith.mulf %91, %95 : vector<17x17xf32>
    %97 = arith.truncf %96 : vector<17x17xf32> to vector<17x17xbf16>
    %98 = arith.truncf %81 : vector<17x8xf32> to vector<17x8xbf16>
    %cst_41 = arith.constant dense<0.000000e+00> : vector<17x8xf32>
    %99 = tpu.matmul %97, %98, %cst_41 {dimension_numbers = #tpu.dot_dimension_numbers<[1], [0], [0], [1], [0, 0, 1, 1], [], []>} : vector<17x17xbf16>, vector<17x8xbf16>, vector<17x8xf32> -> vector<17x8xf32>
    %c0_42 = arith.constant 0 : index
    %c0_43 = arith.constant 0 : index
    %100 = vector.load %arg41[%c0_42, %c0_43] : memref<34x32xf32, #tpu.memory_space<vmem>>, vector<17x8xf32>
    tpu.vector_store %arg41[%c0_42, %c0_43], %99 {strides = array<i32>} : memref<34x32xf32, #tpu.memory_space<vmem>>, vector<17x8xf32>,
    %101 = vector.extract_strided_slice %76 {offsets = [0, 8], sizes = [17, 8], strides = [1, 1]} : vector<17x32xf32> to vector<17x8xf32>
    %102 = vector.extract_strided_slice %77 {offsets = [0, 8], sizes = [17, 8], strides = [1, 1]} : vector<17x32xf32> to vector<17x8xf32>
    %103 = vector.extract_strided_slice %78 {offsets = [0, 8], sizes = [17, 8], strides = [1, 1]} : vector<17x32xf32> to vector<17x8xf32>
    %104 = arith.truncf %101 : vector<17x8xf32> to vector<17x8xbf16>
    %105 = arith.truncf %102 : vector<17x8xf32> to vector<17x8xbf16>
    %cst_44 = arith.constant dense<0.000000e+00> : vector<17x17xf32>
    %106 = tpu.matmul %104, %105, %cst_44 {dimension_numbers = #tpu.dot_dimension_numbers<[1], [1], [0], [0], [0, 0, 1, 0], [], []>} : vector<17x8xbf16>, vector<17x8xbf16>, vector<17x17xf32> -> vector<17x17xf32>
    %cst_45 = arith.constant 0.353553385 : f32
    %107 = vector.broadcast %cst_45 : f32 to vector<17x17xf32>
    %108 = arith.mulf %106, %107 : vector<17x17xf32>
    %cst_46 = arith.constant dense<0xFF800000> : vector<17xf32>
    %109 = vector.multi_reduction <maximumf>, %108, %cst_46 [1] : vector<17x17xf32> to vector<17xf32>
    %110 = vector.shape_cast %109 : vector<17xf32> to vector<17x1xf32>
    %111 = vector.broadcast %110 : vector<17x1xf32> to vector<17x17xf32>
    %112 = arith.subf %108, %111 : vector<17x17xf32>
    %113 = math.exp %112 : vector<17x17xf32>
    %cst_47 = arith.constant dense<0.000000e+00> : vector<17xf32>
    %114 = vector.multi_reduction <add>, %113, %cst_47 [1] : vector<17x17xf32> to vector<17xf32>
    %115 = vector.shape_cast %114 : vector<17xf32> to vector<17x1xf32>
    %116 = tpu.reciprocal %115 {approx = true} : vector<17x1xf32> -> vector<17x1xf32>
    %117 = vector.broadcast %116 : vector<17x1xf32> to vector<17x17xf32>
    %118 = arith.mulf %113, %117 : vector<17x17xf32>
    %119 = arith.truncf %118 : vector<17x17xf32> to vector<17x17xbf16>
    %120 = arith.truncf %103 : vector<17x8xf32> to vector<17x8xbf16>
    %cst_48 = arith.constant dense<0.000000e+00> : vector<17x8xf32>
    %121 = tpu.matmul %119, %120, %cst_48 {dimension_numbers = #tpu.dot_dimension_numbers<[1], [0], [0], [1], [0, 0, 1, 1], [], []>} : vector<17x17xbf16>, vector<17x8xbf16>, vector<17x8xf32> -> vector<17x8xf32>
    %c0_49 = arith.constant 0 : index
    %c8 = arith.constant 8 : index
    %122 = vector.load %arg41[%c0_49, %c8] : memref<34x32xf32, #tpu.memory_space<vmem>>, vector<17x8xf32>
    tpu.vector_store %arg41[%c0_49, %c8], %121 {strides = array<i32>} : memref<34x32xf32, #tpu.memory_space<vmem>>, vector<17x8xf32>,
    %123 = vector.extract_strided_slice %76 {offsets = [0, 16], sizes = [17, 8], strides = [1, 1]} : vector<17x32xf32> to vector<17x8xf32>
    %124 = vector.extract_strided_slice %77 {offsets = [0, 16], sizes = [17, 8], strides = [1, 1]} : vector<17x32xf32> to vector<17x8xf32>
    %125 = vector.extract_strided_slice %78 {offsets = [0, 16], sizes = [17, 8], strides = [1, 1]} : vector<17x32xf32> to vector<17x8xf32>
    %126 = arith.truncf %123 : vector<17x8xf32> to vector<17x8xbf16>
    %127 = arith.truncf %124 : vector<17x8xf32> to vector<17x8xbf16>
    %cst_50 = arith.constant dense<0.000000e+00> : vector<17x17xf32>
    %128 = tpu.matmul %126, %127, %cst_50 {dimension_numbers = #tpu.dot_dimension_numbers<[1], [1], [0], [0], [0, 0, 1, 0], [], []>} : vector<17x8xbf16>, vector<17x8xbf16>, vector<17x17xf32> -> vector<17x17xf32>
    %cst_51 = arith.constant 0.353553385 : f32
    %129 = vector.broadcast %cst_51 : f32 to vector<17x17xf32>
    %130 = arith.mulf %128, %129 : vector<17x17xf32>
    %cst_52 = arith.constant dense<0xFF800000> : vector<17xf32>
    %131 = vector.multi_reduction <maximumf>, %130, %cst_52 [1] : vector<17x17xf32> to vector<17xf32>
    %132 = vector.shape_cast %131 : vector<17xf32> to vector<17x1xf32>
    %133 = vector.broadcast %132 : vector<17x1xf32> to vector<17x17xf32>
    %134 = arith.subf %130, %133 : vector<17x17xf32>
    %135 = math.exp %134 : vector<17x17xf32>
    %cst_53 = arith.constant dense<0.000000e+00> : vector<17xf32>
    %136 = vector.multi_reduction <add>, %135, %cst_53 [1] : vector<17x17xf32> to vector<17xf32>
    %137 = vector.shape_cast %136 : vector<17xf32> to vector<17x1xf32>
    %138 = tpu.reciprocal %137 {approx = true} : vector<17x1xf32> -> vector<17x1xf32>
    %139 = vector.broadcast %138 : vector<17x1xf32> to vector<17x17xf32>
    %140 = arith.mulf %135, %139 : vector<17x17xf32>
    %141 = arith.truncf %140 : vector<17x17xf32> to vector<17x17xbf16>
    %142 = arith.truncf %125 : vector<17x8xf32> to vector<17x8xbf16>
    %cst_54 = arith.constant dense<0.000000e+00> : vector<17x8xf32>
    %143 = tpu.matmul %141, %142, %cst_54 {dimension_numbers = #tpu.dot_dimension_numbers<[1], [0], [0], [1], [0, 0, 1, 1], [], []>} : vector<17x17xbf16>, vector<17x8xbf16>, vector<17x8xf32> -> vector<17x8xf32>
    %c0_55 = arith.constant 0 : index
    %c16 = arith.constant 16 : index
    %144 = vector.load %arg41[%c0_55, %c16] : memref<34x32xf32, #tpu.memory_space<vmem>>, vector<17x8xf32>
    tpu.vector_store %arg41[%c0_55, %c16], %143 {strides = array<i32>} : memref<34x32xf32, #tpu.memory_space<vmem>>, vector<17x8xf32>,
    %145 = vector.extract_strided_slice %76 {offsets = [0, 24], sizes = [17, 8], strides = [1, 1]} : vector<17x32xf32> to vector<17x8xf32>
    %146 = vector.extract_strided_slice %77 {offsets = [0, 24], sizes = [17, 8], strides = [1, 1]} : vector<17x32xf32> to vector<17x8xf32>
    %147 = vector.extract_strided_slice %78 {offsets = [0, 24], sizes = [17, 8], strides = [1, 1]} : vector<17x32xf32> to vector<17x8xf32>
    %148 = arith.truncf %145 : vector<17x8xf32> to vector<17x8xbf16>
    %149 = arith.truncf %146 : vector<17x8xf32> to vector<17x8xbf16>
    %cst_56 = arith.constant dense<0.000000e+00> : vector<17x17xf32>
    %150 = tpu.matmul %148, %149, %cst_56 {dimension_numbers = #tpu.dot_dimension_numbers<[1], [1], [0], [0], [0, 0, 1, 0], [], []>} : vector<17x8xbf16>, vector<17x8xbf16>, vector<17x17xf32> -> vector<17x17xf32>
    %cst_57 = arith.constant 0.353553385 : f32
    %151 = vector.broadcast %cst_57 : f32 to vector<17x17xf32>
    %152 = arith.mulf %150, %151 : vector<17x17xf32>
    %cst_58 = arith.constant dense<0xFF800000> : vector<17xf32>
    %153 = vector.multi_reduction <maximumf>, %152, %cst_58 [1] : vector<17x17xf32> to vector<17xf32>
    %154 = vector.shape_cast %153 : vector<17xf32> to vector<17x1xf32>
    %155 = vector.broadcast %154 : vector<17x1xf32> to vector<17x17xf32>
    %156 = arith.subf %152, %155 : vector<17x17xf32>
    %157 = math.exp %156 : vector<17x17xf32>
    %cst_59 = arith.constant dense<0.000000e+00> : vector<17xf32>
    %158 = vector.multi_reduction <add>, %157, %cst_59 [1] : vector<17x17xf32> to vector<17xf32>
    %159 = vector.shape_cast %158 : vector<17xf32> to vector<17x1xf32>
    %160 = tpu.reciprocal %159 {approx = true} : vector<17x1xf32> -> vector<17x1xf32>
    %161 = vector.broadcast %160 : vector<17x1xf32> to vector<17x17xf32>
    %162 = arith.mulf %157, %161 : vector<17x17xf32>
    %163 = arith.truncf %162 : vector<17x17xf32> to vector<17x17xbf16>
    %164 = arith.truncf %147 : vector<17x8xf32> to vector<17x8xbf16>
    %cst_60 = arith.constant dense<0.000000e+00> : vector<17x8xf32>
    %165 = tpu.matmul %163, %164, %cst_60 {dimension_numbers = #tpu.dot_dimension_numbers<[1], [0], [0], [1], [0, 0, 1, 1], [], []>} : vector<17x17xbf16>, vector<17x8xbf16>, vector<17x8xf32> -> vector<17x8xf32>
    %c0_61 = arith.constant 0 : index
    %c24 = arith.constant 24 : index
    %166 = vector.load %arg41[%c0_61, %c24] : memref<34x32xf32, #tpu.memory_space<vmem>>, vector<17x8xf32>
    tpu.vector_store %arg41[%c0_61, %c24], %165 {strides = array<i32>} : memref<34x32xf32, #tpu.memory_space<vmem>>, vector<17x8xf32>,
    %167 = vector.extract_strided_slice %74 {offsets = [17, 0], sizes = [17, 96], strides = [1, 1]} : vector<34x96xf32> to vector<17x96xf32>
    %168 = vector.extract_strided_slice %167 {offsets = [0, 0], sizes = [17, 32], strides = [1, 1]} : vector<17x96xf32> to vector<17x32xf32>
    %169 = vector.extract_strided_slice %167 {offsets = [0, 32], sizes = [17, 32], strides = [1, 1]} : vector<17x96xf32> to vector<17x32xf32>
    %170 = vector.extract_strided_slice %167 {offsets = [0, 64], sizes = [17, 32], strides = [1, 1]} : vector<17x96xf32> to vector<17x32xf32>
    %171 = vector.extract_strided_slice %168 {offsets = [0, 0], sizes = [17, 8], strides = [1, 1]} : vector<17x32xf32> to vector<17x8xf32>
    %172 = vector.extract_strided_slice %169 {offsets = [0, 0], sizes = [17, 8], strides = [1, 1]} : vector<17x32xf32> to vector<17x8xf32>
    %173 = vector.extract_strided_slice %170 {offsets = [0, 0], sizes = [17, 8], strides = [1, 1]} : vector<17x32xf32> to vector<17x8xf32>
    %174 = arith.truncf %171 : vector<17x8xf32> to vector<17x8xbf16>
    %175 = arith.truncf %172 : vector<17x8xf32> to vector<17x8xbf16>
    %cst_62 = arith.constant dense<0.000000e+00> : vector<17x17xf32>
    %176 = tpu.matmul %174, %175, %cst_62 {dimension_numbers = #tpu.dot_dimension_numbers<[1], [1], [0], [0], [0, 0, 1, 0], [], []>} : vector<17x8xbf16>, vector<17x8xbf16>, vector<17x17xf32> -> vector<17x17xf32>
    %cst_63 = arith.constant 0.353553385 : f32
    %177 = vector.broadcast %cst_63 : f32 to vector<17x17xf32>
    %178 = arith.mulf %176, %177 : vector<17x17xf32>
    %cst_64 = arith.constant dense<0xFF800000> : vector<17xf32>
    %179 = vector.multi_reduction <maximumf>, %178, %cst_64 [1] : vector<17x17xf32> to vector<17xf32>
    %180 = vector.shape_cast %179 : vector<17xf32> to vector<17x1xf32>
    %181 = vector.broadcast %180 : vector<17x1xf32> to vector<17x17xf32>
    %182 = arith.subf %178, %181 : vector<17x17xf32>
    %183 = math.exp %182 : vector<17x17xf32>
    %cst_65 = arith.constant dense<0.000000e+00> : vector<17xf32>
    %184 = vector.multi_reduction <add>, %183, %cst_65 [1] : vector<17x17xf32> to vector<17xf32>
    %185 = vector.shape_cast %184 : vector<17xf32> to vector<17x1xf32>
    %186 = tpu.reciprocal %185 {approx = true} : vector<17x1xf32> -> vector<17x1xf32>
    %187 = vector.broadcast %186 : vector<17x1xf32> to vector<17x17xf32>
    %188 = arith.mulf %183, %187 : vector<17x17xf32>
    %189 = arith.truncf %188 : vector<17x17xf32> to vector<17x17xbf16>
    %190 = arith.truncf %173 : vector<17x8xf32> to vector<17x8xbf16>
    %cst_66 = arith.constant dense<0.000000e+00> : vector<17x8xf32>
    %191 = tpu.matmul %189, %190, %cst_66 {dimension_numbers = #tpu.dot_dimension_numbers<[1], [0], [0], [1], [0, 0, 1, 1], [], []>} : vector<17x17xbf16>, vector<17x8xbf16>, vector<17x8xf32> -> vector<17x8xf32>
    %c17_67 = arith.constant 17 : index
    %c0_68 = arith.constant 0 : index
    %192 = vector.load %arg41[%c17_67, %c0_68] : memref<34x32xf32, #tpu.memory_space<vmem>>, vector<17x8xf32>
    tpu.vector_store %arg41[%c17_67, %c0_68], %191 {strides = array<i32>} : memref<34x32xf32, #tpu.memory_space<vmem>>, vector<17x8xf32>,
    %193 = vector.extract_strided_slice %168 {offsets = [0, 8], sizes = [17, 8], strides = [1, 1]} : vector<17x32xf32> to vector<17x8xf32>
    %194 = vector.extract_strided_slice %169 {offsets = [0, 8], sizes = [17, 8], strides = [1, 1]} : vector<17x32xf32> to vector<17x8xf32>
    %195 = vector.extract_strided_slice %170 {offsets = [0, 8], sizes = [17, 8], strides = [1, 1]} : vector<17x32xf32> to vector<17x8xf32>
    %196 = arith.truncf %193 : vector<17x8xf32> to vector<17x8xbf16>
    %197 = arith.truncf %194 : vector<17x8xf32> to vector<17x8xbf16>
    %cst_69 = arith.constant dense<0.000000e+00> : vector<17x17xf32>
    %198 = tpu.matmul %196, %197, %cst_69 {dimension_numbers = #tpu.dot_dimension_numbers<[1], [1], [0], [0], [0, 0, 1, 0], [], []>} : vector<17x8xbf16>, vector<17x8xbf16>, vector<17x17xf32> -> vector<17x17xf32>
    %cst_70 = arith.constant 0.353553385 : f32
    %199 = vector.broadcast %cst_70 : f32 to vector<17x17xf32>
    %200 = arith.mulf %198, %199 : vector<17x17xf32>
    %cst_71 = arith.constant dense<0xFF800000> : vector<17xf32>
    %201 = vector.multi_reduction <maximumf>, %200, %cst_71 [1] : vector<17x17xf32> to vector<17xf32>
    %202 = vector.shape_cast %201 : vector<17xf32> to vector<17x1xf32>
    %203 = vector.broadcast %202 : vector<17x1xf32> to vector<17x17xf32>
    %204 = arith.subf %200, %203 : vector<17x17xf32>
    %205 = math.exp %204 : vector<17x17xf32>
    %cst_72 = arith.constant dense<0.000000e+00> : vector<17xf32>
    %206 = vector.multi_reduction <add>, %205, %cst_72 [1] : vector<17x17xf32> to vector<17xf32>
    %207 = vector.shape_cast %206 : vector<17xf32> to vector<17x1xf32>
    %208 = tpu.reciprocal %207 {approx = true} : vector<17x1xf32> -> vector<17x1xf32>
    %209 = vector.broadcast %208 : vector<17x1xf32> to vector<17x17xf32>
    %210 = arith.mulf %205, %209 : vector<17x17xf32>
    %211 = arith.truncf %210 : vector<17x17xf32> to vector<17x17xbf16>
    %212 = arith.truncf %195 : vector<17x8xf32> to vector<17x8xbf16>
    %cst_73 = arith.constant dense<0.000000e+00> : vector<17x8xf32>
    %213 = tpu.matmul %211, %212, %cst_73 {dimension_numbers = #tpu.dot_dimension_numbers<[1], [0], [0], [1], [0, 0, 1, 1], [], []>} : vector<17x17xbf16>, vector<17x8xbf16>, vector<17x8xf32> -> vector<17x8xf32>
    %c17_74 = arith.constant 17 : index
    %c8_75 = arith.constant 8 : index
    %214 = vector.load %arg41[%c17_74, %c8_75] : memref<34x32xf32, #tpu.memory_space<vmem>>, vector<17x8xf32>
    tpu.vector_store %arg41[%c17_74, %c8_75], %213 {strides = array<i32>} : memref<34x32xf32, #tpu.memory_space<vmem>>, vector<17x8xf32>,
    %215 = vector.extract_strided_slice %168 {offsets = [0, 16], sizes = [17, 8], strides = [1, 1]} : vector<17x32xf32> to vector<17x8xf32>
    %216 = vector.extract_strided_slice %169 {offsets = [0, 16], sizes = [17, 8], strides = [1, 1]} : vector<17x32xf32> to vector<17x8xf32>
    %217 = vector.extract_strided_slice %170 {offsets = [0, 16], sizes = [17, 8], strides = [1, 1]} : vector<17x32xf32> to vector<17x8xf32>
    %218 = arith.truncf %215 : vector<17x8xf32> to vector<17x8xbf16>
    %219 = arith.truncf %216 : vector<17x8xf32> to vector<17x8xbf16>
    %cst_76 = arith.constant dense<0.000000e+00> : vector<17x17xf32>
    %220 = tpu.matmul %218, %219, %cst_76 {dimension_numbers = #tpu.dot_dimension_numbers<[1], [1], [0], [0], [0, 0, 1, 0], [], []>} : vector<17x8xbf16>, vector<17x8xbf16>, vector<17x17xf32> -> vector<17x17xf32>
    %cst_77 = arith.constant 0.353553385 : f32
    %221 = vector.broadcast %cst_77 : f32 to vector<17x17xf32>
    %222 = arith.mulf %220, %221 : vector<17x17xf32>
    %cst_78 = arith.constant dense<0xFF800000> : vector<17xf32>
    %223 = vector.multi_reduction <maximumf>, %222, %cst_78 [1] : vector<17x17xf32> to vector<17xf32>
    %224 = vector.shape_cast %223 : vector<17xf32> to vector<17x1xf32>
    %225 = vector.broadcast %224 : vector<17x1xf32> to vector<17x17xf32>
    %226 = arith.subf %222, %225 : vector<17x17xf32>
    %227 = math.exp %226 : vector<17x17xf32>
    %cst_79 = arith.constant dense<0.000000e+00> : vector<17xf32>
    %228 = vector.multi_reduction <add>, %227, %cst_79 [1] : vector<17x17xf32> to vector<17xf32>
    %229 = vector.shape_cast %228 : vector<17xf32> to vector<17x1xf32>
    %230 = tpu.reciprocal %229 {approx = true} : vector<17x1xf32> -> vector<17x1xf32>
    %231 = vector.broadcast %230 : vector<17x1xf32> to vector<17x17xf32>
    %232 = arith.mulf %227, %231 : vector<17x17xf32>
    %233 = arith.truncf %232 : vector<17x17xf32> to vector<17x17xbf16>
    %234 = arith.truncf %217 : vector<17x8xf32> to vector<17x8xbf16>
    %cst_80 = arith.constant dense<0.000000e+00> : vector<17x8xf32>
    %235 = tpu.matmul %233, %234, %cst_80 {dimension_numbers = #tpu.dot_dimension_numbers<[1], [0], [0], [1], [0, 0, 1, 1], [], []>} : vector<17x17xbf16>, vector<17x8xbf16>, vector<17x8xf32> -> vector<17x8xf32>
    %c17_81 = arith.constant 17 : index
    %c16_82 = arith.constant 16 : index
    %236 = vector.load %arg41[%c17_81, %c16_82] : memref<34x32xf32, #tpu.memory_space<vmem>>, vector<17x8xf32>
    tpu.vector_store %arg41[%c17_81, %c16_82], %235 {strides = array<i32>} : memref<34x32xf32, #tpu.memory_space<vmem>>, vector<17x8xf32>,
    %237 = vector.extract_strided_slice %168 {offsets = [0, 24], sizes = [17, 8], strides = [1, 1]} : vector<17x32xf32> to vector<17x8xf32>
    %238 = vector.extract_strided_slice %169 {offsets = [0, 24], sizes = [17, 8], strides = [1, 1]} : vector<17x32xf32> to vector<17x8xf32>
    %239 = vector.extract_strided_slice %170 {offsets = [0, 24], sizes = [17, 8], strides = [1, 1]} : vector<17x32xf32> to vector<17x8xf32>
    %240 = arith.truncf %237 : vector<17x8xf32> to vector<17x8xbf16>
    %241 = arith.truncf %238 : vector<17x8xf32> to vector<17x8xbf16>
    %cst_83 = arith.constant dense<0.000000e+00> : vector<17x17xf32>
    %242 = tpu.matmul %240, %241, %cst_83 {dimension_numbers = #tpu.dot_dimension_numbers<[1], [1], [0], [0], [0, 0, 1, 0], [], []>} : vector<17x8xbf16>, vector<17x8xbf16>, vector<17x17xf32> -> vector<17x17xf32>
    %cst_84 = arith.constant 0.353553385 : f32
    %243 = vector.broadcast %cst_84 : f32 to vector<17x17xf32>
    %244 = arith.mulf %242, %243 : vector<17x17xf32>
    %cst_85 = arith.constant dense<0xFF800000> : vector<17xf32>
    %245 = vector.multi_reduction <maximumf>, %244, %cst_85 [1] : vector<17x17xf32> to vector<17xf32>
    %246 = vector.shape_cast %245 : vector<17xf32> to vector<17x1xf32>
    %247 = vector.broadcast %246 : vector<17x1xf32> to vector<17x17xf32>
    %248 = arith.subf %244, %247 : vector<17x17xf32>
    %249 = math.exp %248 : vector<17x17xf32>
    %cst_86 = arith.constant dense<0.000000e+00> : vector<17xf32>
    %250 = vector.multi_reduction <add>, %249, %cst_86 [1] : vector<17x17xf32> to vector<17xf32>
    %251 = vector.shape_cast %250 : vector<17xf32> to vector<17x1xf32>
    %252 = tpu.reciprocal %251 {approx = true} : vector<17x1xf32> -> vector<17x1xf32>
    %253 = vector.broadcast %252 : vector<17x1xf32> to vector<17x17xf32>
    %254 = arith.mulf %249, %253 : vector<17x17xf32>
    %255 = arith.truncf %254 : vector<17x17xf32> to vector<17x17xbf16>
    %256 = arith.truncf %239 : vector<17x8xf32> to vector<17x8xbf16>
    %cst_87 = arith.constant dense<0.000000e+00> : vector<17x8xf32>
    %257 = tpu.matmul %255, %256, %cst_87 {dimension_numbers = #tpu.dot_dimension_numbers<[1], [0], [0], [1], [0, 0, 1, 1], [], []>} : vector<17x17xbf16>, vector<17x8xbf16>, vector<17x8xf32> -> vector<17x8xf32>
    %c17_88 = arith.constant 17 : index
    %c24_89 = arith.constant 24 : index
    %258 = vector.load %arg41[%c17_88, %c24_89] : memref<34x32xf32, #tpu.memory_space<vmem>>, vector<17x8xf32>
    tpu.vector_store %arg41[%c17_88, %c24_89], %257 {strides = array<i32>} : memref<34x32xf32, #tpu.memory_space<vmem>>, vector<17x8xf32>,
    %c0_90 = arith.constant 0 : index
    %c0_91 = arith.constant 0 : index
    %259 = vector.load %arg41[%c0_90, %c0_91] : memref<34x32xf32, #tpu.memory_space<vmem>>, vector<34x32xf32>
    %c0_92 = arith.constant 0 : index
    %c0_93 = arith.constant 0 : index
    %260 = vector.load %arg10[%c0_92, %c0_93] : memref<32x32xbf16, #tpu.memory_space<vmem>>, vector<32x32xbf16>
    %261 = arith.truncf %259 : vector<34x32xf32> to vector<34x32xbf16>
    %cst_94 = arith.constant dense<0.000000e+00> : vector<34x32xf32>
    %262 = tpu.matmul %261, %260, %cst_94 {dimension_numbers = #tpu.dot_dimension_numbers<[1], [0], [0], [1], [0, 0, 1, 1], [], []>} : vector<34x32xbf16>, vector<32x32xbf16>, vector<34x32xf32> -> vector<34x32xf32>
    %c0_95 = arith.constant 0 : index
    %c0_96 = arith.constant 0 : index
    %263 = vector.load %arg11[%c0_95, %c0_96] : memref<1x32xf32, #tpu.memory_space<vmem>>, vector<1x32xf32>
    %264 = vector.broadcast %263 : vector<1x32xf32> to vector<34x32xf32>
    %265 = arith.addf %262, %264 : vector<34x32xf32>
    %266 = arith.addf %44, %265 : vector<34x32xf32>
    %cst_97 = arith.constant dense<0.000000e+00> : vector<34xf32>
    %267 = vector.multi_reduction <add>, %266, %cst_97 [1] : vector<34x32xf32> to vector<34xf32>
    %268 = vector.shape_cast %267 : vector<34xf32> to vector<34x1xf32>
    %cst_98 = arith.constant 3.200000e+01 : f32
    %269 = vector.broadcast %cst_98 : f32 to vector<34x1xf32>
    %270 = arith.divf %268, %269 : vector<34x1xf32>
    %271 = vector.broadcast %270 : vector<34x1xf32> to vector<34x32xf32>
    %272 = arith.subf %266, %271 : vector<34x32xf32>
    %273 = arith.mulf %272, %272 : vector<34x32xf32>
    %cst_99 = arith.constant dense<0.000000e+00> : vector<34xf32>
    %274 = vector.multi_reduction <add>, %273, %cst_99 [1] : vector<34x32xf32> to vector<34xf32>
    %275 = vector.shape_cast %274 : vector<34xf32> to vector<34x1xf32>
    %cst_100 = arith.constant 3.200000e+01 : f32
    %276 = vector.broadcast %cst_100 : f32 to vector<34x1xf32>
    %277 = arith.divf %275, %276 : vector<34x1xf32>
    %278 = vector.broadcast %270 : vector<34x1xf32> to vector<34x32xf32>
    %279 = arith.subf %266, %278 : vector<34x32xf32>
    %cst_101 = arith.constant 9.99999974E-6 : f32
    %280 = vector.broadcast %cst_101 : f32 to vector<34x1xf32>
    %281 = arith.addf %277, %280 : vector<34x1xf32>
    %282 = math.rsqrt %281 : vector<34x1xf32>
    %283 = vector.broadcast %282 : vector<34x1xf32> to vector<34x32xf32>
    %284 = arith.mulf %279, %283 : vector<34x32xf32>
    %c0_102 = arith.constant 0 : index
    %c0_103 = arith.constant 0 : index
    %285 = vector.load %arg12[%c0_102, %c0_103] : memref<1x32xf32, #tpu.memory_space<vmem>>, vector<1x32xf32>
    %286 = vector.broadcast %285 : vector<1x32xf32> to vector<34x32xf32>
    %287 = arith.mulf %284, %286 : vector<34x32xf32>
    %c0_104 = arith.constant 0 : index
    %c0_105 = arith.constant 0 : index
    %288 = vector.load %arg13[%c0_104, %c0_105] : memref<1x32xf32, #tpu.memory_space<vmem>>, vector<1x32xf32>
    %289 = vector.broadcast %288 : vector<1x32xf32> to vector<34x32xf32>
    %290 = arith.addf %287, %289 : vector<34x32xf32>
    %c0_106 = arith.constant 0 : index
    %c0_107 = arith.constant 0 : index
    %291 = vector.load %arg14[%c0_106, %c0_107] : memref<32x128xbf16, #tpu.memory_space<vmem>>, vector<32x128xbf16>
    %292 = arith.truncf %290 : vector<34x32xf32> to vector<34x32xbf16>
    %cst_108 = arith.constant dense<0.000000e+00> : vector<34x128xf32>
    %293 = tpu.matmul %292, %291, %cst_108 {dimension_numbers = #tpu.dot_dimension_numbers<[1], [0], [0], [1], [0, 0, 1, 1], [], []>} : vector<34x32xbf16>, vector<32x128xbf16>, vector<34x128xf32> -> vector<34x128xf32>
    %c0_109 = arith.constant 0 : index
    %c0_110 = arith.constant 0 : index
    %294 = vector.load %arg15[%c0_109, %c0_110] : memref<1x128xf32, #tpu.memory_space<vmem>>, vector<1x128xf32>
    %295 = vector.broadcast %294 : vector<1x128xf32> to vector<34x128xf32>
    %296 = arith.addf %293, %295 : vector<34x128xf32>
    %cst_111 = arith.constant 1.702000e+00 : f32
    %297 = vector.broadcast %cst_111 : f32 to vector<34x128xf32>
    %298 = arith.mulf %297, %296 : vector<34x128xf32>
    %299 = arith.negf %298 : vector<34x128xf32>
    %300 = math.exp %299 : vector<34x128xf32>
    %cst_112 = arith.constant 1.000000e+00 : f32
    %301 = vector.broadcast %cst_112 : f32 to vector<34x128xf32>
    %302 = arith.addf %301, %300 : vector<34x128xf32>
    %303 = arith.divf %301, %302 : vector<34x128xf32>
    %304 = arith.mulf %296, %303 : vector<34x128xf32>
    %c0_113 = arith.constant 0 : index
    %c0_114 = arith.constant 0 : index
    %305 = vector.load %arg16[%c0_113, %c0_114] : memref<128x32xbf16, #tpu.memory_space<vmem>>, vector<128x32xbf16>
    %306 = arith.truncf %304 : vector<34x128xf32> to vector<34x128xbf16>
    %cst_115 = arith.constant dense<0.000000e+00> : vector<34x32xf32>
    %307 = tpu.matmul %306, %305, %cst_115 {dimension_numbers = #tpu.dot_dimension_numbers<[1], [0], [0], [1], [0, 0, 1, 1], [], []>} : vector<34x128xbf16>, vector<128x32xbf16>, vector<34x32xf32> -> vector<34x32xf32>
    %c0_116 = arith.constant 0 : index
    %c0_117 = arith.constant 0 : index
    %308 = vector.load %arg17[%c0_116, %c0_117] : memref<1x32xf32, #tpu.memory_space<vmem>>, vector<1x32xf32>
    %309 = vector.broadcast %308 : vector<1x32xf32> to vector<34x32xf32>
    %310 = arith.addf %307, %309 : vector<34x32xf32>
    %311 = arith.addf %266, %310 : vector<34x32xf32>
    %cst_118 = arith.constant dense<0.000000e+00> : vector<34xf32>
    %312 = vector.multi_reduction <add>, %311, %cst_118 [1] : vector<34x32xf32> to vector<34xf32>
    %313 = vector.shape_cast %312 : vector<34xf32> to vector<34x1xf32>
    %cst_119 = arith.constant 3.200000e+01 : f32
    %314 = vector.broadcast %cst_119 : f32 to vector<34x1xf32>
    %315 = arith.divf %313, %314 : vector<34x1xf32>
    %316 = vector.broadcast %315 : vector<34x1xf32> to vector<34x32xf32>
    %317 = arith.subf %311, %316 : vector<34x32xf32>
    %318 = arith.mulf %317, %317 : vector<34x32xf32>
    %cst_120 = arith.constant dense<0.000000e+00> : vector<34xf32>
    %319 = vector.multi_reduction <add>, %318, %cst_120 [1] : vector<34x32xf32> to vector<34xf32>
    %320 = vector.shape_cast %319 : vector<34xf32> to vector<34x1xf32>
    %cst_121 = arith.constant 3.200000e+01 : f32
    %321 = vector.broadcast %cst_121 : f32 to vector<34x1xf32>
    %322 = arith.divf %320, %321 : vector<34x1xf32>
    %323 = vector.broadcast %315 : vector<34x1xf32> to vector<34x32xf32>
    %324 = arith.subf %311, %323 : vector<34x32xf32>
    %cst_122 = arith.constant 9.99999974E-6 : f32
    %325 = vector.broadcast %cst_122 : f32 to vector<34x1xf32>
    %326 = arith.addf %322, %325 : vector<34x1xf32>
    %327 = math.rsqrt %326 : vector<34x1xf32>
    %328 = vector.broadcast %327 : vector<34x1xf32> to vector<34x32xf32>
    %329 = arith.mulf %324, %328 : vector<34x32xf32>
    %c0_123 = arith.constant 0 : index
    %c0_124 = arith.constant 0 : index
    %330 = vector.load %arg18[%c0_123, %c0_124] : memref<1x32xf32, #tpu.memory_space<vmem>>, vector<1x32xf32>
    %331 = vector.broadcast %330 : vector<1x32xf32> to vector<34x32xf32>
    %332 = arith.mulf %329, %331 : vector<34x32xf32>
    %c0_125 = arith.constant 0 : index
    %c0_126 = arith.constant 0 : index
    %333 = vector.load %arg19[%c0_125, %c0_126] : memref<1x32xf32, #tpu.memory_space<vmem>>, vector<1x32xf32>
    %334 = vector.broadcast %333 : vector<1x32xf32> to vector<34x32xf32>
    %335 = arith.addf %332, %334 : vector<34x32xf32>
    %c0_127 = arith.constant 0 : index
    %c0_128 = arith.constant 0 : index
    %336 = vector.load %arg20[%c0_127, %c0_128] : memref<32x32xbf16, #tpu.memory_space<vmem>>, vector<32x32xbf16>
    %337 = arith.truncf %335 : vector<34x32xf32> to vector<34x32xbf16>
    %cst_129 = arith.constant dense<0.000000e+00> : vector<34x32xf32>
    %338 = tpu.matmul %337, %336, %cst_129 {dimension_numbers = #tpu.dot_dimension_numbers<[1], [0], [0], [1], [0, 0, 1, 1], [], []>} : vector<34x32xbf16>, vector<32x32xbf16>, vector<34x32xf32> -> vector<34x32xf32>
    %c0_130 = arith.constant 0 : index
    %c0_131 = arith.constant 0 : index
    %339 = vector.load %arg21[%c0_130, %c0_131] : memref<1x34xf32, #tpu.memory_space<vmem>>, vector<1x34xf32>
    %cst_132 = arith.constant dense<0.000000e+00> : vector<1x32xf32>
    %340 = tpu.matmul %339, %338, %cst_132 {dimension_numbers = #tpu.dot_dimension_numbers<[1], [0], [0], [1], [0, 0, 1, 1], [], []>} : vector<1x34xf32>, vector<34x32xf32>, vector<1x32xf32> -> vector<1x32xf32>
    %341 = tpu.iota {dimensions = array<i32: 0>} : vector<8x8xi32>
    %342 = tpu.iota {dimensions = array<i32: 1>} : vector<8x8xi32>
    %343 = arith.cmpi sgt, %342, %341 : vector<8x8xi32>
    %cst_133 = arith.constant -1.000000e+30 : f32
    %cst_134 = arith.constant 0.000000e+00 : f32
    %344 = vector.broadcast %cst_133 : f32 to vector<8x8xf32>
    %345 = vector.broadcast %cst_134 : f32 to vector<8x8xf32>
    %346 = arith.select %343, %344, %345 : vector<8x8xi1>, vector<8x8xf32>
    %c0_135 = arith.constant 0 : index
    %c0_136 = arith.constant 0 : index
    %347 = vector.load %arg22[%c0_135, %c0_136] : memref<24x32xf32, #tpu.memory_space<vmem>>, vector<24x32xf32>
    %cst_137 = arith.constant dense<0.000000e+00> : vector<24xf32>
    %348 = vector.multi_reduction <add>, %347, %cst_137 [1] : vector<24x32xf32> to vector<24xf32>
    %349 = vector.shape_cast %348 : vector<24xf32> to vector<24x1xf32>
    %cst_138 = arith.constant 3.200000e+01 : f32
    %350 = vector.broadcast %cst_138 : f32 to vector<24x1xf32>
    %351 = arith.divf %349, %350 : vector<24x1xf32>
    %352 = vector.broadcast %351 : vector<24x1xf32> to vector<24x32xf32>
    %353 = arith.subf %347, %352 : vector<24x32xf32>
    %354 = arith.mulf %353, %353 : vector<24x32xf32>
    %cst_139 = arith.constant dense<0.000000e+00> : vector<24xf32>
    %355 = vector.multi_reduction <add>, %354, %cst_139 [1] : vector<24x32xf32> to vector<24xf32>
    %356 = vector.shape_cast %355 : vector<24xf32> to vector<24x1xf32>
    %cst_140 = arith.constant 3.200000e+01 : f32
    %357 = vector.broadcast %cst_140 : f32 to vector<24x1xf32>
    %358 = arith.divf %356, %357 : vector<24x1xf32>
    %359 = vector.broadcast %351 : vector<24x1xf32> to vector<24x32xf32>
    %360 = arith.subf %347, %359 : vector<24x32xf32>
    %cst_141 = arith.constant 9.99999974E-6 : f32
    %361 = vector.broadcast %cst_141 : f32 to vector<24x1xf32>
    %362 = arith.addf %358, %361 : vector<24x1xf32>
    %363 = math.rsqrt %362 : vector<24x1xf32>
    %364 = vector.broadcast %363 : vector<24x1xf32> to vector<24x32xf32>
    %365 = arith.mulf %360, %364 : vector<24x32xf32>
    %c0_142 = arith.constant 0 : index
    %c0_143 = arith.constant 0 : index
    %366 = vector.load %arg23[%c0_142, %c0_143] : memref<1x32xf32, #tpu.memory_space<vmem>>, vector<1x32xf32>
    %367 = vector.broadcast %366 : vector<1x32xf32> to vector<24x32xf32>
    %368 = arith.mulf %365, %367 : vector<24x32xf32>
    %c0_144 = arith.constant 0 : index
    %c0_145 = arith.constant 0 : index
    %369 = vector.load %arg24[%c0_144, %c0_145] : memref<1x32xf32, #tpu.memory_space<vmem>>, vector<1x32xf32>
    %370 = vector.broadcast %369 : vector<1x32xf32> to vector<24x32xf32>
    %371 = arith.addf %368, %370 : vector<24x32xf32>
    %c0_146 = arith.constant 0 : index
    %c0_147 = arith.constant 0 : index
    %372 = vector.load %arg25[%c0_146, %c0_147] : memref<32x96xbf16, #tpu.memory_space<vmem>>, vector<32x96xbf16>
    %373 = arith.truncf %371 : vector<24x32xf32> to vector<24x32xbf16>
    %cst_148 = arith.constant dense<0.000000e+00> : vector<24x96xf32>
    %374 = tpu.matmul %373, %372, %cst_148 {dimension_numbers = #tpu.dot_dimension_numbers<[1], [0], [0], [1], [0, 0, 1, 1], [], []>} : vector<24x32xbf16>, vector<32x96xbf16>, vector<24x96xf32> -> vector<24x96xf32>
    %c0_149 = arith.constant 0 : index
    %c0_150 = arith.constant 0 : index
    %375 = vector.load %arg26[%c0_149, %c0_150] : memref<1x96xf32, #tpu.memory_space<vmem>>, vector<1x96xf32>
    %376 = vector.broadcast %375 : vector<1x96xf32> to vector<24x96xf32>
    %377 = arith.addf %374, %376 : vector<24x96xf32>
    %378 = vector.extract_strided_slice %377 {offsets = [0, 0], sizes = [8, 96], strides = [1, 1]} : vector<24x96xf32> to vector<8x96xf32>
    %379 = vector.extract_strided_slice %378 {offsets = [0, 0], sizes = [8, 32], strides = [1, 1]} : vector<8x96xf32> to vector<8x32xf32>
    %380 = vector.extract_strided_slice %378 {offsets = [0, 32], sizes = [8, 32], strides = [1, 1]} : vector<8x96xf32> to vector<8x32xf32>
    %381 = vector.extract_strided_slice %378 {offsets = [0, 64], sizes = [8, 32], strides = [1, 1]} : vector<8x96xf32> to vector<8x32xf32>
    %382 = vector.extract_strided_slice %379 {offsets = [0, 0], sizes = [8, 8], strides = [1, 1]} : vector<8x32xf32> to vector<8x8xf32>
    %383 = vector.extract_strided_slice %380 {offsets = [0, 0], sizes = [8, 8], strides = [1, 1]} : vector<8x32xf32> to vector<8x8xf32>
    %384 = vector.extract_strided_slice %381 {offsets = [0, 0], sizes = [8, 8], strides = [1, 1]} : vector<8x32xf32> to vector<8x8xf32>
    %385 = arith.truncf %382 : vector<8x8xf32> to vector<8x8xbf16>
    %386 = arith.truncf %383 : vector<8x8xf32> to vector<8x8xbf16>
    %cst_151 = arith.constant dense<0.000000e+00> : vector<8x8xf32>
    %387 = tpu.matmul %385, %386, %cst_151 {dimension_numbers = #tpu.dot_dimension_numbers<[1], [1], [0], [0], [0, 0, 1, 0], [], []>} : vector<8x8xbf16>, vector<8x8xbf16>, vector<8x8xf32> -> vector<8x8xf32>
    %cst_152 = arith.constant 0.353553385 : f32
    %388 = vector.broadcast %cst_152 : f32 to vector<8x8xf32>
    %389 = arith.mulf %387, %388 : vector<8x8xf32>
    %390 = arith.addf %389, %346 : vector<8x8xf32>
    %cst_153 = arith.constant dense<0xFF800000> : vector<8xf32>
    %391 = vector.multi_reduction <maximumf>, %390, %cst_153 [1] : vector<8x8xf32> to vector<8xf32>
    %392 = vector.shape_cast %391 : vector<8xf32> to vector<8x1xf32>
    %393 = vector.broadcast %392 : vector<8x1xf32> to vector<8x8xf32>
    %394 = arith.subf %390, %393 : vector<8x8xf32>
    %395 = math.exp %394 : vector<8x8xf32>
    %cst_154 = arith.constant dense<0.000000e+00> : vector<8xf32>
    %396 = vector.multi_reduction <add>, %395, %cst_154 [1] : vector<8x8xf32> to vector<8xf32>
    %397 = vector.shape_cast %396 : vector<8xf32> to vector<8x1xf32>
    %398 = tpu.reciprocal %397 {approx = true} : vector<8x1xf32> -> vector<8x1xf32>
    %399 = vector.broadcast %398 : vector<8x1xf32> to vector<8x8xf32>
    %400 = arith.mulf %395, %399 : vector<8x8xf32>
    %401 = arith.truncf %400 : vector<8x8xf32> to vector<8x8xbf16>
    %402 = arith.truncf %384 : vector<8x8xf32> to vector<8x8xbf16>
    %cst_155 = arith.constant dense<0.000000e+00> : vector<8x8xf32>
    %403 = tpu.matmul %401, %402, %cst_155 {dimension_numbers = #tpu.dot_dimension_numbers<[1], [0], [0], [1], [0, 0, 1, 1], [], []>} : vector<8x8xbf16>, vector<8x8xbf16>, vector<8x8xf32> -> vector<8x8xf32>
    %c0_156 = arith.constant 0 : index
    %c0_157 = arith.constant 0 : index
    %404 = vector.load %arg42[%c0_156, %c0_157] : memref<24x32xf32, #tpu.memory_space<vmem>>, vector<8x8xf32>
    tpu.vector_store %arg42[%c0_156, %c0_157], %403 {strides = array<i32>} : memref<24x32xf32, #tpu.memory_space<vmem>>, vector<8x8xf32>,
    %405 = vector.extract_strided_slice %379 {offsets = [0, 8], sizes = [8, 8], strides = [1, 1]} : vector<8x32xf32> to vector<8x8xf32>
    %406 = vector.extract_strided_slice %380 {offsets = [0, 8], sizes = [8, 8], strides = [1, 1]} : vector<8x32xf32> to vector<8x8xf32>
    %407 = vector.extract_strided_slice %381 {offsets = [0, 8], sizes = [8, 8], strides = [1, 1]} : vector<8x32xf32> to vector<8x8xf32>
    %408 = arith.truncf %405 : vector<8x8xf32> to vector<8x8xbf16>
    %409 = arith.truncf %406 : vector<8x8xf32> to vector<8x8xbf16>
    %cst_158 = arith.constant dense<0.000000e+00> : vector<8x8xf32>
    %410 = tpu.matmul %408, %409, %cst_158 {dimension_numbers = #tpu.dot_dimension_numbers<[1], [1], [0], [0], [0, 0, 1, 0], [], []>} : vector<8x8xbf16>, vector<8x8xbf16>, vector<8x8xf32> -> vector<8x8xf32>
    %cst_159 = arith.constant 0.353553385 : f32
    %411 = vector.broadcast %cst_159 : f32 to vector<8x8xf32>
    %412 = arith.mulf %410, %411 : vector<8x8xf32>
    %413 = arith.addf %412, %346 : vector<8x8xf32>
    %cst_160 = arith.constant dense<0xFF800000> : vector<8xf32>
    %414 = vector.multi_reduction <maximumf>, %413, %cst_160 [1] : vector<8x8xf32> to vector<8xf32>
    %415 = vector.shape_cast %414 : vector<8xf32> to vector<8x1xf32>
    %416 = vector.broadcast %415 : vector<8x1xf32> to vector<8x8xf32>
    %417 = arith.subf %413, %416 : vector<8x8xf32>
    %418 = math.exp %417 : vector<8x8xf32>
    %cst_161 = arith.constant dense<0.000000e+00> : vector<8xf32>
    %419 = vector.multi_reduction <add>, %418, %cst_161 [1] : vector<8x8xf32> to vector<8xf32>
    %420 = vector.shape_cast %419 : vector<8xf32> to vector<8x1xf32>
    %421 = tpu.reciprocal %420 {approx = true} : vector<8x1xf32> -> vector<8x1xf32>
    %422 = vector.broadcast %421 : vector<8x1xf32> to vector<8x8xf32>
    %423 = arith.mulf %418, %422 : vector<8x8xf32>
    %424 = arith.truncf %423 : vector<8x8xf32> to vector<8x8xbf16>
    %425 = arith.truncf %407 : vector<8x8xf32> to vector<8x8xbf16>
    %cst_162 = arith.constant dense<0.000000e+00> : vector<8x8xf32>
    %426 = tpu.matmul %424, %425, %cst_162 {dimension_numbers = #tpu.dot_dimension_numbers<[1], [0], [0], [1], [0, 0, 1, 1], [], []>} : vector<8x8xbf16>, vector<8x8xbf16>, vector<8x8xf32> -> vector<8x8xf32>
    %c0_163 = arith.constant 0 : index
    %c8_164 = arith.constant 8 : index
    %427 = vector.load %arg42[%c0_163, %c8_164] : memref<24x32xf32, #tpu.memory_space<vmem>>, vector<8x8xf32>
    tpu.vector_store %arg42[%c0_163, %c8_164], %426 {strides = array<i32>} : memref<24x32xf32, #tpu.memory_space<vmem>>, vector<8x8xf32>,
    %428 = vector.extract_strided_slice %379 {offsets = [0, 16], sizes = [8, 8], strides = [1, 1]} : vector<8x32xf32> to vector<8x8xf32>
    %429 = vector.extract_strided_slice %380 {offsets = [0, 16], sizes = [8, 8], strides = [1, 1]} : vector<8x32xf32> to vector<8x8xf32>
    %430 = vector.extract_strided_slice %381 {offsets = [0, 16], sizes = [8, 8], strides = [1, 1]} : vector<8x32xf32> to vector<8x8xf32>
    %431 = arith.truncf %428 : vector<8x8xf32> to vector<8x8xbf16>
    %432 = arith.truncf %429 : vector<8x8xf32> to vector<8x8xbf16>
    %cst_165 = arith.constant dense<0.000000e+00> : vector<8x8xf32>
    %433 = tpu.matmul %431, %432, %cst_165 {dimension_numbers = #tpu.dot_dimension_numbers<[1], [1], [0], [0], [0, 0, 1, 0], [], []>} : vector<8x8xbf16>, vector<8x8xbf16>, vector<8x8xf32> -> vector<8x8xf32>
    %cst_166 = arith.constant 0.353553385 : f32
    %434 = vector.broadcast %cst_166 : f32 to vector<8x8xf32>
    %435 = arith.mulf %433, %434 : vector<8x8xf32>
    %436 = arith.addf %435, %346 : vector<8x8xf32>
    %cst_167 = arith.constant dense<0xFF800000> : vector<8xf32>
    %437 = vector.multi_reduction <maximumf>, %436, %cst_167 [1] : vector<8x8xf32> to vector<8xf32>
    %438 = vector.shape_cast %437 : vector<8xf32> to vector<8x1xf32>
    %439 = vector.broadcast %438 : vector<8x1xf32> to vector<8x8xf32>
    %440 = arith.subf %436, %439 : vector<8x8xf32>
    %441 = math.exp %440 : vector<8x8xf32>
    %cst_168 = arith.constant dense<0.000000e+00> : vector<8xf32>
    %442 = vector.multi_reduction <add>, %441, %cst_168 [1] : vector<8x8xf32> to vector<8xf32>
    %443 = vector.shape_cast %442 : vector<8xf32> to vector<8x1xf32>
    %444 = tpu.reciprocal %443 {approx = true} : vector<8x1xf32> -> vector<8x1xf32>
    %445 = vector.broadcast %444 : vector<8x1xf32> to vector<8x8xf32>
    %446 = arith.mulf %441, %445 : vector<8x8xf32>
    %447 = arith.truncf %446 : vector<8x8xf32> to vector<8x8xbf16>
    %448 = arith.truncf %430 : vector<8x8xf32> to vector<8x8xbf16>
    %cst_169 = arith.constant dense<0.000000e+00> : vector<8x8xf32>
    %449 = tpu.matmul %447, %448, %cst_169 {dimension_numbers = #tpu.dot_dimension_numbers<[1], [0], [0], [1], [0, 0, 1, 1], [], []>} : vector<8x8xbf16>, vector<8x8xbf16>, vector<8x8xf32> -> vector<8x8xf32>
    %c0_170 = arith.constant 0 : index
    %c16_171 = arith.constant 16 : index
    %450 = vector.load %arg42[%c0_170, %c16_171] : memref<24x32xf32, #tpu.memory_space<vmem>>, vector<8x8xf32>
    tpu.vector_store %arg42[%c0_170, %c16_171], %449 {strides = array<i32>} : memref<24x32xf32, #tpu.memory_space<vmem>>, vector<8x8xf32>,
    %451 = vector.extract_strided_slice %379 {offsets = [0, 24], sizes = [8, 8], strides = [1, 1]} : vector<8x32xf32> to vector<8x8xf32>
    %452 = vector.extract_strided_slice %380 {offsets = [0, 24], sizes = [8, 8], strides = [1, 1]} : vector<8x32xf32> to vector<8x8xf32>
    %453 = vector.extract_strided_slice %381 {offsets = [0, 24], sizes = [8, 8], strides = [1, 1]} : vector<8x32xf32> to vector<8x8xf32>
    %454 = arith.truncf %451 : vector<8x8xf32> to vector<8x8xbf16>
    %455 = arith.truncf %452 : vector<8x8xf32> to vector<8x8xbf16>
    %cst_172 = arith.constant dense<0.000000e+00> : vector<8x8xf32>
    %456 = tpu.matmul %454, %455, %cst_172 {dimension_numbers = #tpu.dot_dimension_numbers<[1], [1], [0], [0], [0, 0, 1, 0], [], []>} : vector<8x8xbf16>, vector<8x8xbf16>, vector<8x8xf32> -> vector<8x8xf32>
    %cst_173 = arith.constant 0.353553385 : f32
    %457 = vector.broadcast %cst_173 : f32 to vector<8x8xf32>
    %458 = arith.mulf %456, %457 : vector<8x8xf32>
    %459 = arith.addf %458, %346 : vector<8x8xf32>
    %cst_174 = arith.constant dense<0xFF800000> : vector<8xf32>
    %460 = vector.multi_reduction <maximumf>, %459, %cst_174 [1] : vector<8x8xf32> to vector<8xf32>
    %461 = vector.shape_cast %460 : vector<8xf32> to vector<8x1xf32>
    %462 = vector.broadcast %461 : vector<8x1xf32> to vector<8x8xf32>
    %463 = arith.subf %459, %462 : vector<8x8xf32>
    %464 = math.exp %463 : vector<8x8xf32>
    %cst_175 = arith.constant dense<0.000000e+00> : vector<8xf32>
    %465 = vector.multi_reduction <add>, %464, %cst_175 [1] : vector<8x8xf32> to vector<8xf32>
    %466 = vector.shape_cast %465 : vector<8xf32> to vector<8x1xf32>
    %467 = tpu.reciprocal %466 {approx = true} : vector<8x1xf32> -> vector<8x1xf32>
    %468 = vector.broadcast %467 : vector<8x1xf32> to vector<8x8xf32>
    %469 = arith.mulf %464, %468 : vector<8x8xf32>
    %470 = arith.truncf %469 : vector<8x8xf32> to vector<8x8xbf16>
    %471 = arith.truncf %453 : vector<8x8xf32> to vector<8x8xbf16>
    %cst_176 = arith.constant dense<0.000000e+00> : vector<8x8xf32>
    %472 = tpu.matmul %470, %471, %cst_176 {dimension_numbers = #tpu.dot_dimension_numbers<[1], [0], [0], [1], [0, 0, 1, 1], [], []>} : vector<8x8xbf16>, vector<8x8xbf16>, vector<8x8xf32> -> vector<8x8xf32>
    %c0_177 = arith.constant 0 : index
    %c24_178 = arith.constant 24 : index
    %473 = vector.load %arg42[%c0_177, %c24_178] : memref<24x32xf32, #tpu.memory_space<vmem>>, vector<8x8xf32>
    tpu.vector_store %arg42[%c0_177, %c24_178], %472 {strides = array<i32>} : memref<24x32xf32, #tpu.memory_space<vmem>>, vector<8x8xf32>,
    %474 = vector.extract_strided_slice %377 {offsets = [8, 0], sizes = [8, 96], strides = [1, 1]} : vector<24x96xf32> to vector<8x96xf32>
    %475 = vector.extract_strided_slice %474 {offsets = [0, 0], sizes = [8, 32], strides = [1, 1]} : vector<8x96xf32> to vector<8x32xf32>
    %476 = vector.extract_strided_slice %474 {offsets = [0, 32], sizes = [8, 32], strides = [1, 1]} : vector<8x96xf32> to vector<8x32xf32>
    %477 = vector.extract_strided_slice %474 {offsets = [0, 64], sizes = [8, 32], strides = [1, 1]} : vector<8x96xf32> to vector<8x32xf32>
    %478 = vector.extract_strided_slice %475 {offsets = [0, 0], sizes = [8, 8], strides = [1, 1]} : vector<8x32xf32> to vector<8x8xf32>
    %479 = vector.extract_strided_slice %476 {offsets = [0, 0], sizes = [8, 8], strides = [1, 1]} : vector<8x32xf32> to vector<8x8xf32>
    %480 = vector.extract_strided_slice %477 {offsets = [0, 0], sizes = [8, 8], strides = [1, 1]} : vector<8x32xf32> to vector<8x8xf32>
    %481 = arith.truncf %478 : vector<8x8xf32> to vector<8x8xbf16>
    %482 = arith.truncf %479 : vector<8x8xf32> to vector<8x8xbf16>
    %cst_179 = arith.constant dense<0.000000e+00> : vector<8x8xf32>
    %483 = tpu.matmul %481, %482, %cst_179 {dimension_numbers = #tpu.dot_dimension_numbers<[1], [1], [0], [0], [0, 0, 1, 0], [], []>} : vector<8x8xbf16>, vector<8x8xbf16>, vector<8x8xf32> -> vector<8x8xf32>
    %cst_180 = arith.constant 0.353553385 : f32
    %484 = vector.broadcast %cst_180 : f32 to vector<8x8xf32>
    %485 = arith.mulf %483, %484 : vector<8x8xf32>
    %486 = arith.addf %485, %346 : vector<8x8xf32>
    %cst_181 = arith.constant dense<0xFF800000> : vector<8xf32>
    %487 = vector.multi_reduction <maximumf>, %486, %cst_181 [1] : vector<8x8xf32> to vector<8xf32>
    %488 = vector.shape_cast %487 : vector<8xf32> to vector<8x1xf32>
    %489 = vector.broadcast %488 : vector<8x1xf32> to vector<8x8xf32>
    %490 = arith.subf %486, %489 : vector<8x8xf32>
    %491 = math.exp %490 : vector<8x8xf32>
    %cst_182 = arith.constant dense<0.000000e+00> : vector<8xf32>
    %492 = vector.multi_reduction <add>, %491, %cst_182 [1] : vector<8x8xf32> to vector<8xf32>
    %493 = vector.shape_cast %492 : vector<8xf32> to vector<8x1xf32>
    %494 = tpu.reciprocal %493 {approx = true} : vector<8x1xf32> -> vector<8x1xf32>
    %495 = vector.broadcast %494 : vector<8x1xf32> to vector<8x8xf32>
    %496 = arith.mulf %491, %495 : vector<8x8xf32>
    %497 = arith.truncf %496 : vector<8x8xf32> to vector<8x8xbf16>
    %498 = arith.truncf %480 : vector<8x8xf32> to vector<8x8xbf16>
    %cst_183 = arith.constant dense<0.000000e+00> : vector<8x8xf32>
    %499 = tpu.matmul %497, %498, %cst_183 {dimension_numbers = #tpu.dot_dimension_numbers<[1], [0], [0], [1], [0, 0, 1, 1], [], []>} : vector<8x8xbf16>, vector<8x8xbf16>, vector<8x8xf32> -> vector<8x8xf32>
    %c8_184 = arith.constant 8 : index
    %c0_185 = arith.constant 0 : index
    %500 = vector.load %arg42[%c8_184, %c0_185] : memref<24x32xf32, #tpu.memory_space<vmem>>, vector<8x8xf32>
    tpu.vector_store %arg42[%c8_184, %c0_185], %499 {strides = array<i32>} : memref<24x32xf32, #tpu.memory_space<vmem>>, vector<8x8xf32>,
    %501 = vector.extract_strided_slice %475 {offsets = [0, 8], sizes = [8, 8], strides = [1, 1]} : vector<8x32xf32> to vector<8x8xf32>
    %502 = vector.extract_strided_slice %476 {offsets = [0, 8], sizes = [8, 8], strides = [1, 1]} : vector<8x32xf32> to vector<8x8xf32>
    %503 = vector.extract_strided_slice %477 {offsets = [0, 8], sizes = [8, 8], strides = [1, 1]} : vector<8x32xf32> to vector<8x8xf32>
    %504 = arith.truncf %501 : vector<8x8xf32> to vector<8x8xbf16>
    %505 = arith.truncf %502 : vector<8x8xf32> to vector<8x8xbf16>
    %cst_186 = arith.constant dense<0.000000e+00> : vector<8x8xf32>
    %506 = tpu.matmul %504, %505, %cst_186 {dimension_numbers = #tpu.dot_dimension_numbers<[1], [1], [0], [0], [0, 0, 1, 0], [], []>} : vector<8x8xbf16>, vector<8x8xbf16>, vector<8x8xf32> -> vector<8x8xf32>
    %cst_187 = arith.constant 0.353553385 : f32
    %507 = vector.broadcast %cst_187 : f32 to vector<8x8xf32>
    %508 = arith.mulf %506, %507 : vector<8x8xf32>
    %509 = arith.addf %508, %346 : vector<8x8xf32>
    %cst_188 = arith.constant dense<0xFF800000> : vector<8xf32>
    %510 = vector.multi_reduction <maximumf>, %509, %cst_188 [1] : vector<8x8xf32> to vector<8xf32>
    %511 = vector.shape_cast %510 : vector<8xf32> to vector<8x1xf32>
    %512 = vector.broadcast %511 : vector<8x1xf32> to vector<8x8xf32>
    %513 = arith.subf %509, %512 : vector<8x8xf32>
    %514 = math.exp %513 : vector<8x8xf32>
    %cst_189 = arith.constant dense<0.000000e+00> : vector<8xf32>
    %515 = vector.multi_reduction <add>, %514, %cst_189 [1] : vector<8x8xf32> to vector<8xf32>
    %516 = vector.shape_cast %515 : vector<8xf32> to vector<8x1xf32>
    %517 = tpu.reciprocal %516 {approx = true} : vector<8x1xf32> -> vector<8x1xf32>
    %518 = vector.broadcast %517 : vector<8x1xf32> to vector<8x8xf32>
    %519 = arith.mulf %514, %518 : vector<8x8xf32>
    %520 = arith.truncf %519 : vector<8x8xf32> to vector<8x8xbf16>
    %521 = arith.truncf %503 : vector<8x8xf32> to vector<8x8xbf16>
    %cst_190 = arith.constant dense<0.000000e+00> : vector<8x8xf32>
    %522 = tpu.matmul %520, %521, %cst_190 {dimension_numbers = #tpu.dot_dimension_numbers<[1], [0], [0], [1], [0, 0, 1, 1], [], []>} : vector<8x8xbf16>, vector<8x8xbf16>, vector<8x8xf32> -> vector<8x8xf32>
    %c8_191 = arith.constant 8 : index
    %c8_192 = arith.constant 8 : index
    %523 = vector.load %arg42[%c8_191, %c8_192] : memref<24x32xf32, #tpu.memory_space<vmem>>, vector<8x8xf32>
    tpu.vector_store %arg42[%c8_191, %c8_192], %522 {strides = array<i32>} : memref<24x32xf32, #tpu.memory_space<vmem>>, vector<8x8xf32>,
    %524 = vector.extract_strided_slice %475 {offsets = [0, 16], sizes = [8, 8], strides = [1, 1]} : vector<8x32xf32> to vector<8x8xf32>
    %525 = vector.extract_strided_slice %476 {offsets = [0, 16], sizes = [8, 8], strides = [1, 1]} : vector<8x32xf32> to vector<8x8xf32>
    %526 = vector.extract_strided_slice %477 {offsets = [0, 16], sizes = [8, 8], strides = [1, 1]} : vector<8x32xf32> to vector<8x8xf32>
    %527 = arith.truncf %524 : vector<8x8xf32> to vector<8x8xbf16>
    %528 = arith.truncf %525 : vector<8x8xf32> to vector<8x8xbf16>
    %cst_193 = arith.constant dense<0.000000e+00> : vector<8x8xf32>
    %529 = tpu.matmul %527, %528, %cst_193 {dimension_numbers = #tpu.dot_dimension_numbers<[1], [1], [0], [0], [0, 0, 1, 0], [], []>} : vector<8x8xbf16>, vector<8x8xbf16>, vector<8x8xf32> -> vector<8x8xf32>
    %cst_194 = arith.constant 0.353553385 : f32
    %530 = vector.broadcast %cst_194 : f32 to vector<8x8xf32>
    %531 = arith.mulf %529, %530 : vector<8x8xf32>
    %532 = arith.addf %531, %346 : vector<8x8xf32>
    %cst_195 = arith.constant dense<0xFF800000> : vector<8xf32>
    %533 = vector.multi_reduction <maximumf>, %532, %cst_195 [1] : vector<8x8xf32> to vector<8xf32>
    %534 = vector.shape_cast %533 : vector<8xf32> to vector<8x1xf32>
    %535 = vector.broadcast %534 : vector<8x1xf32> to vector<8x8xf32>
    %536 = arith.subf %532, %535 : vector<8x8xf32>
    %537 = math.exp %536 : vector<8x8xf32>
    %cst_196 = arith.constant dense<0.000000e+00> : vector<8xf32>
    %538 = vector.multi_reduction <add>, %537, %cst_196 [1] : vector<8x8xf32> to vector<8xf32>
    %539 = vector.shape_cast %538 : vector<8xf32> to vector<8x1xf32>
    %540 = tpu.reciprocal %539 {approx = true} : vector<8x1xf32> -> vector<8x1xf32>
    %541 = vector.broadcast %540 : vector<8x1xf32> to vector<8x8xf32>
    %542 = arith.mulf %537, %541 : vector<8x8xf32>
    %543 = arith.truncf %542 : vector<8x8xf32> to vector<8x8xbf16>
    %544 = arith.truncf %526 : vector<8x8xf32> to vector<8x8xbf16>
    %cst_197 = arith.constant dense<0.000000e+00> : vector<8x8xf32>
    %545 = tpu.matmul %543, %544, %cst_197 {dimension_numbers = #tpu.dot_dimension_numbers<[1], [0], [0], [1], [0, 0, 1, 1], [], []>} : vector<8x8xbf16>, vector<8x8xbf16>, vector<8x8xf32> -> vector<8x8xf32>
    %c8_198 = arith.constant 8 : index
    %c16_199 = arith.constant 16 : index
    %546 = vector.load %arg42[%c8_198, %c16_199] : memref<24x32xf32, #tpu.memory_space<vmem>>, vector<8x8xf32>
    tpu.vector_store %arg42[%c8_198, %c16_199], %545 {strides = array<i32>} : memref<24x32xf32, #tpu.memory_space<vmem>>, vector<8x8xf32>,
    %547 = vector.extract_strided_slice %475 {offsets = [0, 24], sizes = [8, 8], strides = [1, 1]} : vector<8x32xf32> to vector<8x8xf32>
    %548 = vector.extract_strided_slice %476 {offsets = [0, 24], sizes = [8, 8], strides = [1, 1]} : vector<8x32xf32> to vector<8x8xf32>
    %549 = vector.extract_strided_slice %477 {offsets = [0, 24], sizes = [8, 8], strides = [1, 1]} : vector<8x32xf32> to vector<8x8xf32>
    %550 = arith.truncf %547 : vector<8x8xf32> to vector<8x8xbf16>
    %551 = arith.truncf %548 : vector<8x8xf32> to vector<8x8xbf16>
    %cst_200 = arith.constant dense<0.000000e+00> : vector<8x8xf32>
    %552 = tpu.matmul %550, %551, %cst_200 {dimension_numbers = #tpu.dot_dimension_numbers<[1], [1], [0], [0], [0, 0, 1, 0], [], []>} : vector<8x8xbf16>, vector<8x8xbf16>, vector<8x8xf32> -> vector<8x8xf32>
    %cst_201 = arith.constant 0.353553385 : f32
    %553 = vector.broadcast %cst_201 : f32 to vector<8x8xf32>
    %554 = arith.mulf %552, %553 : vector<8x8xf32>
    %555 = arith.addf %554, %346 : vector<8x8xf32>
    %cst_202 = arith.constant dense<0xFF800000> : vector<8xf32>
    %556 = vector.multi_reduction <maximumf>, %555, %cst_202 [1] : vector<8x8xf32> to vector<8xf32>
    %557 = vector.shape_cast %556 : vector<8xf32> to vector<8x1xf32>
    %558 = vector.broadcast %557 : vector<8x1xf32> to vector<8x8xf32>
    %559 = arith.subf %555, %558 : vector<8x8xf32>
    %560 = math.exp %559 : vector<8x8xf32>
    %cst_203 = arith.constant dense<0.000000e+00> : vector<8xf32>
    %561 = vector.multi_reduction <add>, %560, %cst_203 [1] : vector<8x8xf32> to vector<8xf32>
    %562 = vector.shape_cast %561 : vector<8xf32> to vector<8x1xf32>
    %563 = tpu.reciprocal %562 {approx = true} : vector<8x1xf32> -> vector<8x1xf32>
    %564 = vector.broadcast %563 : vector<8x1xf32> to vector<8x8xf32>
    %565 = arith.mulf %560, %564 : vector<8x8xf32>
    %566 = arith.truncf %565 : vector<8x8xf32> to vector<8x8xbf16>
    %567 = arith.truncf %549 : vector<8x8xf32> to vector<8x8xbf16>
    %cst_204 = arith.constant dense<0.000000e+00> : vector<8x8xf32>
    %568 = tpu.matmul %566, %567, %cst_204 {dimension_numbers = #tpu.dot_dimension_numbers<[1], [0], [0], [1], [0, 0, 1, 1], [], []>} : vector<8x8xbf16>, vector<8x8xbf16>, vector<8x8xf32> -> vector<8x8xf32>
    %c8_205 = arith.constant 8 : index
    %c24_206 = arith.constant 24 : index
    %569 = vector.load %arg42[%c8_205, %c24_206] : memref<24x32xf32, #tpu.memory_space<vmem>>, vector<8x8xf32>
    tpu.vector_store %arg42[%c8_205, %c24_206], %568 {strides = array<i32>} : memref<24x32xf32, #tpu.memory_space<vmem>>, vector<8x8xf32>,
    %570 = vector.extract_strided_slice %377 {offsets = [16, 0], sizes = [8, 96], strides = [1, 1]} : vector<24x96xf32> to vector<8x96xf32>
    %571 = vector.extract_strided_slice %570 {offsets = [0, 0], sizes = [8, 32], strides = [1, 1]} : vector<8x96xf32> to vector<8x32xf32>
    %572 = vector.extract_strided_slice %570 {offsets = [0, 32], sizes = [8, 32], strides = [1, 1]} : vector<8x96xf32> to vector<8x32xf32>
    %573 = vector.extract_strided_slice %570 {offsets = [0, 64], sizes = [8, 32], strides = [1, 1]} : vector<8x96xf32> to vector<8x32xf32>
    %574 = vector.extract_strided_slice %571 {offsets = [0, 0], sizes = [8, 8], strides = [1, 1]} : vector<8x32xf32> to vector<8x8xf32>
    %575 = vector.extract_strided_slice %572 {offsets = [0, 0], sizes = [8, 8], strides = [1, 1]} : vector<8x32xf32> to vector<8x8xf32>
    %576 = vector.extract_strided_slice %573 {offsets = [0, 0], sizes = [8, 8], strides = [1, 1]} : vector<8x32xf32> to vector<8x8xf32>
    %577 = arith.truncf %574 : vector<8x8xf32> to vector<8x8xbf16>
    %578 = arith.truncf %575 : vector<8x8xf32> to vector<8x8xbf16>
    %cst_207 = arith.constant dense<0.000000e+00> : vector<8x8xf32>
    %579 = tpu.matmul %577, %578, %cst_207 {dimension_numbers = #tpu.dot_dimension_numbers<[1], [1], [0], [0], [0, 0, 1, 0], [], []>} : vector<8x8xbf16>, vector<8x8xbf16>, vector<8x8xf32> -> vector<8x8xf32>
    %cst_208 = arith.constant 0.353553385 : f32
    %580 = vector.broadcast %cst_208 : f32 to vector<8x8xf32>
    %581 = arith.mulf %579, %580 : vector<8x8xf32>
    %582 = arith.addf %581, %346 : vector<8x8xf32>
    %cst_209 = arith.constant dense<0xFF800000> : vector<8xf32>
    %583 = vector.multi_reduction <maximumf>, %582, %cst_209 [1] : vector<8x8xf32> to vector<8xf32>
    %584 = vector.shape_cast %583 : vector<8xf32> to vector<8x1xf32>
    %585 = vector.broadcast %584 : vector<8x1xf32> to vector<8x8xf32>
    %586 = arith.subf %582, %585 : vector<8x8xf32>
    %587 = math.exp %586 : vector<8x8xf32>
    %cst_210 = arith.constant dense<0.000000e+00> : vector<8xf32>
    %588 = vector.multi_reduction <add>, %587, %cst_210 [1] : vector<8x8xf32> to vector<8xf32>
    %589 = vector.shape_cast %588 : vector<8xf32> to vector<8x1xf32>
    %590 = tpu.reciprocal %589 {approx = true} : vector<8x1xf32> -> vector<8x1xf32>
    %591 = vector.broadcast %590 : vector<8x1xf32> to vector<8x8xf32>
    %592 = arith.mulf %587, %591 : vector<8x8xf32>
    %593 = arith.truncf %592 : vector<8x8xf32> to vector<8x8xbf16>
    %594 = arith.truncf %576 : vector<8x8xf32> to vector<8x8xbf16>
    %cst_211 = arith.constant dense<0.000000e+00> : vector<8x8xf32>
    %595 = tpu.matmul %593, %594, %cst_211 {dimension_numbers = #tpu.dot_dimension_numbers<[1], [0], [0], [1], [0, 0, 1, 1], [], []>} : vector<8x8xbf16>, vector<8x8xbf16>, vector<8x8xf32> -> vector<8x8xf32>
    %c16_212 = arith.constant 16 : index
    %c0_213 = arith.constant 0 : index
    %596 = vector.load %arg42[%c16_212, %c0_213] : memref<24x32xf32, #tpu.memory_space<vmem>>, vector<8x8xf32>
    tpu.vector_store %arg42[%c16_212, %c0_213], %595 {strides = array<i32>} : memref<24x32xf32, #tpu.memory_space<vmem>>, vector<8x8xf32>,
    %597 = vector.extract_strided_slice %571 {offsets = [0, 8], sizes = [8, 8], strides = [1, 1]} : vector<8x32xf32> to vector<8x8xf32>
    %598 = vector.extract_strided_slice %572 {offsets = [0, 8], sizes = [8, 8], strides = [1, 1]} : vector<8x32xf32> to vector<8x8xf32>
    %599 = vector.extract_strided_slice %573 {offsets = [0, 8], sizes = [8, 8], strides = [1, 1]} : vector<8x32xf32> to vector<8x8xf32>
    %600 = arith.truncf %597 : vector<8x8xf32> to vector<8x8xbf16>
    %601 = arith.truncf %598 : vector<8x8xf32> to vector<8x8xbf16>
    %cst_214 = arith.constant dense<0.000000e+00> : vector<8x8xf32>
    %602 = tpu.matmul %600, %601, %cst_214 {dimension_numbers = #tpu.dot_dimension_numbers<[1], [1], [0], [0], [0, 0, 1, 0], [], []>} : vector<8x8xbf16>, vector<8x8xbf16>, vector<8x8xf32> -> vector<8x8xf32>
    %cst_215 = arith.constant 0.353553385 : f32
    %603 = vector.broadcast %cst_215 : f32 to vector<8x8xf32>
    %604 = arith.mulf %602, %603 : vector<8x8xf32>
    %605 = arith.addf %604, %346 : vector<8x8xf32>
    %cst_216 = arith.constant dense<0xFF800000> : vector<8xf32>
    %606 = vector.multi_reduction <maximumf>, %605, %cst_216 [1] : vector<8x8xf32> to vector<8xf32>
    %607 = vector.shape_cast %606 : vector<8xf32> to vector<8x1xf32>
    %608 = vector.broadcast %607 : vector<8x1xf32> to vector<8x8xf32>
    %609 = arith.subf %605, %608 : vector<8x8xf32>
    %610 = math.exp %609 : vector<8x8xf32>
    %cst_217 = arith.constant dense<0.000000e+00> : vector<8xf32>
    %611 = vector.multi_reduction <add>, %610, %cst_217 [1] : vector<8x8xf32> to vector<8xf32>
    %612 = vector.shape_cast %611 : vector<8xf32> to vector<8x1xf32>
    %613 = tpu.reciprocal %612 {approx = true} : vector<8x1xf32> -> vector<8x1xf32>
    %614 = vector.broadcast %613 : vector<8x1xf32> to vector<8x8xf32>
    %615 = arith.mulf %610, %614 : vector<8x8xf32>
    %616 = arith.truncf %615 : vector<8x8xf32> to vector<8x8xbf16>
    %617 = arith.truncf %599 : vector<8x8xf32> to vector<8x8xbf16>
    %cst_218 = arith.constant dense<0.000000e+00> : vector<8x8xf32>
    %618 = tpu.matmul %616, %617, %cst_218 {dimension_numbers = #tpu.dot_dimension_numbers<[1], [0], [0], [1], [0, 0, 1, 1], [], []>} : vector<8x8xbf16>, vector<8x8xbf16>, vector<8x8xf32> -> vector<8x8xf32>
    %c16_219 = arith.constant 16 : index
    %c8_220 = arith.constant 8 : index
    %619 = vector.load %arg42[%c16_219, %c8_220] : memref<24x32xf32, #tpu.memory_space<vmem>>, vector<8x8xf32>
    tpu.vector_store %arg42[%c16_219, %c8_220], %618 {strides = array<i32>} : memref<24x32xf32, #tpu.memory_space<vmem>>, vector<8x8xf32>,
    %620 = vector.extract_strided_slice %571 {offsets = [0, 16], sizes = [8, 8], strides = [1, 1]} : vector<8x32xf32> to vector<8x8xf32>
    %621 = vector.extract_strided_slice %572 {offsets = [0, 16], sizes = [8, 8], strides = [1, 1]} : vector<8x32xf32> to vector<8x8xf32>
    %622 = vector.extract_strided_slice %573 {offsets = [0, 16], sizes = [8, 8], strides = [1, 1]} : vector<8x32xf32> to vector<8x8xf32>
    %623 = arith.truncf %620 : vector<8x8xf32> to vector<8x8xbf16>
    %624 = arith.truncf %621 : vector<8x8xf32> to vector<8x8xbf16>
    %cst_221 = arith.constant dense<0.000000e+00> : vector<8x8xf32>
    %625 = tpu.matmul %623, %624, %cst_221 {dimension_numbers = #tpu.dot_dimension_numbers<[1], [1], [0], [0], [0, 0, 1, 0], [], []>} : vector<8x8xbf16>, vector<8x8xbf16>, vector<8x8xf32> -> vector<8x8xf32>
    %cst_222 = arith.constant 0.353553385 : f32
    %626 = vector.broadcast %cst_222 : f32 to vector<8x8xf32>
    %627 = arith.mulf %625, %626 : vector<8x8xf32>
    %628 = arith.addf %627, %346 : vector<8x8xf32>
    %cst_223 = arith.constant dense<0xFF800000> : vector<8xf32>
    %629 = vector.multi_reduction <maximumf>, %628, %cst_223 [1] : vector<8x8xf32> to vector<8xf32>
    %630 = vector.shape_cast %629 : vector<8xf32> to vector<8x1xf32>
    %631 = vector.broadcast %630 : vector<8x1xf32> to vector<8x8xf32>
    %632 = arith.subf %628, %631 : vector<8x8xf32>
    %633 = math.exp %632 : vector<8x8xf32>
    %cst_224 = arith.constant dense<0.000000e+00> : vector<8xf32>
    %634 = vector.multi_reduction <add>, %633, %cst_224 [1] : vector<8x8xf32> to vector<8xf32>
    %635 = vector.shape_cast %634 : vector<8xf32> to vector<8x1xf32>
    %636 = tpu.reciprocal %635 {approx = true} : vector<8x1xf32> -> vector<8x1xf32>
    %637 = vector.broadcast %636 : vector<8x1xf32> to vector<8x8xf32>
    %638 = arith.mulf %633, %637 : vector<8x8xf32>
    %639 = arith.truncf %638 : vector<8x8xf32> to vector<8x8xbf16>
    %640 = arith.truncf %622 : vector<8x8xf32> to vector<8x8xbf16>
    %cst_225 = arith.constant dense<0.000000e+00> : vector<8x8xf32>
    %641 = tpu.matmul %639, %640, %cst_225 {dimension_numbers = #tpu.dot_dimension_numbers<[1], [0], [0], [1], [0, 0, 1, 1], [], []>} : vector<8x8xbf16>, vector<8x8xbf16>, vector<8x8xf32> -> vector<8x8xf32>
    %c16_226 = arith.constant 16 : index
    %c16_227 = arith.constant 16 : index
    %642 = vector.load %arg42[%c16_226, %c16_227] : memref<24x32xf32, #tpu.memory_space<vmem>>, vector<8x8xf32>
    tpu.vector_store %arg42[%c16_226, %c16_227], %641 {strides = array<i32>} : memref<24x32xf32, #tpu.memory_space<vmem>>, vector<8x8xf32>,
    %643 = vector.extract_strided_slice %571 {offsets = [0, 24], sizes = [8, 8], strides = [1, 1]} : vector<8x32xf32> to vector<8x8xf32>
    %644 = vector.extract_strided_slice %572 {offsets = [0, 24], sizes = [8, 8], strides = [1, 1]} : vector<8x32xf32> to vector<8x8xf32>
    %645 = vector.extract_strided_slice %573 {offsets = [0, 24], sizes = [8, 8], strides = [1, 1]} : vector<8x32xf32> to vector<8x8xf32>
    %646 = arith.truncf %643 : vector<8x8xf32> to vector<8x8xbf16>
    %647 = arith.truncf %644 : vector<8x8xf32> to vector<8x8xbf16>
    %cst_228 = arith.constant dense<0.000000e+00> : vector<8x8xf32>
    %648 = tpu.matmul %646, %647, %cst_228 {dimension_numbers = #tpu.dot_dimension_numbers<[1], [1], [0], [0], [0, 0, 1, 0], [], []>} : vector<8x8xbf16>, vector<8x8xbf16>, vector<8x8xf32> -> vector<8x8xf32>
    %cst_229 = arith.constant 0.353553385 : f32
    %649 = vector.broadcast %cst_229 : f32 to vector<8x8xf32>
    %650 = arith.mulf %648, %649 : vector<8x8xf32>
    %651 = arith.addf %650, %346 : vector<8x8xf32>
    %cst_230 = arith.constant dense<0xFF800000> : vector<8xf32>
    %652 = vector.multi_reduction <maximumf>, %651, %cst_230 [1] : vector<8x8xf32> to vector<8xf32>
    %653 = vector.shape_cast %652 : vector<8xf32> to vector<8x1xf32>
    %654 = vector.broadcast %653 : vector<8x1xf32> to vector<8x8xf32>
    %655 = arith.subf %651, %654 : vector<8x8xf32>
    %656 = math.exp %655 : vector<8x8xf32>
    %cst_231 = arith.constant dense<0.000000e+00> : vector<8xf32>
    %657 = vector.multi_reduction <add>, %656, %cst_231 [1] : vector<8x8xf32> to vector<8xf32>
    %658 = vector.shape_cast %657 : vector<8xf32> to vector<8x1xf32>
    %659 = tpu.reciprocal %658 {approx = true} : vector<8x1xf32> -> vector<8x1xf32>
    %660 = vector.broadcast %659 : vector<8x1xf32> to vector<8x8xf32>
    %661 = arith.mulf %656, %660 : vector<8x8xf32>
    %662 = arith.truncf %661 : vector<8x8xf32> to vector<8x8xbf16>
    %663 = arith.truncf %645 : vector<8x8xf32> to vector<8x8xbf16>
    %cst_232 = arith.constant dense<0.000000e+00> : vector<8x8xf32>
    %664 = tpu.matmul %662, %663, %cst_232 {dimension_numbers = #tpu.dot_dimension_numbers<[1], [0], [0], [1], [0, 0, 1, 1], [], []>} : vector<8x8xbf16>, vector<8x8xbf16>, vector<8x8xf32> -> vector<8x8xf32>
    %c16_233 = arith.constant 16 : index
    %c24_234 = arith.constant 24 : index
    %665 = vector.load %arg42[%c16_233, %c24_234] : memref<24x32xf32, #tpu.memory_space<vmem>>, vector<8x8xf32>
    tpu.vector_store %arg42[%c16_233, %c24_234], %664 {strides = array<i32>} : memref<24x32xf32, #tpu.memory_space<vmem>>, vector<8x8xf32>,
    %c0_235 = arith.constant 0 : index
    %c0_236 = arith.constant 0 : index
    %666 = vector.load %arg42[%c0_235, %c0_236] : memref<24x32xf32, #tpu.memory_space<vmem>>, vector<24x32xf32>
    %c0_237 = arith.constant 0 : index
    %c0_238 = arith.constant 0 : index
    %667 = vector.load %arg27[%c0_237, %c0_238] : memref<32x32xbf16, #tpu.memory_space<vmem>>, vector<32x32xbf16>
    %668 = arith.truncf %666 : vector<24x32xf32> to vector<24x32xbf16>
    %cst_239 = arith.constant dense<0.000000e+00> : vector<24x32xf32>
    %669 = tpu.matmul %668, %667, %cst_239 {dimension_numbers = #tpu.dot_dimension_numbers<[1], [0], [0], [1], [0, 0, 1, 1], [], []>} : vector<24x32xbf16>, vector<32x32xbf16>, vector<24x32xf32> -> vector<24x32xf32>
    %c0_240 = arith.constant 0 : index
    %c0_241 = arith.constant 0 : index
    %670 = vector.load %arg28[%c0_240, %c0_241] : memref<1x32xf32, #tpu.memory_space<vmem>>, vector<1x32xf32>
    %671 = vector.broadcast %670 : vector<1x32xf32> to vector<24x32xf32>
    %672 = arith.addf %669, %671 : vector<24x32xf32>
    %673 = arith.addf %347, %672 : vector<24x32xf32>
    %cst_242 = arith.constant dense<0.000000e+00> : vector<24xf32>
    %674 = vector.multi_reduction <add>, %673, %cst_242 [1] : vector<24x32xf32> to vector<24xf32>
    %675 = vector.shape_cast %674 : vector<24xf32> to vector<24x1xf32>
    %cst_243 = arith.constant 3.200000e+01 : f32
    %676 = vector.broadcast %cst_243 : f32 to vector<24x1xf32>
    %677 = arith.divf %675, %676 : vector<24x1xf32>
    %678 = vector.broadcast %677 : vector<24x1xf32> to vector<24x32xf32>
    %679 = arith.subf %673, %678 : vector<24x32xf32>
    %680 = arith.mulf %679, %679 : vector<24x32xf32>
    %cst_244 = arith.constant dense<0.000000e+00> : vector<24xf32>
    %681 = vector.multi_reduction <add>, %680, %cst_244 [1] : vector<24x32xf32> to vector<24xf32>
    %682 = vector.shape_cast %681 : vector<24xf32> to vector<24x1xf32>
    %cst_245 = arith.constant 3.200000e+01 : f32
    %683 = vector.broadcast %cst_245 : f32 to vector<24x1xf32>
    %684 = arith.divf %682, %683 : vector<24x1xf32>
    %685 = vector.broadcast %677 : vector<24x1xf32> to vector<24x32xf32>
    %686 = arith.subf %673, %685 : vector<24x32xf32>
    %cst_246 = arith.constant 9.99999974E-6 : f32
    %687 = vector.broadcast %cst_246 : f32 to vector<24x1xf32>
    %688 = arith.addf %684, %687 : vector<24x1xf32>
    %689 = math.rsqrt %688 : vector<24x1xf32>
    %690 = vector.broadcast %689 : vector<24x1xf32> to vector<24x32xf32>
    %691 = arith.mulf %686, %690 : vector<24x32xf32>
    %c0_247 = arith.constant 0 : index
    %c0_248 = arith.constant 0 : index
    %692 = vector.load %arg29[%c0_247, %c0_248] : memref<1x32xf32, #tpu.memory_space<vmem>>, vector<1x32xf32>
    %693 = vector.broadcast %692 : vector<1x32xf32> to vector<24x32xf32>
    %694 = arith.mulf %691, %693 : vector<24x32xf32>
    %c0_249 = arith.constant 0 : index
    %c0_250 = arith.constant 0 : index
    %695 = vector.load %arg30[%c0_249, %c0_250] : memref<1x32xf32, #tpu.memory_space<vmem>>, vector<1x32xf32>
    %696 = vector.broadcast %695 : vector<1x32xf32> to vector<24x32xf32>
    %697 = arith.addf %694, %696 : vector<24x32xf32>
    %c0_251 = arith.constant 0 : index
    %c0_252 = arith.constant 0 : index
    %698 = vector.load %arg31[%c0_251, %c0_252] : memref<32x128xbf16, #tpu.memory_space<vmem>>, vector<32x128xbf16>
    %699 = arith.truncf %697 : vector<24x32xf32> to vector<24x32xbf16>
    %cst_253 = arith.constant dense<0.000000e+00> : vector<24x128xf32>
    %700 = tpu.matmul %699, %698, %cst_253 {dimension_numbers = #tpu.dot_dimension_numbers<[1], [0], [0], [1], [0, 0, 1, 1], [], []>} : vector<24x32xbf16>, vector<32x128xbf16>, vector<24x128xf32> -> vector<24x128xf32>
    %c0_254 = arith.constant 0 : index
    %c0_255 = arith.constant 0 : index
    %701 = vector.load %arg32[%c0_254, %c0_255] : memref<1x128xf32, #tpu.memory_space<vmem>>, vector<1x128xf32>
    %702 = vector.broadcast %701 : vector<1x128xf32> to vector<24x128xf32>
    %703 = arith.addf %700, %702 : vector<24x128xf32>
    %cst_256 = arith.constant 1.702000e+00 : f32
    %704 = vector.broadcast %cst_256 : f32 to vector<24x128xf32>
    %705 = arith.mulf %704, %703 : vector<24x128xf32>
    %706 = arith.negf %705 : vector<24x128xf32>
    %707 = math.exp %706 : vector<24x128xf32>
    %cst_257 = arith.constant 1.000000e+00 : f32
    %708 = vector.broadcast %cst_257 : f32 to vector<24x128xf32>
    %709 = arith.addf %708, %707 : vector<24x128xf32>
    %710 = arith.divf %708, %709 : vector<24x128xf32>
    %711 = arith.mulf %703, %710 : vector<24x128xf32>
    %c0_258 = arith.constant 0 : index
    %c0_259 = arith.constant 0 : index
    %712 = vector.load %arg33[%c0_258, %c0_259] : memref<128x32xbf16, #tpu.memory_space<vmem>>, vector<128x32xbf16>
    %713 = arith.truncf %711 : vector<24x128xf32> to vector<24x128xbf16>
    %cst_260 = arith.constant dense<0.000000e+00> : vector<24x32xf32>
    %714 = tpu.matmul %713, %712, %cst_260 {dimension_numbers = #tpu.dot_dimension_numbers<[1], [0], [0], [1], [0, 0, 1, 1], [], []>} : vector<24x128xbf16>, vector<128x32xbf16>, vector<24x32xf32> -> vector<24x32xf32>
    %c0_261 = arith.constant 0 : index
    %c0_262 = arith.constant 0 : index
    %715 = vector.load %arg34[%c0_261, %c0_262] : memref<1x32xf32, #tpu.memory_space<vmem>>, vector<1x32xf32>
    %716 = vector.broadcast %715 : vector<1x32xf32> to vector<24x32xf32>
    %717 = arith.addf %714, %716 : vector<24x32xf32>
    %718 = arith.addf %673, %717 : vector<24x32xf32>
    %cst_263 = arith.constant dense<0.000000e+00> : vector<24xf32>
    %719 = vector.multi_reduction <add>, %718, %cst_263 [1] : vector<24x32xf32> to vector<24xf32>
    %720 = vector.shape_cast %719 : vector<24xf32> to vector<24x1xf32>
    %cst_264 = arith.constant 3.200000e+01 : f32
    %721 = vector.broadcast %cst_264 : f32 to vector<24x1xf32>
    %722 = arith.divf %720, %721 : vector<24x1xf32>
    %723 = vector.broadcast %722 : vector<24x1xf32> to vector<24x32xf32>
    %724 = arith.subf %718, %723 : vector<24x32xf32>
    %725 = arith.mulf %724, %724 : vector<24x32xf32>
    %cst_265 = arith.constant dense<0.000000e+00> : vector<24xf32>
    %726 = vector.multi_reduction <add>, %725, %cst_265 [1] : vector<24x32xf32> to vector<24xf32>
    %727 = vector.shape_cast %726 : vector<24xf32> to vector<24x1xf32>
    %cst_266 = arith.constant 3.200000e+01 : f32
    %728 = vector.broadcast %cst_266 : f32 to vector<24x1xf32>
    %729 = arith.divf %727, %728 : vector<24x1xf32>
    %730 = vector.broadcast %722 : vector<24x1xf32> to vector<24x32xf32>
    %731 = arith.subf %718, %730 : vector<24x32xf32>
    %cst_267 = arith.constant 9.99999974E-6 : f32
    %732 = vector.broadcast %cst_267 : f32 to vector<24x1xf32>
    %733 = arith.addf %729, %732 : vector<24x1xf32>
    %734 = math.rsqrt %733 : vector<24x1xf32>
    %735 = vector.broadcast %734 : vector<24x1xf32> to vector<24x32xf32>
    %736 = arith.mulf %731, %735 : vector<24x32xf32>
    %c0_268 = arith.constant 0 : index
    %c0_269 = arith.constant 0 : index
    %737 = vector.load %arg35[%c0_268, %c0_269] : memref<1x32xf32, #tpu.memory_space<vmem>>, vector<1x32xf32>
    %738 = vector.broadcast %737 : vector<1x32xf32> to vector<24x32xf32>
    %739 = arith.mulf %736, %738 : vector<24x32xf32>
    %c0_270 = arith.constant 0 : index
    %c0_271 = arith.constant 0 : index
    %740 = vector.load %arg36[%c0_270, %c0_271] : memref<1x32xf32, #tpu.memory_space<vmem>>, vector<1x32xf32>
    %741 = vector.broadcast %740 : vector<1x32xf32> to vector<24x32xf32>
    %742 = arith.addf %739, %741 : vector<24x32xf32>
    %c0_272 = arith.constant 0 : index
    %c0_273 = arith.constant 0 : index
    %743 = vector.load %arg38[%c0_272, %c0_273] : memref<3x24xf32, #tpu.memory_space<vmem>>, vector<3x24xf32>
    %cst_274 = arith.constant dense<0.000000e+00> : vector<3x32xf32>
    %744 = tpu.matmul %743, %742, %cst_274 {dimension_numbers = #tpu.dot_dimension_numbers<[1], [0], [0], [1], [0, 0, 1, 1], [], []>} : vector<3x24xf32>, vector<24x32xf32>, vector<3x32xf32> -> vector<3x32xf32>
    %c0_275 = arith.constant 0 : index
    %c0_276 = arith.constant 0 : index
    %745 = vector.load %arg37[%c0_275, %c0_276] : memref<32x32xbf16, #tpu.memory_space<vmem>>, vector<32x32xbf16>
    %746 = arith.truncf %744 : vector<3x32xf32> to vector<3x32xbf16>
    %cst_277 = arith.constant dense<0.000000e+00> : vector<3x32xf32>
    %747 = tpu.matmul %746, %745, %cst_277 {dimension_numbers = #tpu.dot_dimension_numbers<[1], [0], [0], [1], [0, 0, 1, 1], [], []>} : vector<3x32xbf16>, vector<32x32xbf16>, vector<3x32xf32> -> vector<3x32xf32>
    %cst_278 = arith.constant dense<0.000000e+00> : vector<1x3xf32>
    %748 = tpu.matmul %340, %747, %cst_278 {dimension_numbers = #tpu.dot_dimension_numbers<[1], [1], [0], [0], [0, 0, 1, 0], [], []>} : vector<1x32xf32>, vector<3x32xf32>, vector<1x3xf32> -> vector<1x3xf32>
    %c0_279 = arith.constant 0 : index
    %c0_280 = arith.constant 0 : index
    %749 = vector.load %arg39[%c0_279, %c0_280] : memref<1x3xf32, #tpu.memory_space<vmem>>, vector<1x3xf32>
    tpu.vector_store %arg39[%c0_279, %c0_280], %748 {strides = array<i32>} : memref<1x3xf32, #tpu.memory_space<vmem>>, vector<1x3xf32>,
    return
  }
}

</mosaic_0001>

<bundles_post_ra>
// kernel: clip_benchmark_forward.1
= control target key start
LH: loop header
LB: loop body
LE: loop exit
PB: predicated region body
PF: predicated region fallthrough
CT: control target
= control target key end

     0   :  { %s6209_s6 = smov 1   ;;  %s6210_s10 = smov 2   ;;  %s7566_s0 = inlined_call_operand.smem [shape: u32[40], index: -1, kind: input, shape index: {}] }
   0x1   :  { %s6275_s5 = sld [smem:[%s7566_s0]]   ;;  %s6211_s14 = smov 3  }
   0x2   :  { %s6280_s9 = sld [smem:[%s7566_s0 + %s6209_s6]]   ;;  %s6212_s18 = smov 4  }
   0x3   :  { %s6285_s13 = sld [smem:[%s7566_s0 + %s6210_s10]]   ;;  %s6213_s22 = smov 5  }
   0x4   :  { %s6290_s17 = sld [smem:[%s7566_s0 + %s6211_s14]]   ;;  %s6214_s26 = smov 6  }
   0x5   :  { %s6295_s21 = sld [smem:[%s7566_s0 + %s6212_s18]]   ;;  %s6215_s30 = smov 7  }
   0x6   :  { %s6300_s25 = sld [smem:[%s7566_s0 + %s6213_s22]]   ;;  %s6216_s4 = smov 8  }
   0x7   :  { %s6305_s29 = sld [smem:[%s7566_s0 + %s6214_s26]]   ;;  %s6217_s10 = smov 9  }
   0x8   :  { %s6310_s3 = sld [smem:[%s7566_s0 + %s6215_s30]]   ;;  %s6218_s15 = smov 10  }
   0x9   :  { %s6315_s8 = sld [smem:[%s7566_s0 + %s6216_s4]]   ;;  %s6219_s20 = smov 11  }
   0xa   :  { %s6320_s14 = sld [smem:[%s7566_s0 + %s6217_s10]]   ;;  %s6220_s26 = smov 12  }
   0xb   :  { %s6325_s19 = sld [smem:[%s7566_s0 + %s6218_s15]]   ;;  %s6221_s1 = smov 13  }
   0xc   :  { %s6330_s24 = sld [smem:[%s7566_s0 + %s6219_s20]]   ;;  %s6222_s7 = smov 14  }
   0xd   :  { %s6335_s30 = sld [smem:[%s7566_s0 + %s6220_s26]]   ;;  %s6223_s15 = smov 15  }
   0xe   :  { %s6340_s6 = sld [smem:[%s7566_s0 + %s6221_s1]]   ;;  %s6224_s22 = smov 16  }
   0xf   :  { %s6345_s12 = sld [smem:[%s7566_s0 + %s6222_s7]]   ;;  %s6225_s28 = smov 17  }
  0x10   :  { %s6350_s20 = sld [smem:[%s7566_s0 + %s6223_s15]]   ;;  %s6226_s7 = smov 18  }
  0x11   :  { %s6355_s27 = sld [smem:[%s7566_s0 + %s6224_s22]]   ;;  %s6227_s15 = smov 19  }
  0x12   :  { %s6360_s4 = sld [smem:[%s7566_s0 + %s6225_s28]]   ;;  %s6228_s22 = smov 20  }
  0x13   :  { %s6229_s28 = smov 21  }
  0x14   :  { %7574 = sst [smem:[#allocation8_spill]] %s6340_s6 }
  0x15   :  { %s6365_s6 = sld [smem:[%s7566_s0 + %s6226_s7]]   ;;  %s6230_s7 = smov 22  }
  0x16   :  { %7575 = sst [smem:[#allocation9_spill]] %s6350_s20 }
  0x17   :  { %7576 = sst [smem:[#allocation10_spill]] %s6355_s27 }
  0x18   :  { %7577 = sst [smem:[#allocation11_spill]] %s6360_s4 }
  0x19   :  { %s6370_s20 = sld [smem:[%s7566_s0 + %s6227_s15]]   ;;  %s6231_s15 = smov 23  }
  0x1a   :  { %s6375_s27 = sld [smem:[%s7566_s0 + %s6228_s22]]   ;;  %s6232_s22 = smov 24  }
  0x1b   :  { %7578 = sst [smem:[#allocation12_spill]] %s6365_s6 }
  0x1c   :  { %s6380_s4 = sld [smem:[%s7566_s0 + %s6229_s28]]   ;;  %s6233_s28 = smov 25  }
  0x1d   :  { %s6385_s6 = sld [smem:[%s7566_s0 + %s6230_s7]]   ;;  %s6234_s7 = smov 26  }
  0x1f   :  { %7579 = sst [smem:[#allocation13_spill]] %s6370_s20 }
  0x20   :  { %7580 = sst [smem:[#allocation14_spill]] %s6375_s27 }
  0x21   :  { %s6390_s20 = sld [smem:[%s7566_s0 + %s6231_s15]]   ;;  %s6235_s15 = smov 27  }
  0x22   :  { %7581 = sst [smem:[#allocation15_spill]] %s6380_s4 }
  0x23   :  { %7582 = sst [smem:[#allocation16_spill]] %s6385_s6 }
  0x24   :  { %s6395_s27 = sld [smem:[%s7566_s0 + %s6232_s22]]   ;;  %s6236_s22 = smov 28  }
  0x25   :  { %s6400_s4 = sld [smem:[%s7566_s0 + %s6233_s28]]   ;;  %s6237_s28 = smov 29  }
  0x26   :  { %s6405_s6 = sld [smem:[%s7566_s0 + %s6234_s7]]   ;;  %s6238_s7 = smov 30  }
  0x27   :  { %7583 = sst [smem:[#allocation17_spill]] %s6390_s20 }
  0x28   :  { %s6410_s20 = sld [smem:[%s7566_s0 + %s6235_s15]]   ;;  %s6239_s15 = smov 31  }
  0x2a   :  { %7584 = sst [smem:[#allocation18_spill]] %s6395_s27 }
  0x2b   :  { %7585 = sst [smem:[#allocation19_spill]] %s6400_s4 }
  0x2c   :  { %7586 = sst [smem:[#allocation20_spill]] %s6405_s6 }
  0x2d   :  { %s6415_s27 = sld [smem:[%s7566_s0 + %s6236_s22]]   ;;  %s6240_s22 = smov 32  }
  0x2e   :  { %7587 = sst [smem:[#allocation21_spill]] %s6410_s20 }
  0x2f   :  { %s6420_s4 = sld [smem:[%s7566_s0 + %s6237_s28]]   ;;  %s6241_s28 = smov 33  }
  0x30   :  { %s6425_s6 = sld [smem:[%s7566_s0 + %s6238_s7]]   ;;  %s6242_s7 = smov 34  }
  0x31   :  { %s6430_s20 = sld [smem:[%s7566_s0 + %s6239_s15]]   ;;  %s6243_s15 = smov 35  }
  0x33   :  { %7588 = sst [smem:[#allocation22_spill]] %s6415_s27 }
  0x34   :  { %s6435_s27 = sld [smem:[%s7566_s0 + %s6240_s22]]   ;;  %s6244_s22 = smov 36  }
  0x35   :  { %7589 = sst [smem:[#allocation23_spill]] %s6420_s4 }
  0x36   :  { %7590 = sst [smem:[#allocation24_spill]] %s6425_s6 }
  0x37   :  { %7591 = sst [smem:[#allocation25_spill]] %s6430_s20 }
  0x38   :  { %s6440_s4 = sld [smem:[%s7566_s0 + %s6241_s28]]   ;;  %s6245_s28 = smov 37  }
  0x39   :  { %s6445_s6 = sld [smem:[%s7566_s0 + %s6242_s7]]   ;;  %s6246_s7 = smov 38  }
  0x3a   :  { %7592 = sst [smem:[#allocation26_spill]] %s6435_s27 }
  0x3b   :  { %s6450_s20 = sld [smem:[%s7566_s0 + %s6243_s15]]   ;;  %s6247_s15 = smov 39  }
  0x3c   :  { %s6455_s27 = sld [smem:[%s7566_s0 + %s6244_s22]]  }
  0x3e   :  { %7593 = sst [smem:[#allocation27_spill]] %s6440_s4 }
  0x3f   :  { %7594 = sst [smem:[#allocation28_spill]] %s6445_s6 }
  0x40   :  { %s6460_s4 = sld [smem:[%s7566_s0 + %s6245_s28]]  }
  0x41   :  { %7595 = sst [smem:[#allocation29_spill]] %s6450_s20 }
  0x42   :  { %s6465_s6 = sld [smem:[%s7566_s0 + %s6246_s7]]  }
  0x43   :  { %s6470_s20 = sld [smem:[%s7566_s0 + %s6247_s15]]  }
  0x44   :  { %v5904_v0 = vld [vmem:[%s6280_s9] sm:$0xff]   ;;  %v6248_v1 = vmov 0   ;;  %v5905_v2 = vld [vmem:[%s6280_s9 + $0x8] sm:$0xff]   ;;  %v5906_v3 = vld [vmem:[%s6280_s9 + $0x10] sm:$0xff]   ;;  %vm272_vm0 = vcmask 523264  }
  0x45   :  { %279 = vmatprep.subr.bf16.mxu0 %v6248_v1  ;;  %v5907_v4 = vld [vmem:[%s6280_s9 + $0x18] sm:$0xff]   ;;  %v165_v5 = vld [vmem:[%s6275_s5 + $0x8] sm:$0xff]  ;;  %v5908_v8 = vld [vmem:[%s6280_s9 + $0x20] sm:$0xff]  }
  0x46   :  { %280 = vmatpush1.bf16.msra.mxu0 %v5904_v0  ;;  %v167_v6 = vld [vmem:[%s6275_s5 + $0x18] sm:$0xff]  ;;  %v5909_v9 = vld [vmem:[%s6280_s9 + $0x28] sm:$0xff]   ;;  %v5910_v10 = vld [vmem:[%s6280_s9 + $0x30] sm:$0xff]  }
  0x47   :  { %281 = vmatprep.subr.bf16.mxu0 %v6248_v1  ;;  %v197_v7 = vpack.c.bf16 %v167_v6, %v165_v5  ;;  %v5911_v11 = vld [vmem:[%s6280_s9 + $0x38] sm:$0xff]   ;;  %v5912_v12 = vld [vmem:[%s6280_s9 + $0x40] sm:$0xff]   ;;  %v5913_v13 = vld [vmem:[%s6280_s9 + $0x48] sm:$0xff]  }
  0x49   :  { %5054 = vmatprep.mubr.msk.bf16.mxu0 %vm272_vm0, %v197_v7 }
  0x4a   :  { %282 = vmatpush1.bf16.msra.mxu0 %v5905_v2 }
  0x4b   :  { %283 = vmatprep.subr.bf16.mxu0 %v6248_v1 }
  0x4e   :  { %284 = vmatpush1.bf16.msra.mxu0 %v5906_v3 }
  0x4f   :  { %285 = vmatprep.subr.bf16.mxu0 %v6248_v1 }
  0x52   :  { %286 = vmatpush1.bf16.msra.mxu0 %v5907_v4 }
  0x53   :  { %287 = vmatprep.subr.bf16.mxu0 %v6248_v1 }
  0x56   :  { %288 = vmatpush1.bf16.msra.mxu0 %v5908_v8 }
  0x57   :  { %289 = vmatprep.subr.bf16.mxu0 %v6248_v1 }
  0x5a   :  { %290 = vmatpush1.bf16.msra.mxu0 %v5909_v9 }
  0x5b   :  { %291 = vmatprep.subr.bf16.mxu0 %v6248_v1 }
  0x5e   :  { %292 = vmatpush1.bf16.msra.mxu0 %v5910_v10 }
  0x5f   :  { %293 = vmatprep.subr.bf16.mxu0 %v6248_v1 }
  0x62   :  { %294 = vmatpush1.bf16.msra.mxu0 %v5911_v11 }
  0x63   :  { %295 = vmatprep.subr.bf16.mxu0 %v6248_v1 }
  0x66   :  { %296 = vmatpush1.bf16.msra.mxu0 %v5912_v12 }
  0x67   :  { %297 = vmatprep.subr.bf16.mxu0 %v6248_v1 }
  0x68   :  { %84 = vsyncpa [#allocation6], 0  ;;  %v5914_v14 = vld [vmem:[%s6280_s9 + $0x50] sm:$0xff]   ;;  %v5915_v15 = vld [vmem:[%s6280_s9 + $0x58] sm:$0xff]   ;;  %vm333_vm1 = vcmask 253952   ;;  %vm338_vm2 = vcmask 1046528  }
  0x69   :  { %v164_v16 = vld [vmem:[%s6275_s5] sm:$0xff]  ;;  %v166_v17 = vld [vmem:[%s6275_s5 + $0x10] sm:$0xff]  ;;  %v169_v18 = vld [vmem:[%s6275_s5 + $0x28] sm:$0xff]  ;;  %vm348_vm3 = vcmask 261120   ;;  %vm373_vm4 = vcmask 254976   ;;  %vm6250_vm5 = vmmov 0  }
  0x6a   :  { %298 = vmatpush1.bf16.msra.mxu0 %v5913_v13  ;;  %v171_v19 = vld [vmem:[%s6275_s5 + $0x38] sm:$0xff]  ;;  %v196_v20 = vpack.c.bf16 %v166_v17, %v164_v16  ;;  %v168_v22 = vld [vmem:[%s6275_s5 + $0x20] sm:$0xff]  ;;  %v170_v23 = vld [vmem:[%s6275_s5 + $0x30] sm:$0xff]  ;;  %s6251_s0 = smov 96   ;;  %vm640_vm6 = vcmask 64512   ;;  %vm704_vm8 = vcmask 138240  }
  0x6b   :  { %299 = vmatprep.subr.bf16.mxu0 %v6248_v1  ;;  %v199_v21 = vpack.c.bf16 %v171_v19, %v169_v18  ;;  %v198_v24 = vpack.c.bf16 %v170_v23, %v168_v22  ;;  %v328_v25 = vld [vmem:[%s6290_s17] sm:$0xff]  ;;  %v329_v28 = vld [vmem:[%s6290_s17 + $0x8] sm:$0xff]  ;;  %v330_v29 = vld [vmem:[%s6290_s17 + $0x10] sm:$0x1]  ;;  %vm1367_vm7 = vsmask.f32 7424 }
  0x6c   :  { %v331_v26 = vld [vmem:[%s6285_s13] sm:$0x1]  ;;  %v339_v30 = vrot.slane %v328_v25, 1  ;;  %v340_v31 = vrot.slane %v329_v28, 1  ;;  %v342_v32 = vrot.slane %v330_v29, 1  ;;  %vm711_vm9 = vcmask 131072  }
  0x6d   :  { %v332_v27 = vadd.f32 %v331_v26, %v328_v25  ;;  %v6523_v25 = vld [vmem:[%s6295_s21] ss:$0 sm:$0xff]  ;;  %s6252_s5 = smov 64   ;;  %s6253_s9 = smov 120   ;;  %vm752_vm10 = vcmask 1040384   ;;  %vm808_vm11 = vcmask 57344  }
  0x6e   :  { %300 = vmatpush1.bf16.msra.mxu0 %v5914_v14  ;;  %v341_v33 = vsel %vm338_vm2, %v339_v30, %v340_v31  ;;  %v343_v35 = vsel %vm338_vm2, %v340_v31, %v342_v32  ;;  %s6254_s13 = smov 88   ;;  %s6255_s17 = smov 56   ;;  %vm990_vm12 = vcmask 130112   ;;  %vm1175_vm13 = vcmask 195712  }
  0x6f   :  { %301 = vmatprep.subr.bf16.mxu0 %v6248_v1  ;;  %334 = vst.msk [vmem:[#allocation2] sm:$0x1] %vm333_vm1, %v332_v27  ;;  %351 = vst.msk [vmem:[#allocation2 + $0x11] sm:$0x1] %vm333_vm1, %v332_v27  ;;  %v6526_v27 = vld [vmem:[%s6300_s25] ss:$0 sm:$0xff] }
  0x70   :  { %s6256_s21 = smov 80   ;;  %s6257_s25 = smov 112   ;;  %vm1360_vm14 = vcmask 261312   ;;  %vm993_vm15 = vcmask 122944   ;;  %vm1363_vm1 = vcmask 254144   ;;  %vm2732_vm2 = vcmask 1041408  }
  0x71   :  { %s6262_s22 = smov 8   ;;  %s6263_s23 = smov 16  }
  0x72   :  { %302 = vmatpush1.bf16.msra.mxu0 %v5915_v15  ;;  %s6264_s26 = smov 24   ;;  %s7600_s28 = sld [smem:[#allocation11_spill]] }
  0x73   :  { %s7601_s1 = sld [smem:[#allocation19_spill]]  ;;  %s7602_s2 = sld [smem:[#allocation14_spill]] }
  0x74   :  { %s7603_s7 = sld [smem:[#allocation17_spill]]  ;;  %s7604_s10 = sld [smem:[#allocation12_spill]] }
  0x75   :  { %312 = vmatmul.mubr.bf16.vlgmr.msra.gmra.mrb[0].mxu0 %v196_v20  ;;  %s7605_s11 = sld [smem:[#allocation18_spill]]  ;;  %s7606_s15 = sld [smem:[#allocation13_spill]] }
  0x76   :  { %5055 = vmatprep.mubr.msk.bf16.mxu0 %vm272_vm0, %v199_v21  ;;  %vm1178_vm0 = vcmask 188544   ;;  %s7607_s16 = sld [smem:[#allocation20_spill]]  ;;  %s7608_s18 = sld [smem:[#allocation15_spill]] }
  0x7d   :  { %320 = vmatmul.mubr.bf16.gmra.mrb[4].mxu0 %v198_v24 }
 0x148   :  { %v313_v34 = vpop.f32.mrb[0].mxu0 }
 0x149   :  { %v346_v36 = vadd.f32 %v341_v33, %v313_v34  ;;  %v315_v37 = vpop.f32.mrb[1].mxu0 }
 0x14a   :  { %v316_v38 = vpop.f32.mrb[2].mxu0 }
 0x14b   :  { %349 = vst.msk [vmem:[#allocation2 + $0x1] sm:$0xff] %vm348_vm3, %v346_v36  ;;  %v347_v39 = vadd.f32 %v343_v35, %v316_v38  ;;  %v318_v40 = vpop.f32.mrb[3].mxu0 }
 0x14d   :  { %350 = vst.msk [vmem:[#allocation2 + $0x9] sm:$0xff] %vm348_vm3, %v347_v39 }
 0x150   :  { %v321_v41 = vpop.f32.mrb[4].mxu0 }
 0x151   :  { %v352_v42 = vadd.f32 %v341_v33, %v321_v41  ;;  %v323_v43 = vpop.f32.mrb[5].mxu0 }
 0x152   :  { %v324_v44 = vpop.f32.mrb[6].mxu0  ;;  %v356_v45 = vld [vmem:[#allocation2] sm:$0xff] }
 0x153   :  { %354 = vst.msk [vmem:[#allocation2 + $0x12] sm:$0xff] %vm348_vm3, %v352_v42  ;;  %v353_v46 = vadd.f32 %v343_v35, %v324_v44  ;;  %v326_v47 = vpop.f32.mrb[7].mxu0  ;;  %v361_v48 = vsel %vm348_vm3, %v356_v45, 0.0 }
 0x154   :  { %362 = vadd.xlane.f32.xlu0 %v361_v48  ;;  %v357_v49 = vld [vmem:[#allocation2 + $0x8] sm:$0xff] }
 0x155   :  { %355 = vst.msk [vmem:[#allocation2 + $0x1a] sm:$0xff] %vm348_vm3, %v353_v46  ;;  %v364_v50 = vsel %vm348_vm3, %v357_v49, 0.0 }
 0x158   :  { %365 = vadd.xlane.f32.xlu0 %v364_v50 }
 0x15a   :  { %v358_v51 = vld [vmem:[#allocation2 + $0x10] sm:$0xff] }
 0x15b   :  { %v367_v52 = vsel %vm348_vm3, %v358_v51, 0.0 }
 0x15c   :  { %368 = vadd.xlane.f32.xlu1 %v367_v52  ;;  %v359_v53 = vld [vmem:[#allocation2 + $0x18] sm:$0xff] }
 0x15d   :  { %v370_v54 = vsel %vm348_vm3, %v359_v53, 0.0 }
 0x160   :  { %371 = vadd.xlane.f32.xlu1 %v370_v54 }
 0x1e1   :  { %v363_v55 = vpop.xlane.xlu0 %362 }
 0x1e2   :  { %v378_v56 = vmul.f32 0.03125, %v363_v55 }
 0x1e4   :  { %v383_v57 = vsub.f32 %v356_v45, %v378_v56 }
 0x1e5   :  { %v366_v58 = vpop.xlane.xlu0 %365 }
 0x1e6   :  { %v379_v59 = vmul.f32 0.03125, %v366_v58  ;;  %v388_v60 = vmul.f32 %v383_v57, %v383_v57 }
 0x1e8   :  { %v384_v61 = vsub.f32 %v357_v49, %v379_v59  ;;  %v393_v62 = vsel %vm348_vm3, %v388_v60, 0.0 }
 0x1e9   :  { %394 = vadd.xlane.f32.xlu0 %v393_v62  ;;  %v369_v63 = vpop.xlane.xlu1 %368 }
 0x1ea   :  { %v380_v0 = vmul.f32 0.03125, %v369_v63  ;;  %v389_v2 = vmul.f32 %v384_v61, %v384_v61 }
 0x1ec   :  { %v385_v3 = vsub.f32 %v358_v51, %v380_v0  ;;  %v396_v4 = vsel %vm348_vm3, %v389_v2, 0.0  ;;  %v360_v0 = vld [vmem:[#allocation2 + $0x20] sm:$0x3] }
 0x1ed   :  { %397 = vadd.xlane.f32.xlu1 %v396_v4  ;;  %v372_v5 = vpop.xlane.xlu1 %371 }
 0x1ee   :  { %v381_v6 = vmul.f32 0.03125, %v372_v5  ;;  %v390_v7 = vmul.f32 %v385_v3, %v385_v3  ;;  %v6249_v5 = vmov 0.0  }
 0x1ef   :  { %5378 = vmatprep.subr.bf16.mxu1 %v6249_v5  ;;  %5382 = vmatprep.mubr.msk.bf16.mxu1 %vm6250_vm5, %v6249_v5 }
 0x1f0   :  { %v386_v8 = vsub.f32 %v359_v53, %v381_v6  ;;  %v399_v9 = vsel %vm348_vm3, %v390_v7, 0.0  ;;  %v5916_v6 = vld [vmem:[%s6315_s8] sm:$0xff]   ;;  %v5917_v7 = vld [vmem:[%s6315_s8 + $0x8] sm:$0xff]   ;;  %s6260_s8 = smov 104  }
 0x1f1   :  { %400 = vadd.xlane.f32.xlu0 %v399_v9  ;;  %5379 = vmatpush3.bf16.msra.mxu1 %v5916_v6 }
 0x1f2   :  { %v391_v10 = vmul.f32 %v386_v8, %v386_v8  ;;  %5380 = vmatprep.subr.bf16.mxu1 %v6249_v5 }
 0x1f4   :  { %v402_v11 = vsel %vm348_vm3, %v391_v10, 0.0 }
 0x1f5   :  { %403 = vadd.xlane.f32.xlu1 %v402_v11  ;;  %5381 = vmatpush3.bf16.msra.mxu1 %v5917_v7 }
 0x276   :  { %v395_v12 = vpop.xlane.xlu0 %394 }
 0x277   :  { %v408_v13 = vmul.f32 0.03125, %v395_v12 }
 0x279   :  { %v413_v14 = vadd.f32 1e-05, %v408_v13 }
 0x27a   :  { %v398_v15 = vpop.xlane.xlu1 %397 }
 0x27b   :  { %5948 = vrsqrt.f32 %v413_v14  ;;  %v409_v16 = vmul.f32 0.03125, %v398_v15 }
 0x27d   :  { %v414_v17 = vadd.f32 1e-05, %v409_v16 }
 0x27e   :  { %v401_v18 = vpop.xlane.xlu0 %400 }
 0x27f   :  { %5950 = vrsqrt.f32 %v414_v17  ;;  %v410_v19 = vmul.f32 0.03125, %v401_v18 }
 0x281   :  { %v415_v20 = vadd.f32 1e-05, %v410_v19 }
 0x282   :  { %v404_v21 = vpop.xlane.xlu1 %403 }
 0x283   :  { %5952 = vrsqrt.f32 %v415_v20  ;;  %v411_v22 = vmul.f32 0.03125, %v404_v21 }
 0x285   :  { %v5949_v23 = vpop.eup %5948  ;;  %v416_v24 = vadd.f32 1e-05, %v411_v22 }
 0x286   :  { %v423_v26 = vmul.f32 %v5949_v23, %v383_v57 }
 0x287   :  { %5954 = vrsqrt.f32 %v416_v24 }
 0x288   :  { %v435_v28 = vmul.f32 %v6523_v25, %v423_v26 }
 0x289   :  { %v5951_v29 = vpop.eup %5950 }
 0x28a   :  { %v6530_v30 = vadd.f32 %v6526_v27, %v435_v28  ;;  %v424_v31 = vmul.f32 %v5951_v29, %v384_v61  ;;  %v6568_v28 = vld [vmem:[%s6305_s29] ss:$0 sm:$0xff]  ;;  %s6258_s29 = smov 48  }
 0x28c   :  { %v452_v32 = vsel %vm348_vm3, %v6530_v30, 0.0  ;;  %v436_v33 = vmul.f32 %v6523_v25, %v424_v31 }
 0x28d   :  { %v5953_v34 = vpop.eup %5952  ;;  %453 = vadd.xlane.f32.xlu0 %v452_v32 }
 0x28e   :  { %v6536_v35 = vadd.f32 %v6526_v27, %v436_v33  ;;  %v425_v36 = vmul.f32 %v5953_v34, %v385_v3  ;;  %v374_v3 = vsel %vm373_vm4, %v360_v0, 0.0  ;;  %v6573_v34 = vld [vmem:[%s6310_s3] ss:$0 sm:$0xff]  ;;  %s6259_s3 = smov 72  }
 0x290   :  { %v455_v37 = vsel %vm348_vm3, %v6536_v35, 0.0  ;;  %v437_v38 = vmul.f32 %v6523_v25, %v425_v36 }
 0x291   :  { %v5955_v39 = vpop.eup %5954  ;;  %456 = vadd.xlane.f32.xlu1 %v455_v37 }
 0x292   :  { %v6542_v40 = vadd.f32 %v6526_v27, %v437_v38  ;;  %v426_v41 = vmul.f32 %v5955_v39, %v386_v8 }
 0x294   :  { %v458_v42 = vsel %vm348_vm3, %v6542_v40, 0.0  ;;  %v438_v43 = vmul.f32 %v6523_v25, %v426_v41 }
 0x295   :  { %459 = vadd.xlane.f32.xlu0 %v458_v42 }
 0x296   :  { %v6548_v44 = vadd.f32 %v6526_v27, %v438_v43 }
 0x298   :  { %v461_v45 = vsel %vm348_vm3, %v6548_v44, 0.0 }
 0x299   :  { %462 = vadd.xlane.f32.xlu1 %v461_v45 }
 0x31a   :  { %v454_v46 = vpop.xlane.xlu0 %453 }
 0x31b   :  { %v467_v47 = vmul.f32 0.03125, %v454_v46 }
 0x31d   :  { %v472_v48 = vsub.f32 %v6530_v30, %v467_v47 }
 0x31e   :  { %v457_v49 = vpop.xlane.xlu1 %456 }
 0x31f   :  { %v468_v50 = vmul.f32 0.03125, %v457_v49  ;;  %v477_v51 = vmul.f32 %v472_v48, %v472_v48 }
 0x321   :  { %v473_v52 = vsub.f32 %v6536_v35, %v468_v50  ;;  %v482_v53 = vsel %vm348_vm3, %v477_v51, 0.0 }
 0x322   :  { %483 = vadd.xlane.f32.xlu0 %v482_v53  ;;  %v460_v54 = vpop.xlane.xlu0 %459 }
 0x323   :  { %v469_v55 = vmul.f32 0.03125, %v460_v54  ;;  %v478_v56 = vmul.f32 %v473_v52, %v473_v52 }
 0x325   :  { %v474_v57 = vsub.f32 %v6542_v40, %v469_v55  ;;  %v485_v58 = vsel %vm348_vm3, %v478_v56, 0.0 }
 0x326   :  { %486 = vadd.xlane.f32.xlu1 %v485_v58  ;;  %v463_v59 = vpop.xlane.xlu1 %462 }
 0x327   :  { %v470_v60 = vmul.f32 0.03125, %v463_v59  ;;  %v479_v61 = vmul.f32 %v474_v57, %v474_v57  ;;  %v5060_v59 = vld [vmem:[%s6320_s14] ss:$0 sm:$0xff]  ;;  %s6261_s14 = smov 40  }
 0x329   :  { %v475_v62 = vsub.f32 %v6548_v44, %v470_v60  ;;  %v488_v63 = vsel %vm348_vm3, %v479_v61, 0.0 }
 0x32a   :  { %489 = vadd.xlane.f32.xlu0 %v488_v63 }
 0x32b   :  { %v480_v2 = vmul.f32 %v475_v62, %v475_v62 }
 0x32d   :  { %v491_v4 = vsel %vm348_vm3, %v480_v2, 0.0 }
 0x32e   :  { %375 = vadd.xlane.f32.xlu0 %v374_v3  ;;  %492 = vadd.xlane.f32.xlu1 %v491_v4 }
 0x3af   :  { %v484_v8 = vpop.xlane.xlu0 %483 }
 0x3b0   :  { %v497_v9 = vmul.f32 0.03125, %v484_v8 }
 0x3b2   :  { %v502_v10 = vadd.f32 1e-05, %v497_v9 }
 0x3b3   :  { %v487_v11 = vpop.xlane.xlu1 %486 }
 0x3b4   :  { %5956 = vrsqrt.f32 %v502_v10  ;;  %v498_v12 = vmul.f32 0.03125, %v487_v11 }
 0x3b6   :  { %v503_v13 = vadd.f32 1e-05, %v498_v12 }
 0x3b7   :  { %v490_v14 = vpop.xlane.xlu0 %489 }
 0x3b8   :  { %5958 = vrsqrt.f32 %v503_v13  ;;  %v499_v15 = vmul.f32 0.03125, %v490_v14 }
 0x3ba   :  { %v504_v16 = vadd.f32 1e-05, %v499_v15 }
 0x3bb   :  { %v376_v17 = vpop.xlane.xlu0 %375  ;;  %v493_v18 = vpop.xlane.xlu1 %492 }
 0x3bc   :  { %5960 = vrsqrt.f32 %v504_v16  ;;  %v382_v19 = vmul.f32 0.03125, %v376_v17  ;;  %v500_v20 = vmul.f32 0.03125, %v493_v18 }
 0x3be   :  { %v5957_v21 = vpop.eup %5956  ;;  %v387_v22 = vsub.f32 %v360_v0, %v382_v19  ;;  %v505_v23 = vadd.f32 1e-05, %v500_v20 }
 0x3bf   :  { %v512_v24 = vmul.f32 %v5957_v21, %v472_v48 }
 0x3c0   :  { %5962 = vrsqrt.f32 %v505_v23  ;;  %v392_v26 = vmul.f32 %v387_v22, %v387_v22 }
 0x3c1   :  { %v524_v33 = vmul.f32 %v6568_v28, %v512_v24 }
 0x3c2   :  { %v5959_v29 = vpop.eup %5958  ;;  %v405_v31 = vsel %vm373_vm4, %v392_v26, 0.0 }
 0x3c3   :  { %406 = vadd.xlane.f32.xlu1 %v405_v31  ;;  %v513_v32 = vmul.f32 %v5959_v29, %v473_v52  ;;  %v536_v38 = vadd.f32 %v6573_v34, %v524_v33 }
 0x3c5   :  { %v525_v36 = vmul.f32 %v6568_v28, %v513_v32 }
 0x3c6   :  { %v5961_v37 = vpop.eup %5960 }
 0x3c7   :  { %v537_v39 = vadd.f32 %v6573_v34, %v525_v36  ;;  %v514_v41 = vmul.f32 %v5961_v37, %v474_v57 }
 0x3c9   :  { %v545_v42 = vpack.c.bf16 %v537_v39, %v536_v38  ;;  %v526_v46 = vmul.f32 %v6568_v28, %v514_v41 }
 0x3ca   :  { %v5963_v43 = vpop.eup %5962 }
 0x3cb   :  { %5383 = vmatmul.mubr.msk.bf16.vlgmr.msra.gmra.mrb[0].mxu1 %vm348_vm3, %v545_v42  ;;  %v515_v45 = vmul.f32 %v5963_v43, %v475_v62  ;;  %v538_v48 = vadd.f32 %v6573_v34, %v526_v46 }
 0x3cc   :  { %5386 = vmatprep.mubr.msk.bf16.mxu1 %vm6250_vm5, %v6249_v5 }
 0x3cd   :  { %v527_v47 = vmul.f32 %v6568_v28, %v515_v45 }
 0x3cf   :  { %v539_v49 = vadd.f32 %v6573_v34, %v527_v47 }
 0x3d1   :  { %v546_v50 = vpack.c.bf16 %v539_v49, %v538_v48 }
 0x3d3   :  { %5387 = vmatmul.mubr.msk.bf16.gmra.mrb[4].mxu1 %vm348_vm3, %v546_v50 }
 0x3d4   :  { %5390 = vmatprep.mubr.msk.bf16.mxu1 %vm6250_vm5, %v6249_v5 }
 0x450   :  { %v407_v51 = vpop.xlane.xlu1 %406 }
 0x451   :  { %v412_v52 = vmul.f32 0.03125, %v407_v51 }
 0x453   :  { %v417_v53 = vadd.f32 1e-05, %v412_v52 }
 0x455   :  { %5964 = vrsqrt.f32 %v417_v53 }
 0x45f   :  { %v5965_v54 = vpop.eup %5964 }
 0x460   :  { %v427_v55 = vmul.f32 %v5965_v54, %v387_v22 }
 0x462   :  { %v439_v56 = vmul.f32 %v6523_v25, %v427_v55 }
 0x464   :  { %v6590_v57 = vadd.f32 %v6526_v27, %v439_v56 }
 0x466   :  { %v464_v58 = vsel %vm373_vm4, %v6590_v57, 0.0 }
 0x467   :  { %465 = vadd.xlane.f32.xlu0 %v464_v58 }
 0x49e   :  { %v610_v60 = vpop.f32.mrb[0].mxu1 }
 0x49f   :  { %v5384_v61 = vpop.f32.mrb[1].mxu1  ;;  %v611_v63 = vadd.f32 %v5060_v59, %v610_v60 }
 0x4a0   :  { %v613_v62 = vpop.f32.mrb[2].mxu1 }
 0x4a1   :  { %v614_v0 = vadd.f32 %v5060_v59, %v613_v62  ;;  %v5385_v2 = vpop.f32.mrb[3].mxu1 }
 0x4a3   :  { %v6595_v3 = vpack.c.bf16 %v614_v0, %v611_v63 }
 0x4a5   :  { %636 = vrot.lane.b32.xlu0 %v6595_v3, %s6251_s0 }
 0x4a6   :  { %v618_v25 = vpop.f32.mrb[4].mxu1 }
 0x4a7   :  { %v5388_v27 = vpop.f32.mrb[5].mxu1  ;;  %v619_v6 = vadd.f32 %v5060_v59, %v618_v25 }
 0x4a8   :  { %v621_v4 = vpop.f32.mrb[6].mxu1 }
 0x4a9   :  { %v622_v7 = vadd.f32 %v5060_v59, %v621_v4  ;;  %v5389_v8 = vpop.f32.mrb[7].mxu1  ;;  %v6601_v15 = vpack.c.bf16 %v619_v6, %v619_v6 }
 0x4ab   :  { %v1365_v9 = vpack.c.bf16 %v622_v7, %v619_v6 }
 0x4ad   :  { %v1371_v32 = vshll.u32 %v1365_v9, 16  ;;  %v1369_v42 = vshrl.u32 %v1365_v9, 16 }
 0x4af   :  { %v1373_v39 = vrot.slane %v1371_v32, 1 }
 0x4b1   :  { %v1374_v43 = vor.u32 %v1373_v39, %v1369_v42 }
 0x4f4   :  { %v466_v10 = vpop.xlane.xlu0 %465 }
 0x4f5   :  { %v471_v11 = vmul.f32 0.03125, %v466_v10 }
 0x4f7   :  { %v476_v12 = vsub.f32 %v6590_v57, %v471_v11 }
 0x4f9   :  { %v481_v13 = vmul.f32 %v476_v12, %v476_v12 }
 0x4fb   :  { %v494_v14 = vsel %vm373_vm4, %v481_v13, 0.0 }
 0x4fc   :  { %495 = vadd.xlane.f32.xlu1 %v494_v14  ;;  %v6640_v14 = vsel %vm752_vm10, 65535, %v6248_v1 }
 0x50d   :  { %638 = vrot.lane.b32.xlu1 %v6601_v15, %s6251_s0 }
 0x517   :  { %v637_v16 = vpop.permute.xlu0 %636 }
 0x518   :  { %5830 = vmatprep.subr.msk.bf16.mxu1 %vm640_vm6, %v637_v16  ;;  %v648_v17 = vsel %vm640_vm6, %v637_v16, 0 }
 0x519   :  { %5395 = vmatpush3.bf16.xpose.msra.mxu1 %v648_v17 }
 0x589   :  { %v496_v18 = vpop.xlane.xlu1 %495 }
 0x58a   :  { %v501_v19 = vmul.f32 0.03125, %v496_v18 }
 0x58c   :  { %v506_v20 = vadd.f32 1e-05, %v501_v19 }
 0x58d   :  { %v639_v21 = vpop.permute.xlu1 %638 }
 0x58e   :  { %5966 = vrsqrt.f32 %v506_v20  ;;  %5831 = vmatprep.subr.msk.bf16.mxu1 %vm640_vm6, %v639_v21  ;;  %v651_v22 = vsel %vm640_vm6, %v639_v21, 0 }
 0x58f   :  { %5397 = vmatpush3.bf16.xpose.msra.mxu1 %v651_v22 }
 0x598   :  { %v5967_v23 = vpop.eup %5966 }
 0x599   :  { %v516_v24 = vmul.f32 %v5967_v23, %v476_v12 }
 0x59b   :  { %v528_v26 = vmul.f32 %v6568_v28, %v516_v24 }
 0x59d   :  { %v540_v29 = vadd.f32 %v6573_v34, %v528_v26 }
 0x59f   :  { %v547_v31 = vpack.c.bf16 %v540_v29, %v540_v29 }
 0x5a1   :  { %5391 = vmatmul.mubr.msk.bf16.gmra.mrb[8].mxu1 %vm348_vm3, %v547_v31 }
 0x5a2   :  { %5398 = vmatprep.mubr.msk.bf16.mxu1 %vm640_vm6, %v6595_v3 }
 0x5a9   :  { %5399 = vmatmul.mubr.msk.bf16.vlgmr.msra.gmra.mrb[12].mxu1 %vm640_vm6, %v6601_v15 }
 0x674   :  { %v626_v33 = vpop.f32.mrb[8].mxu1 }
 0x675   :  { %v627_v36 = vadd.f32 %v5060_v59, %v626_v33  ;;  %v5392_v37 = vpop.f32.mrb[9].mxu1 }
 0x676   :  { %v629_v38 = vpop.f32.mrb[10].mxu1 }
 0x677   :  { %v6616_v41 = vpack.c.bf16 %v627_v36, %v627_v36  ;;  %v5393_v28 = vpop.f32.mrb[11].mxu1 }
 0x679   :  { %v1376_v34 = vshll.u32 %v6616_v41, 16 }
 0x67b   :  { %v1378_v45 = vrot.slane %v1376_v34, 1 }
 0x67c   :  { %v5400_v46 = vpop.f32.mrb[12].mxu1 }
 0x67d   :  { %v6619_v47 = vsel %vm1367_vm7, %v1374_v43, %v1378_v45  ;;  %v687_v48 = vpop.f32.mrb[13].mxu1  ;;  %v703_v54 = vmul.f32 0.35355338, %v5400_v46  ;;  %vm3022_vm7 = vcmask 1043456  }
 0x67e   :  { %v701_v49 = vmul.f32 0.35355338, %v687_v48  ;;  %v5401_v50 = vpop.f32.mrb[14].mxu1 }
 0x67f   :  { %v690_v51 = vpop.f32.mrb[15].mxu1  ;;  %v712_v56 = vsel %vm711_vm9, %v703_v54, -inf }
 0x680   :  { %v702_v52 = vmul.f32 0.35355338, %v690_v51  ;;  %v705_v53 = vsel %vm704_vm8, %v701_v49, -inf }
 0x681   :  { %706 = vmax.xlane.f32.xlu1 %v705_v53 }
 0x682   :  { %v708_v55 = vsel %vm704_vm8, %v702_v52, -inf }
 0x683   :  { %709 = vmax.xlane.f32.xlu0 %v708_v55 }
 0x687   :  { %713 = vmax.xlane.f32.xlu0 %v712_v56 }
 0x70e   :  { %v707_v58 = vpop.xlane.xlu1 %706 }
 0x70f   :  { %v715_v61 = vsub.f32 %v701_v49, %v707_v58 }
 0x710   :  { %v710_v59 = vpop.xlane.xlu0 %709 }
 0x711   :  { %v716_v60 = vsub.f32 %v702_v52, %v710_v59  ;;  %v718_v2 = vmul.f32 1.442695, %v715_v61 }
 0x713   :  { %v720_v62 = vmul.f32 1.442695, %v716_v60 }
 0x714   :  { %v714_v63 = vpop.xlane.xlu0 %713 }
 0x715   :  { %5968 = vpow2.f32 %v720_v62  ;;  %v717_v0 = vsub.f32 %v703_v54, %v714_v63 }
 0x717   :  { %v722_v25 = vmul.f32 1.442695, %v717_v0 }
 0x719   :  { %5970 = vpow2.f32 %v722_v25 }
 0x71a   :  { %5972 = vpow2.f32 %v718_v2 }
 0x71f   :  { %v5969_v27 = vpop.eup %5968 }
 0x720   :  { %v727_v4 = vsel %vm704_vm8, %v5969_v27, 0.0 }
 0x721   :  { %728 = vadd.xlane.f32.xlu0 %v727_v4 }
 0x723   :  { %v5971_v6 = vpop.eup %5970 }
 0x724   :  { %v730_v7 = vsel %vm711_vm9, %v5971_v6, 0.0  ;;  %v5973_v8 = vpop.eup %5972 }
 0x725   :  { %731 = vadd.xlane.f32.xlu1 %v730_v7  ;;  %v724_v9 = vsel %vm704_vm8, %v5973_v8, 0.0 }
 0x729   :  { %725 = vadd.xlane.f32.xlu1 %v724_v9 }
 0x737   :  { %741 = vrot.lane.b32.xlu0 %v6595_v3, %s6252_s5 }
 0x73a   :  { %743 = vrot.lane.b32.xlu1 %v6601_v15, %s6252_s5 }
 0x73b   :  { %810 = vrot.lane.b32.xlu0 %v6595_v3, %s6253_s9 }
 0x73e   :  { %814 = vrot.lane.b32.xlu1 %v6595_v3, %s6254_s13 }
 0x742   :  { %816 = vrot.lane.b32.xlu1 %v6601_v15, %s6254_s13 }
 0x746   :  { %812 = vrot.lane.b32.xlu1 %v6601_v15, %s6253_s9 }
 0x7ae   :  { %v729_v10 = vpop.xlane.xlu0 %728 }
 0x7b2   :  { %v732_v11 = vpop.xlane.xlu1 %731  ;;  %v742_v12 = vpop.permute.xlu0 %741 }
 0x7b3   :  { %5402 = vmatprep.subr.bf16.mxu1 %v742_v12  ;;  %5974 = vrcp.f32 %v732_v11 }
 0x7b4   :  { %5403 = vmatpush3.bf16.msra.mxu1 %v742_v12  ;;  %5976 = vrcp.f32 %v729_v10 }
 0x7b6   :  { %v726_v13 = vpop.xlane.xlu1 %725  ;;  %v811_v1 = vpop.permute.xlu0 %810 }
 0x7b7   :  { %5978 = vrcp.f32 %v726_v13 }
 0x7ba   :  { %v744_v16 = vpop.permute.xlu1 %743 }
 0x7bb   :  { %v756_v17 = vand.u32 %v6640_v14, %v744_v16 }
 0x7bd   :  { %5404 = vmatprep.subr.bf16.mxu1 %v756_v17  ;;  %v5975_v18 = vpop.eup %5974 }
 0x7be   :  { %v815_v19 = vpop.permute.xlu1 %814  ;;  %5405 = vmatpush3.bf16.msra.mxu1 %v756_v17  ;;  %v5977_v20 = vpop.eup %5976  ;;  %v738_v22 = vmul.f32 %v5975_v18, %v5971_v6 }
 0x7bf   :  { %5832 = vmatprep.subr.msk.bf16.mxu1 %vm640_vm6, %v815_v19  ;;  %v737_v24 = vmul.f32 %v5977_v20, %v5969_v27  ;;  %v825_v31 = vsel %vm640_vm6, %v815_v19, 0 }
 0x7c0   :  { %v740_v29 = vpack.c.bf16 %v738_v22, %v738_v22 }
 0x7c1   :  { %v5979_v21 = vpop.eup %5978 }
 0x7c2   :  { %v736_v23 = vmul.f32 %v5979_v21, %v5973_v8  ;;  %v817_v32 = vpop.permute.xlu1 %816 }
 0x7c3   :  { %v828_v33 = vsel %vm640_vm6, %v817_v32, 0 }
 0x7c4   :  { %v739_v26 = vpack.c.bf16 %v737_v24, %v736_v23 }
 0x7c6   :  { %5406 = vmatprep.mubr.msk.bf16.mxu1 %vm704_vm8, %v739_v26  ;;  %v813_v36 = vpop.permute.xlu1 %812 }
 0x7c7   :  { %5407 = vmatmul.mubr.msk.bf16.vlgmr.msra.gmra.mrb[16].mxu1 %vm704_vm8, %v740_v29 }
 0x7c8   :  { %5411 = vmatpush3.bf16.xpose.msra.mxu1 %v825_v31  ;;  %5414 = vmatprep.mubr.msk.bf16.mxu1 %vm640_vm6, %v811_v1 }
 0x7c9   :  { %5833 = vmatprep.subr.msk.bf16.mxu1 %vm640_vm6, %v817_v32 }
 0x7d0   :  { %5413 = vmatpush3.bf16.xpose.msra.mxu1 %v828_v33 }
 0x7d7   :  { %5415 = vmatmul.mubr.msk.bf16.vlgmr.msra.gmra.mrb[20].mxu1 %vm640_vm6, %v813_v36 }
 0x89a   :  { %v5408_v37 = vpop.f32.mrb[16].mxu1 }
 0x89b   :  { %809 = vst.msk [vmem:[#allocation3 + $0x10] sm:$0x1] %vm808_vm11, %v5408_v37  ;;  %v792_v38 = vpop.f32.mrb[17].mxu1 }
 0x89c   :  { %806 = vst.msk [vmem:[#allocation3] sm:$0xff] %vm640_vm6, %v792_v38  ;;  %v5409_v39 = vpop.f32.mrb[18].mxu1 }
 0x89d   :  { %v795_v28 = vpop.f32.mrb[19].mxu1 }
 0x89e   :  { %807 = vst.msk [vmem:[#allocation3 + $0x8] sm:$0xff] %vm640_vm6, %v795_v28 }
 0x8aa   :  { %v5416_v42 = vpop.f32.mrb[20].mxu1 }
 0x8ab   :  { %v864_v34 = vpop.f32.mrb[21].mxu1  ;;  %v880_v48 = vmul.f32 0.35355338, %v5416_v42 }
 0x8ac   :  { %v878_v43 = vmul.f32 0.35355338, %v864_v34  ;;  %v5417_v45 = vpop.f32.mrb[22].mxu1 }
 0x8ad   :  { %v867_v46 = vpop.f32.mrb[23].mxu1  ;;  %v887_v52 = vsel %vm711_vm9, %v880_v48, -inf }
 0x8ae   :  { %v879_v49 = vmul.f32 0.35355338, %v867_v46  ;;  %v881_v50 = vsel %vm704_vm8, %v878_v43, -inf }
 0x8af   :  { %882 = vmax.xlane.f32.xlu0 %v881_v50 }
 0x8b0   :  { %v884_v51 = vsel %vm704_vm8, %v879_v49, -inf }
 0x8b1   :  { %885 = vmax.xlane.f32.xlu1 %v884_v51 }
 0x8b3   :  { %888 = vmax.xlane.f32.xlu0 %v887_v52 }
 0x93c   :  { %v883_v53 = vpop.xlane.xlu0 %882 }
 0x93d   :  { %v890_v54 = vsub.f32 %v878_v43, %v883_v53 }
 0x93e   :  { %v886_v55 = vpop.xlane.xlu1 %885 }
 0x93f   :  { %v893_v56 = vmul.f32 1.442695, %v890_v54  ;;  %v891_v58 = vsub.f32 %v879_v49, %v886_v55 }
 0x940   :  { %v889_v59 = vpop.xlane.xlu0 %888 }
 0x941   :  { %5980 = vpow2.f32 %v893_v56  ;;  %v895_v60 = vmul.f32 1.442695, %v891_v58  ;;  %v892_v61 = vsub.f32 %v880_v48, %v889_v59 }
 0x943   :  { %5982 = vpow2.f32 %v895_v60  ;;  %v897_v62 = vmul.f32 1.442695, %v892_v61 }
 0x945   :  { %5984 = vpow2.f32 %v897_v62 }
 0x94b   :  { %v5981_v63 = vpop.eup %5980 }
 0x94c   :  { %v899_v0 = vsel %vm704_vm8, %v5981_v63, 0.0 }
 0x94d   :  { %v5983_v2 = vpop.eup %5982  ;;  %900 = vadd.xlane.f32.xlu0 %v899_v0 }
 0x94e   :  { %v902_v4 = vsel %vm704_vm8, %v5983_v2, 0.0 }
 0x94f   :  { %v5985_v25 = vpop.eup %5984 }
 0x950   :  { %v905_v27 = vsel %vm711_vm9, %v5985_v25, 0.0 }
 0x951   :  { %906 = vadd.xlane.f32.xlu1 %v905_v27  ;;  %903 = vadd.xlane.f32.xlu0 %v902_v4 }
 0x962   :  { %918 = vrot.lane.b32.xlu1 %v6601_v15, %s6255_s17 }
 0x966   :  { %999 = vrot.lane.b32.xlu1 %v6595_v3, %s6256_s21 }
 0x967   :  { %916 = vrot.lane.b32.xlu0 %v6595_v3, %s6255_s17 }
 0x96a   :  { %1001 = vrot.lane.b32.xlu1 %v6601_v15, %s6256_s21 }
 0x96b   :  { %995 = vrot.lane.b32.xlu0 %v6595_v3, %s6257_s25 }
 0x96e   :  { %997 = vrot.lane.b32.xlu1 %v6601_v15, %s6257_s25 }
 0x9da   :  { %v901_v6 = vpop.xlane.xlu0 %900 }
 0x9db   :  { %5986 = vrcp.f32 %v901_v6 }
 0x9de   :  { %v904_v7 = vpop.xlane.xlu0 %903  ;;  %v907_v8 = vpop.xlane.xlu1 %906 }
 0x9df   :  { %5988 = vrcp.f32 %v904_v7 }
 0x9e0   :  { %5990 = vrcp.f32 %v907_v8 }
 0x9e2   :  { %v917_v9 = vpop.permute.xlu0 %916  ;;  %v919_v10 = vpop.permute.xlu1 %918 }
 0x9e3   :  { %v928_v11 = vand.u32 %v919_v10, %v6640_v14  ;;  %5418 = vmatprep.subr.bf16.mxu1 %v917_v9 }
 0x9e4   :  { %5419 = vmatpush3.bf16.msra.mxu1 %v917_v9 }
 0x9e5   :  { %5420 = vmatprep.subr.bf16.mxu1 %v928_v11  ;;  %v5987_v12 = vpop.eup %5986 }
 0x9e6   :  { %v1000_v13 = vpop.permute.xlu1 %999  ;;  %v911_v18 = vmul.f32 %v5987_v12, %v5981_v63  ;;  %v996_v23 = vpop.permute.xlu0 %995 }
 0x9e7   :  { %v1010_v24 = vsel %vm640_vm6, %v1000_v13, 0 }
 0x9e8   :  { %5421 = vmatpush3.bf16.msra.mxu1 %v928_v11 }
 0x9e9   :  { %v5989_v16 = vpop.eup %5988  ;;  %5834 = vmatprep.subr.msk.bf16.mxu1 %vm640_vm6, %v1000_v13 }
 0x9ea   :  { %v5991_v17 = vpop.eup %5990  ;;  %v912_v19 = vmul.f32 %v5989_v16, %v5983_v2  ;;  %v1002_v26 = vpop.permute.xlu1 %1001 }
 0x9eb   :  { %v913_v20 = vmul.f32 %v5991_v17, %v5985_v25  ;;  %v1013_v29 = vsel %vm640_vm6, %v1002_v26, 0 }
 0x9ec   :  { %v914_v21 = vpack.c.bf16 %v912_v19, %v911_v18 }
 0x9ed   :  { %v915_v22 = vpack.c.bf16 %v913_v20, %v913_v20 }
 0x9ee   :  { %5422 = vmatprep.mubr.msk.bf16.mxu1 %vm704_vm8, %v914_v21  ;;  %v998_v1 = vpop.permute.xlu1 %997 }
 0x9ef   :  { %5423 = vmatmul.mubr.msk.bf16.vlgmr.msra.gmra.mrb[24].mxu1 %vm704_vm8, %v915_v22 }
 0x9f0   :  { %5430 = vmatprep.mubr.msk.bf16.mxu1 %vm640_vm6, %v996_v23 }
 0x9f1   :  { %5427 = vmatpush3.bf16.xpose.msra.mxu1 %v1010_v24 }
 0x9f2   :  { %5835 = vmatprep.subr.msk.bf16.mxu1 %vm640_vm6, %v1002_v26 }
 0x9f9   :  { %5429 = vmatpush3.bf16.xpose.msra.mxu1 %v1013_v29 }
 0xa00   :  { %5431 = vmatmul.mubr.msk.bf16.vlgmr.msra.gmra.mrb[28].mxu1 %vm640_vm6, %v998_v1 }
 0xac2   :  { %v6681_v31 = vpop.f32.mrb[24].mxu1 }
 0xac3   :  { %v6683_v32 = vpop.f32.mrb[25].mxu1 }
 0xac4   :  { %v5425_v33 = vpop.f32.mrb[26].mxu1 }
 0xac5   :  { %v6685_v36 = vpop.f32.mrb[27].mxu1 }
 0xad3   :  { %v5432_v37 = vpop.f32.mrb[28].mxu1 }
 0xad4   :  { %v1049_v38 = vpop.f32.mrb[29].mxu1  ;;  %v1065_v34 = vmul.f32 0.35355338, %v5432_v37 }
 0xad5   :  { %v1063_v39 = vmul.f32 0.35355338, %v1049_v38  ;;  %v5433_v28 = vpop.f32.mrb[30].mxu1 }
 0xad6   :  { %v1052_v42 = vpop.f32.mrb[31].mxu1  ;;  %v1072_v48 = vsel %vm711_vm9, %v1065_v34, -inf }
 0xad7   :  { %v1064_v43 = vmul.f32 0.35355338, %v1052_v42  ;;  %v1066_v45 = vsel %vm704_vm8, %v1063_v39, -inf }
 0xad8   :  { %1067 = vmax.xlane.f32.xlu0 %v1066_v45 }
 0xad9   :  { %v1069_v46 = vsel %vm704_vm8, %v1064_v43, -inf }
 0xada   :  { %1070 = vmax.xlane.f32.xlu1 %v1069_v46 }
 0xadc   :  { %1073 = vmax.xlane.f32.xlu0 %v1072_v48 }
 0xb65   :  { %v1068_v49 = vpop.xlane.xlu0 %1067 }
 0xb66   :  { %v1075_v50 = vsub.f32 %v1063_v39, %v1068_v49 }
 0xb67   :  { %v1071_v51 = vpop.xlane.xlu1 %1070 }
 0xb68   :  { %v1078_v52 = vmul.f32 1.442695, %v1075_v50  ;;  %v1076_v53 = vsub.f32 %v1064_v43, %v1071_v51 }
 0xb69   :  { %v1074_v54 = vpop.xlane.xlu0 %1073 }
 0xb6a   :  { %5992 = vpow2.f32 %v1078_v52  ;;  %v1080_v55 = vmul.f32 1.442695, %v1076_v53  ;;  %v1077_v56 = vsub.f32 %v1065_v34, %v1074_v54 }
 0xb6c   :  { %5994 = vpow2.f32 %v1080_v55  ;;  %v1082_v58 = vmul.f32 1.442695, %v1077_v56 }
 0xb6e   :  { %5996 = vpow2.f32 %v1082_v58 }
 0xb74   :  { %v5993_v59 = vpop.eup %5992 }
 0xb75   :  { %v1084_v60 = vsel %vm704_vm8, %v5993_v59, 0.0 }
 0xb76   :  { %v5995_v61 = vpop.eup %5994  ;;  %1085 = vadd.xlane.f32.xlu0 %v1084_v60 }
 0xb77   :  { %v1087_v0 = vsel %vm704_vm8, %v5995_v61, 0.0 }
 0xb78   :  { %v5997_v62 = vpop.eup %5996 }
 0xb79   :  { %v1090_v63 = vsel %vm711_vm9, %v5997_v62, 0.0 }
 0xb7a   :  { %1091 = vadd.xlane.f32.xlu1 %v1090_v63  ;;  %1088 = vadd.xlane.f32.xlu0 %v1087_v0  ;;  %v6733_v0 = vshrl.u32 %v6616_v41, 16 }
 0xb8b   :  { %1103 = vrot.lane.b32.xlu1 %v6601_v15, %s6258_s29 }
 0xb8f   :  { %1184 = vrot.lane.b32.xlu1 %v6595_v3, %s6259_s3 }
 0xb90   :  { %1101 = vrot.lane.b32.xlu0 %v6595_v3, %s6258_s29 }
 0xb93   :  { %1186 = vrot.lane.b32.xlu1 %v6601_v15, %s6259_s3 }
 0xb94   :  { %1180 = vrot.lane.b32.xlu0 %v6595_v3, %s6260_s8 }
 0xb97   :  { %1182 = vrot.lane.b32.xlu1 %v6601_v15, %s6260_s8 }
 0xc03   :  { %v1086_v2 = vpop.xlane.xlu0 %1085 }
 0xc04   :  { %5998 = vrcp.f32 %v1086_v2 }
 0xc07   :  { %v1089_v25 = vpop.xlane.xlu0 %1088  ;;  %v1092_v27 = vpop.xlane.xlu1 %1091 }
 0xc08   :  { %6000 = vrcp.f32 %v1089_v25 }
 0xc09   :  { %6002 = vrcp.f32 %v1092_v27 }
 0xc0b   :  { %v1102_v4 = vpop.permute.xlu0 %1101  ;;  %v1104_v6 = vpop.permute.xlu1 %1103 }
 0xc0c   :  { %v1113_v7 = vand.u32 %v1104_v6, %v6640_v14  ;;  %5434 = vmatprep.subr.bf16.mxu0 %v1102_v4 }
 0xc0d   :  { %5435 = vmatpush3.bf16.msra.mxu0 %v1102_v4 }
 0xc0e   :  { %5436 = vmatprep.subr.bf16.mxu0 %v1113_v7  ;;  %v5999_v8 = vpop.eup %5998 }
 0xc0f   :  { %v1185_v9 = vpop.permute.xlu1 %1184  ;;  %v1096_v12 = vmul.f32 %v5999_v8, %v5993_v59  ;;  %v1181_v19 = vpop.permute.xlu0 %1180 }
 0xc10   :  { %v1195_v20 = vsel %vm640_vm6, %v1185_v9, 0 }
 0xc11   :  { %5437 = vmatpush3.bf16.msra.mxu0 %v1113_v7 }
 0xc12   :  { %v6001_v10 = vpop.eup %6000  ;;  %5836 = vmatprep.subr.msk.bf16.mxu0 %vm640_vm6, %v1185_v9 }
 0xc13   :  { %v6003_v11 = vpop.eup %6002  ;;  %v1097_v13 = vmul.f32 %v6001_v10, %v5995_v61  ;;  %v1187_v21 = vpop.permute.xlu1 %1186 }
 0xc14   :  { %v1098_v16 = vmul.f32 %v6003_v11, %v5997_v62  ;;  %v1198_v22 = vsel %vm640_vm6, %v1187_v21, 0 }
 0xc15   :  { %v1099_v17 = vpack.c.bf16 %v1097_v13, %v1096_v12 }
 0xc16   :  { %v1100_v18 = vpack.c.bf16 %v1098_v16, %v1098_v16 }
 0xc17   :  { %5438 = vmatprep.mubr.msk.bf16.mxu0 %vm704_vm8, %v1099_v17  ;;  %v1183_v23 = vpop.permute.xlu1 %1182 }
 0xc18   :  { %5439 = vmatmul.mubr.msk.bf16.vlgmr.msra.gmra.mrb[8].mxu0 %vm704_vm8, %v1100_v18 }
 0xc19   :  { %5446 = vmatprep.mubr.msk.bf16.mxu0 %vm640_vm6, %v1181_v19 }
 0xc1a   :  { %5443 = vmatpush3.bf16.xpose.msra.mxu0 %v1195_v20 }
 0xc1b   :  { %5837 = vmatprep.subr.msk.bf16.mxu0 %vm640_vm6, %v1187_v21 }
 0xc22   :  { %5445 = vmatpush3.bf16.xpose.msra.mxu0 %v1198_v22 }
 0xc29   :  { %5447 = vmatmul.mubr.msk.bf16.vlgmr.msra.gmra.mrb[12].mxu0 %vm640_vm6, %v1183_v23 }
 0xceb   :  { %v6714_v24 = vpop.f32.mrb[8].mxu0 }
 0xcec   :  { %v6716_v26 = vpop.f32.mrb[9].mxu0 }
 0xced   :  { %v5441_v29 = vpop.f32.mrb[10].mxu0 }
 0xcee   :  { %v6718_v1 = vpop.f32.mrb[11].mxu0 }
 0xcfc   :  { %v5448_v33 = vpop.f32.mrb[12].mxu0 }
 0xcfd   :  { %v1234_v37 = vpop.f32.mrb[13].mxu0  ;;  %v1250_v42 = vmul.f32 0.35355338, %v5448_v33 }
 0xcfe   :  { %v1248_v38 = vmul.f32 0.35355338, %v1234_v37  ;;  %v5449_v39 = vpop.f32.mrb[14].mxu0 }
 0xcff   :  { %v1237_v28 = vpop.f32.mrb[15].mxu0  ;;  %v1257_v46 = vsel %vm711_vm9, %v1250_v42, -inf }
 0xd00   :  { %v1249_v34 = vmul.f32 0.35355338, %v1237_v28  ;;  %v1251_v43 = vsel %vm704_vm8, %v1248_v38, -inf }
 0xd01   :  { %1252 = vmax.xlane.f32.xlu0 %v1251_v43 }
 0xd02   :  { %v1254_v45 = vsel %vm704_vm8, %v1249_v34, -inf }
 0xd03   :  { %1255 = vmax.xlane.f32.xlu1 %v1254_v45 }
 0xd05   :  { %1258 = vmax.xlane.f32.xlu0 %v1257_v46 }
 0xd8e   :  { %v1253_v48 = vpop.xlane.xlu0 %1252 }
 0xd8f   :  { %v1260_v49 = vsub.f32 %v1248_v38, %v1253_v48 }
 0xd90   :  { %v1256_v50 = vpop.xlane.xlu1 %1255 }
 0xd91   :  { %v1263_v51 = vmul.f32 1.442695, %v1260_v49  ;;  %v1261_v52 = vsub.f32 %v1249_v34, %v1256_v50 }
 0xd92   :  { %v1259_v53 = vpop.xlane.xlu0 %1258 }
 0xd93   :  { %6004 = vpow2.f32 %v1263_v51  ;;  %v1265_v54 = vmul.f32 1.442695, %v1261_v52  ;;  %v1262_v55 = vsub.f32 %v1250_v42, %v1259_v53 }
 0xd95   :  { %6006 = vpow2.f32 %v1265_v54  ;;  %v1267_v56 = vmul.f32 1.442695, %v1262_v55 }
 0xd97   :  { %6008 = vpow2.f32 %v1267_v56 }
 0xd9d   :  { %v6005_v58 = vpop.eup %6004 }
 0xd9e   :  { %v1269_v59 = vsel %vm704_vm8, %v6005_v58, 0.0 }
 0xd9f   :  { %v6007_v60 = vpop.eup %6006  ;;  %1270 = vadd.xlane.f32.xlu0 %v1269_v59 }
 0xda0   :  { %v1272_v63 = vsel %vm704_vm8, %v6007_v60, 0.0 }
 0xda1   :  { %v6009_v61 = vpop.eup %6008 }
 0xda2   :  { %v1275_v62 = vsel %vm711_vm9, %v6009_v61, 0.0 }
 0xda3   :  { %1276 = vadd.xlane.f32.xlu1 %v1275_v62  ;;  %1273 = vadd.xlane.f32.xlu0 %v1272_v63 }
 0xdb4   :  { %1288 = vrot.lane.b32.xlu1 %v6601_v15, %s6261_s14 }
 0xdb8   :  { %1382 = vrot.lane.b32.xlu1 %v6619_v47, %s6251_s0 }
 0xdb9   :  { %1286 = vrot.lane.b32.xlu0 %v6595_v3, %s6261_s14 }
 0xdbc   :  { %1384 = vrot.lane.b32.xlu1 %v6733_v0, %s6251_s0 }
 0xe2c   :  { %v1271_v2 = vpop.xlane.xlu0 %1270 }
 0xe2d   :  { %6010 = vrcp.f32 %v1271_v2 }
 0xe30   :  { %v1274_v25 = vpop.xlane.xlu0 %1273  ;;  %v1277_v27 = vpop.xlane.xlu1 %1276 }
 0xe31   :  { %6012 = vrcp.f32 %v1274_v25 }
 0xe32   :  { %6014 = vrcp.f32 %v1277_v27 }
 0xe34   :  { %v1287_v4 = vpop.permute.xlu0 %1286  ;;  %v1289_v15 = vpop.permute.xlu1 %1288 }
 0xe35   :  { %v1298_v6 = vand.u32 %v1289_v15, %v6640_v14  ;;  %5450 = vmatprep.subr.bf16.mxu1 %v1287_v4 }
 0xe36   :  { %5451 = vmatpush3.bf16.msra.mxu1 %v1287_v4 }
 0xe37   :  { %5452 = vmatprep.subr.bf16.mxu1 %v1298_v6  ;;  %v6011_v3 = vpop.eup %6010 }
 0xe38   :  { %v1383_v7 = vpop.permute.xlu1 %1382  ;;  %v1281_v9 = vmul.f32 %v6011_v3, %v6005_v58 }
 0xe39   :  { %v1393_v16 = vsel %vm640_vm6, %v1383_v7, 0 }
 0xe3a   :  { %5453 = vmatpush3.bf16.msra.mxu1 %v1298_v6 }
 0xe3b   :  { %v6013_v41 = vpop.eup %6012  ;;  %5838 = vmatprep.subr.msk.bf16.mxu1 %vm640_vm6, %v1383_v7 }
 0xe3c   :  { %v6015_v8 = vpop.eup %6014  ;;  %v1282_v10 = vmul.f32 %v6013_v41, %v6007_v60  ;;  %v1385_v17 = vpop.permute.xlu1 %1384 }
 0xe3d   :  { %v1283_v11 = vmul.f32 %v6015_v8, %v6009_v61  ;;  %v1396_v18 = vsel %vm640_vm6, %v1385_v17, 0 }
 0xe3e   :  { %v1284_v12 = vpack.c.bf16 %v1282_v10, %v1281_v9 }
 0xe3f   :  { %v1285_v13 = vpack.c.bf16 %v1283_v11, %v1283_v11 }
 0xe40   :  { %5454 = vmatprep.mubr.msk.bf16.mxu1 %vm704_vm8, %v1284_v12 }
 0xe41   :  { %5455 = vmatmul.mubr.msk.bf16.vlgmr.msra.gmra.mrb[32].mxu1 %vm704_vm8, %v1285_v13 }
 0xe42   :  { %5462 = vmatprep.mubr.msk.bf16.mxu1 %vm640_vm6, %v6619_v47 }
 0xe43   :  { %5459 = vmatpush3.bf16.xpose.msra.mxu1 %v1393_v16 }
 0xe44   :  { %5839 = vmatprep.subr.msk.bf16.mxu1 %vm640_vm6, %v1385_v17 }
 0xe4b   :  { %5461 = vmatpush3.bf16.xpose.msra.mxu1 %v1396_v18 }
 0xe52   :  { %5463 = vmatmul.mubr.msk.bf16.vlgmr.msra.gmra.mrb[36].mxu1 %vm640_vm6, %v6733_v0 }
 0xf14   :  { %v6748_v19 = vpop.f32.mrb[32].mxu1 }
 0xf15   :  { %v6750_v20 = vpop.f32.mrb[33].mxu1 }
 0xf16   :  { %v5457_v21 = vpop.f32.mrb[34].mxu1 }
 0xf17   :  { %v6752_v22 = vpop.f32.mrb[35].mxu1 }
 0xf25   :  { %v5464_v23 = vpop.f32.mrb[36].mxu1 }
 0xf26   :  { %v1432_v29 = vpop.f32.mrb[37].mxu1  ;;  %v1448_v39 = vmul.f32 0.35355338, %v5464_v23 }
 0xf27   :  { %v1446_v33 = vmul.f32 0.35355338, %v1432_v29  ;;  %v5465_v37 = vpop.f32.mrb[38].mxu1 }
 0xf28   :  { %v1435_v38 = vpop.f32.mrb[39].mxu1  ;;  %v1455_v43 = vsel %vm711_vm9, %v1448_v39, -inf }
 0xf29   :  { %v1447_v28 = vmul.f32 0.35355338, %v1435_v38  ;;  %v1449_v42 = vsel %vm704_vm8, %v1446_v33, -inf }
 0xf2a   :  { %1450 = vmax.xlane.f32.xlu0 %v1449_v42 }
 0xf2b   :  { %v1452_v34 = vsel %vm704_vm8, %v1447_v28, -inf }
 0xf2c   :  { %1453 = vmax.xlane.f32.xlu1 %v1452_v34 }
 0xf2e   :  { %1456 = vmax.xlane.f32.xlu0 %v1455_v43 }
 0xfb7   :  { %v1451_v45 = vpop.xlane.xlu0 %1450 }
 0xfb8   :  { %v1458_v46 = vsub.f32 %v1446_v33, %v1451_v45 }
 0xfb9   :  { %v1454_v48 = vpop.xlane.xlu1 %1453 }
 0xfba   :  { %v1461_v49 = vmul.f32 1.442695, %v1458_v46  ;;  %v1459_v50 = vsub.f32 %v1447_v28, %v1454_v48 }
 0xfbb   :  { %v1457_v51 = vpop.xlane.xlu0 %1456 }
 0xfbc   :  { %6016 = vpow2.f32 %v1461_v49  ;;  %v1463_v52 = vmul.f32 1.442695, %v1459_v50  ;;  %v1460_v53 = vsub.f32 %v1448_v39, %v1457_v51 }
 0xfbe   :  { %6018 = vpow2.f32 %v1463_v52  ;;  %v1465_v54 = vmul.f32 1.442695, %v1460_v53 }
 0xfc0   :  { %6020 = vpow2.f32 %v1465_v54 }
 0xfc6   :  { %v6017_v55 = vpop.eup %6016 }
 0xfc7   :  { %v1467_v56 = vsel %vm704_vm8, %v6017_v55, 0.0 }
 0xfc8   :  { %v6019_v58 = vpop.eup %6018  ;;  %1468 = vadd.xlane.f32.xlu0 %v1467_v56 }
 0xfc9   :  { %v1470_v61 = vsel %vm704_vm8, %v6019_v58, 0.0 }
 0xfca   :  { %v6021_v59 = vpop.eup %6020 }
 0xfcb   :  { %v1473_v60 = vsel %vm711_vm9, %v6021_v59, 0.0 }
 0xfcc   :  { %1474 = vadd.xlane.f32.xlu1 %v1473_v60  ;;  %1471 = vadd.xlane.f32.xlu0 %v1470_v61 }
 0xfdd   :  { %1486 = vrot.lane.b32.xlu1 %v6733_v0, %s6252_s5 }
 0xfe1   :  { %1553 = vrot.lane.b32.xlu1 %v6619_v47, %s6254_s13 }
 0xfe2   :  { %1484 = vrot.lane.b32.xlu0 %v6619_v47, %s6252_s5 }
 0xfe5   :  { %1555 = vrot.lane.b32.xlu1 %v6733_v0, %s6254_s13 }
 0xfe6   :  { %1549 = vrot.lane.b32.xlu0 %v6619_v47, %s6253_s9 }
 0xfe9   :  { %1551 = vrot.lane.b32.xlu1 %v6733_v0, %s6253_s9 }
0x1055   :  { %v1469_v62 = vpop.xlane.xlu0 %1468 }
0x1056   :  { %6022 = vrcp.f32 %v1469_v62 }
0x1059   :  { %v1472_v63 = vpop.xlane.xlu0 %1471  ;;  %v1475_v2 = vpop.xlane.xlu1 %1474 }
0x105a   :  { %6024 = vrcp.f32 %v1472_v63 }
0x105b   :  { %6026 = vrcp.f32 %v1475_v2 }
0x105d   :  { %v1485_v25 = vpop.permute.xlu0 %1484  ;;  %v1487_v27 = vpop.permute.xlu1 %1486 }
0x105e   :  { %v1496_v4 = vand.u32 %v1487_v27, %v6640_v14  ;;  %5466 = vmatprep.subr.bf16.mxu0 %v1485_v25 }
0x105f   :  { %5467 = vmatpush3.bf16.msra.mxu0 %v1485_v25 }
0x1060   :  { %5468 = vmatprep.subr.bf16.mxu0 %v1496_v4  ;;  %v6023_v15 = vpop.eup %6022 }
0x1061   :  { %v1554_v6 = vpop.permute.xlu1 %1553  ;;  %v1479_v41 = vmul.f32 %v6023_v15, %v6017_v55  ;;  %v1550_v12 = vpop.permute.xlu0 %1549 }
0x1062   :  { %v1564_v13 = vsel %vm640_vm6, %v1554_v6, 0 }
0x1063   :  { %5469 = vmatpush3.bf16.msra.mxu0 %v1496_v4 }
0x1064   :  { %v6025_v3 = vpop.eup %6024  ;;  %5840 = vmatprep.subr.msk.bf16.mxu0 %vm640_vm6, %v1554_v6 }
0x1065   :  { %v6027_v7 = vpop.eup %6026  ;;  %v1480_v8 = vmul.f32 %v6025_v3, %v6019_v58  ;;  %v1556_v16 = vpop.permute.xlu1 %1555 }
0x1066   :  { %v1481_v9 = vmul.f32 %v6027_v7, %v6021_v59  ;;  %v1567_v17 = vsel %vm640_vm6, %v1556_v16, 0 }
0x1067   :  { %v1482_v10 = vpack.c.bf16 %v1480_v8, %v1479_v41 }
0x1068   :  { %v1483_v11 = vpack.c.bf16 %v1481_v9, %v1481_v9 }
0x1069   :  { %5470 = vmatprep.mubr.msk.bf16.mxu0 %vm704_vm8, %v1482_v10  ;;  %v1552_v18 = vpop.permute.xlu1 %1551 }
0x106a   :  { %5471 = vmatmul.mubr.msk.bf16.vlgmr.msra.gmra.mrb[16].mxu0 %vm704_vm8, %v1483_v11 }
0x106b   :  { %5478 = vmatprep.mubr.msk.bf16.mxu0 %vm640_vm6, %v1550_v12 }
0x106c   :  { %5475 = vmatpush3.bf16.xpose.msra.mxu0 %v1564_v13 }
0x106d   :  { %5841 = vmatprep.subr.msk.bf16.mxu0 %vm640_vm6, %v1556_v16 }
0x1074   :  { %5477 = vmatpush3.bf16.xpose.msra.mxu0 %v1567_v17 }
0x107b   :  { %5479 = vmatmul.mubr.msk.bf16.vlgmr.msra.gmra.mrb[20].mxu0 %vm640_vm6, %v1552_v18 }
0x113d   :  { %v5472_v21 = vpop.f32.mrb[16].mxu0 }
0x113e   :  { %1548 = vst.msk [vmem:[#allocation3 + $0x21] sm:$0x1] %vm808_vm11, %v5472_v21  ;;  %v1532_v23 = vpop.f32.mrb[17].mxu0 }
0x113f   :  { %1546 = vst.msk [vmem:[#allocation3 + $0x11] sm:$0xff] %vm640_vm6, %v1532_v23  ;;  %v5473_v29 = vpop.f32.mrb[18].mxu0 }
0x1140   :  { %v1535_v33 = vpop.f32.mrb[19].mxu0 }
0x1141   :  { %1547 = vst.msk [vmem:[#allocation3 + $0x19] sm:$0xff] %vm640_vm6, %v1535_v33 }
0x114e   :  { %v5480_v37 = vpop.f32.mrb[20].mxu0 }
0x114f   :  { %v1603_v38 = vpop.f32.mrb[21].mxu0  ;;  %v1619_v34 = vmul.f32 0.35355338, %v5480_v37 }
0x1150   :  { %v1617_v39 = vmul.f32 0.35355338, %v1603_v38  ;;  %v5481_v28 = vpop.f32.mrb[22].mxu0 }
0x1151   :  { %v1606_v42 = vpop.f32.mrb[23].mxu0  ;;  %v1626_v48 = vsel %vm711_vm9, %v1619_v34, -inf }
0x1152   :  { %v1618_v43 = vmul.f32 0.35355338, %v1606_v42  ;;  %v1620_v45 = vsel %vm704_vm8, %v1617_v39, -inf }
0x1153   :  { %1621 = vmax.xlane.f32.xlu0 %v1620_v45 }
0x1154   :  { %v1623_v46 = vsel %vm704_vm8, %v1618_v43, -inf }
0x1155   :  { %1624 = vmax.xlane.f32.xlu1 %v1623_v46 }
0x1157   :  { %1627 = vmax.xlane.f32.xlu0 %v1626_v48 }
0x11e0   :  { %v1622_v49 = vpop.xlane.xlu0 %1621 }
0x11e1   :  { %v1629_v50 = vsub.f32 %v1617_v39, %v1622_v49 }
0x11e2   :  { %v1625_v51 = vpop.xlane.xlu1 %1624 }
0x11e3   :  { %v1632_v52 = vmul.f32 1.442695, %v1629_v50  ;;  %v1630_v53 = vsub.f32 %v1618_v43, %v1625_v51 }
0x11e4   :  { %v1628_v54 = vpop.xlane.xlu0 %1627 }
0x11e5   :  { %6028 = vpow2.f32 %v1632_v52  ;;  %v1634_v55 = vmul.f32 1.442695, %v1630_v53  ;;  %v1631_v56 = vsub.f32 %v1619_v34, %v1628_v54 }
0x11e7   :  { %6030 = vpow2.f32 %v1634_v55  ;;  %v1636_v58 = vmul.f32 1.442695, %v1631_v56 }
0x11e9   :  { %6032 = vpow2.f32 %v1636_v58 }
0x11ef   :  { %v6029_v59 = vpop.eup %6028 }
0x11f0   :  { %v1638_v60 = vsel %vm704_vm8, %v6029_v59, 0.0 }
0x11f1   :  { %v6031_v61 = vpop.eup %6030  ;;  %1639 = vadd.xlane.f32.xlu0 %v1638_v60 }
0x11f2   :  { %v1641_v2 = vsel %vm704_vm8, %v6031_v61, 0.0 }
0x11f3   :  { %v6033_v62 = vpop.eup %6032 }
0x11f4   :  { %v1644_v63 = vsel %vm711_vm9, %v6033_v62, 0.0 }
0x11f5   :  { %1645 = vadd.xlane.f32.xlu1 %v1644_v63  ;;  %1642 = vadd.xlane.f32.xlu0 %v1641_v2 }
0x1206   :  { %1657 = vrot.lane.b32.xlu1 %v6733_v0, %s6255_s17 }
0x120a   :  { %1736 = vrot.lane.b32.xlu1 %v6619_v47, %s6256_s21 }
0x120b   :  { %1655 = vrot.lane.b32.xlu0 %v6619_v47, %s6255_s17 }
0x120e   :  { %1738 = vrot.lane.b32.xlu1 %v6733_v0, %s6256_s21 }
0x120f   :  { %1732 = vrot.lane.b32.xlu0 %v6619_v47, %s6257_s25 }
0x1212   :  { %1734 = vrot.lane.b32.xlu1 %v6733_v0, %s6257_s25 }
0x127e   :  { %v1640_v25 = vpop.xlane.xlu0 %1639 }
0x127f   :  { %6034 = vrcp.f32 %v1640_v25 }
0x1282   :  { %v1643_v27 = vpop.xlane.xlu0 %1642  ;;  %v1646_v4 = vpop.xlane.xlu1 %1645 }
0x1283   :  { %6036 = vrcp.f32 %v1643_v27 }
0x1284   :  { %6038 = vrcp.f32 %v1646_v4 }
0x1286   :  { %v1656_v15 = vpop.permute.xlu0 %1655  ;;  %v1658_v6 = vpop.permute.xlu1 %1657 }
0x1287   :  { %v1667_v3 = vand.u32 %v1658_v6, %v6640_v14  ;;  %5482 = vmatprep.subr.bf16.mxu1 %v1656_v15 }
0x1288   :  { %5483 = vmatpush3.bf16.msra.mxu1 %v1656_v15 }
0x1289   :  { %5484 = vmatprep.subr.bf16.mxu1 %v1667_v3  ;;  %v6035_v7 = vpop.eup %6034 }
0x128a   :  { %v1737_v41 = vpop.permute.xlu1 %1736  ;;  %v1650_v10 = vmul.f32 %v6035_v7, %v6029_v59  ;;  %v1733_v17 = vpop.permute.xlu0 %1732 }
0x128b   :  { %v1747_v18 = vsel %vm640_vm6, %v1737_v41, 0 }
0x128c   :  { %5485 = vmatpush3.bf16.msra.mxu1 %v1667_v3 }
0x128d   :  { %v6037_v8 = vpop.eup %6036  ;;  %5842 = vmatprep.subr.msk.bf16.mxu1 %vm640_vm6, %v1737_v41 }
0x128e   :  { %v6039_v9 = vpop.eup %6038  ;;  %v1651_v11 = vmul.f32 %v6037_v8, %v6031_v61  ;;  %v1739_v21 = vpop.permute.xlu1 %1738 }
0x128f   :  { %v1652_v12 = vmul.f32 %v6039_v9, %v6033_v62  ;;  %v1750_v23 = vsel %vm640_vm6, %v1739_v21, 0 }
0x1290   :  { %v1653_v13 = vpack.c.bf16 %v1651_v11, %v1650_v10 }
0x1291   :  { %v1654_v16 = vpack.c.bf16 %v1652_v12, %v1652_v12 }
0x1292   :  { %5486 = vmatprep.mubr.msk.bf16.mxu1 %vm704_vm8, %v1653_v13  ;;  %v1735_v29 = vpop.permute.xlu1 %1734 }
0x1293   :  { %5487 = vmatmul.mubr.msk.bf16.vlgmr.msra.gmra.mrb[40].mxu1 %vm704_vm8, %v1654_v16 }
0x1294   :  { %5494 = vmatprep.mubr.msk.bf16.mxu1 %vm640_vm6, %v1733_v17 }
0x1295   :  { %5491 = vmatpush3.bf16.xpose.msra.mxu1 %v1747_v18 }
0x1296   :  { %5843 = vmatprep.subr.msk.bf16.mxu1 %vm640_vm6, %v1739_v21 }
0x129d   :  { %5493 = vmatpush3.bf16.xpose.msra.mxu1 %v1750_v23 }
0x12a4   :  { %5495 = vmatmul.mubr.msk.bf16.vlgmr.msra.gmra.mrb[44].mxu1 %vm640_vm6, %v1735_v29 }
0x1366   :  { %v6811_v33 = vpop.f32.mrb[40].mxu1 }
0x1367   :  { %v6813_v37 = vpop.f32.mrb[41].mxu1 }
0x1368   :  { %v5489_v38 = vpop.f32.mrb[42].mxu1 }
0x1369   :  { %v6815_v39 = vpop.f32.mrb[43].mxu1 }
0x1377   :  { %v5496_v28 = vpop.f32.mrb[44].mxu1 }
0x1378   :  { %v1786_v42 = vpop.f32.mrb[45].mxu1  ;;  %v1802_v46 = vmul.f32 0.35355338, %v5496_v28 }
0x1379   :  { %v1800_v34 = vmul.f32 0.35355338, %v1786_v42  ;;  %v5497_v43 = vpop.f32.mrb[46].mxu1 }
0x137a   :  { %v1789_v45 = vpop.f32.mrb[47].mxu1  ;;  %v1809_v51 = vsel %vm711_vm9, %v1802_v46, -inf }
0x137b   :  { %v1801_v48 = vmul.f32 0.35355338, %v1789_v45  ;;  %v1803_v49 = vsel %vm704_vm8, %v1800_v34, -inf }
0x137c   :  { %1804 = vmax.xlane.f32.xlu0 %v1803_v49 }
0x137d   :  { %v1806_v50 = vsel %vm704_vm8, %v1801_v48, -inf }
0x137e   :  { %1807 = vmax.xlane.f32.xlu1 %v1806_v50 }
0x1380   :  { %1810 = vmax.xlane.f32.xlu0 %v1809_v51 }
0x1409   :  { %v1805_v52 = vpop.xlane.xlu0 %1804 }
0x140a   :  { %v1812_v53 = vsub.f32 %v1800_v34, %v1805_v52 }
0x140b   :  { %v1808_v54 = vpop.xlane.xlu1 %1807 }
0x140c   :  { %v1815_v55 = vmul.f32 1.442695, %v1812_v53  ;;  %v1813_v56 = vsub.f32 %v1801_v48, %v1808_v54 }
0x140d   :  { %v1811_v58 = vpop.xlane.xlu0 %1810 }
0x140e   :  { %6040 = vpow2.f32 %v1815_v55  ;;  %v1817_v59 = vmul.f32 1.442695, %v1813_v56  ;;  %v1814_v60 = vsub.f32 %v1802_v46, %v1811_v58 }
0x1410   :  { %6042 = vpow2.f32 %v1817_v59  ;;  %v1819_v61 = vmul.f32 1.442695, %v1814_v60 }
0x1412   :  { %6044 = vpow2.f32 %v1819_v61 }
0x1418   :  { %v6041_v62 = vpop.eup %6040 }
0x1419   :  { %v1821_v63 = vsel %vm704_vm8, %v6041_v62, 0.0 }
0x141a   :  { %v6043_v2 = vpop.eup %6042  ;;  %1822 = vadd.xlane.f32.xlu0 %v1821_v63 }
0x141b   :  { %v1824_v4 = vsel %vm704_vm8, %v6043_v2, 0.0 }
0x141c   :  { %v6045_v25 = vpop.eup %6044 }
0x141d   :  { %v1827_v27 = vsel %vm711_vm9, %v6045_v25, 0.0 }
0x141e   :  { %1828 = vadd.xlane.f32.xlu1 %v1827_v27  ;;  %1825 = vadd.xlane.f32.xlu0 %v1824_v4 }
0x142f   :  { %1840 = vrot.lane.b32.xlu1 %v6733_v0, %s6258_s29 }
0x1433   :  { %1919 = vrot.lane.b32.xlu1 %v6619_v47, %s6259_s3 }
0x1434   :  { %1838 = vrot.lane.b32.xlu0 %v6619_v47, %s6258_s29 }
0x1437   :  { %1921 = vrot.lane.b32.xlu1 %v6733_v0, %s6259_s3 }
0x1438   :  { %1915 = vrot.lane.b32.xlu0 %v6619_v47, %s6260_s8 }
0x143b   :  { %1917 = vrot.lane.b32.xlu1 %v6733_v0, %s6260_s8 }
0x14a7   :  { %v1823_v15 = vpop.xlane.xlu0 %1822 }
0x14a8   :  { %6046 = vrcp.f32 %v1823_v15 }
0x14ab   :  { %v1826_v6 = vpop.xlane.xlu0 %1825  ;;  %v1829_v3 = vpop.xlane.xlu1 %1828 }
0x14ac   :  { %6048 = vrcp.f32 %v1826_v6 }
0x14ad   :  { %6050 = vrcp.f32 %v1829_v3 }
0x14af   :  { %v1839_v7 = vpop.permute.xlu0 %1838  ;;  %v1841_v41 = vpop.permute.xlu1 %1840 }
0x14b0   :  { %v1850_v8 = vand.u32 %v1841_v41, %v6640_v14  ;;  %5498 = vmatprep.subr.bf16.mxu0 %v1839_v7 }
0x14b1   :  { %5499 = vmatpush3.bf16.msra.mxu0 %v1839_v7 }
0x14b2   :  { %5500 = vmatprep.subr.bf16.mxu0 %v1850_v8  ;;  %v6047_v9 = vpop.eup %6046 }
0x14b3   :  { %v1920_v10 = vpop.permute.xlu1 %1919  ;;  %v1833_v13 = vmul.f32 %v6047_v9, %v6041_v62  ;;  %v1916_v23 = vpop.permute.xlu0 %1915 }
0x14b4   :  { %v1930_v29 = vsel %vm640_vm6, %v1920_v10, 0 }
0x14b5   :  { %5501 = vmatpush3.bf16.msra.mxu0 %v1850_v8 }
0x14b6   :  { %v6049_v11 = vpop.eup %6048  ;;  %5844 = vmatprep.subr.msk.bf16.mxu0 %vm640_vm6, %v1920_v10 }
0x14b7   :  { %v6051_v12 = vpop.eup %6050  ;;  %v1834_v16 = vmul.f32 %v6049_v11, %v6043_v2  ;;  %v1922_v38 = vpop.permute.xlu1 %1921 }
0x14b8   :  { %v1835_v17 = vmul.f32 %v6051_v12, %v6045_v25  ;;  %v1933_v28 = vsel %vm640_vm6, %v1922_v38, 0  ;;  %v5918_v12 = vld [vmem:[%s6325_s19] sm:$0xff]  }
0x14b9   :  { %v1836_v18 = vpack.c.bf16 %v1834_v16, %v1833_v13 }
0x14ba   :  { %v1837_v21 = vpack.c.bf16 %v1835_v17, %v1835_v17 }
0x14bb   :  { %5502 = vmatprep.mubr.msk.bf16.mxu0 %vm704_vm8, %v1836_v18  ;;  %v1918_v42 = vpop.permute.xlu1 %1917  ;;  %v5919_v18 = vld [vmem:[%s6325_s19 + $0x8] sm:$0xff]   ;;  %s7596_s19 = sld [smem:[#allocation8_spill]] }
0x14bc   :  { %5503 = vmatmul.mubr.msk.bf16.vlgmr.msra.gmra.mrb[24].mxu0 %vm704_vm8, %v1837_v21 }
0x14bd   :  { %5510 = vmatprep.mubr.msk.bf16.mxu0 %vm640_vm6, %v1916_v23 }
0x14be   :  { %5507 = vmatpush3.bf16.xpose.msra.mxu0 %v1930_v29 }
0x14bf   :  { %5845 = vmatprep.subr.msk.bf16.mxu0 %vm640_vm6, %v1922_v38 }
0x14c6   :  { %5509 = vmatpush3.bf16.xpose.msra.mxu0 %v1933_v28 }
0x14c7   :  { %5538 = vmatprep.subr.bf16.mxu0 %v6249_v5 }
0x14cd   :  { %5511 = vmatmul.mubr.msk.bf16.vlgmr.msra.gmra.mrb[28].mxu0 %vm640_vm6, %v1918_v42 }
0x14ce   :  { %5542 = vmatprep.mubr.msk.bf16.mxu0 %vm6250_vm5, %v6249_v5 }
0x158f   :  { %v6847_v34 = vpop.f32.mrb[24].mxu0 }
0x1590   :  { %v1886_v43 = vpop.f32.mrb[25].mxu0 }
0x1591   :  { %v5505_v45 = vpop.f32.mrb[26].mxu0 }
0x1592   :  { %v1889_v46 = vpop.f32.mrb[27].mxu0 }
0x15a0   :  { %v5512_v48 = vpop.f32.mrb[28].mxu0 }
0x15a1   :  { %v1969_v49 = vpop.f32.mrb[29].mxu0  ;;  %v1985_v53 = vmul.f32 0.35355338, %v5512_v48 }
0x15a2   :  { %v1983_v50 = vmul.f32 0.35355338, %v1969_v49  ;;  %v5513_v51 = vpop.f32.mrb[30].mxu0 }
0x15a3   :  { %v1972_v52 = vpop.f32.mrb[31].mxu0  ;;  %v1992_v58 = vsel %vm711_vm9, %v1985_v53, -inf }
0x15a4   :  { %v1984_v54 = vmul.f32 0.35355338, %v1972_v52  ;;  %v1986_v55 = vsel %vm704_vm8, %v1983_v50, -inf }
0x15a5   :  { %1987 = vmax.xlane.f32.xlu0 %v1986_v55 }
0x15a6   :  { %v1989_v56 = vsel %vm704_vm8, %v1984_v54, -inf }
0x15a7   :  { %1990 = vmax.xlane.f32.xlu1 %v1989_v56 }
0x15a9   :  { %1993 = vmax.xlane.f32.xlu0 %v1992_v58  ;;  %v5098_v58 = vld [vmem:[%s6330_s24] ss:$0 sm:$0xff]  ;;  %s7597_s24 = sld [smem:[#allocation10_spill]] }
0x1632   :  { %v1988_v59 = vpop.xlane.xlu0 %1987 }
0x1633   :  { %v1995_v60 = vsub.f32 %v1983_v50, %v1988_v59 }
0x1634   :  { %v1991_v61 = vpop.xlane.xlu1 %1990 }
0x1635   :  { %v1998_v62 = vmul.f32 1.442695, %v1995_v60  ;;  %v1996_v63 = vsub.f32 %v1984_v54, %v1991_v61 }
0x1636   :  { %v1994_v2 = vpop.xlane.xlu0 %1993 }
0x1637   :  { %6052 = vpow2.f32 %v1998_v62  ;;  %v2000_v25 = vmul.f32 1.442695, %v1996_v63  ;;  %v1997_v27 = vsub.f32 %v1985_v53, %v1994_v2 }
0x1639   :  { %6054 = vpow2.f32 %v2000_v25  ;;  %v2002_v4 = vmul.f32 1.442695, %v1997_v27 }
0x163b   :  { %6056 = vpow2.f32 %v2002_v4 }
0x1641   :  { %v6053_v15 = vpop.eup %6052 }
0x1642   :  { %v2004_v6 = vsel %vm704_vm8, %v6053_v15, 0.0 }
0x1643   :  { %v6055_v3 = vpop.eup %6054  ;;  %2005 = vadd.xlane.f32.xlu0 %v2004_v6 }
0x1644   :  { %v2007_v8 = vsel %vm704_vm8, %v6055_v3, 0.0 }
0x1645   :  { %v6057_v7 = vpop.eup %6056 }
0x1646   :  { %v2010_v41 = vsel %vm711_vm9, %v6057_v7, 0.0  ;;  %vm4987_vm9 = vcmask 16384  }
0x1647   :  { %2011 = vadd.xlane.f32.xlu1 %v2010_v41  ;;  %2008 = vadd.xlane.f32.xlu0 %v2007_v8 }
0x1658   :  { %2023 = vrot.lane.b32.xlu1 %v6733_v0, %s6261_s14 }
0x165c   :  { %981 = vrot.lane.b32.xlu1 %v6683_v32, %s6262_s22 }
0x165d   :  { %2021 = vrot.lane.b32.xlu0 %v6619_v47, %s6261_s14 }
0x1660   :  { %983 = vrot.lane.b32.xlu1 %v6685_v36, %s6262_s22 }
0x1661   :  { %1166 = vrot.lane.b32.xlu0 %v6716_v26, %s6263_s23 }
0x1664   :  { %1168 = vrot.lane.b32.xlu1 %v6718_v1, %s6263_s23 }
0x1665   :  { %1351 = vrot.lane.b32.xlu0 %v6750_v20, %s6264_s26 }
0x1668   :  { %1353 = vrot.lane.b32.xlu1 %v6752_v22, %s6264_s26 }
0x1669   :  { %985 = vrot.lane.b32.xlu0 %v6681_v31, %s6262_s22 }
0x166c   :  { %1720 = vrot.lane.b32.xlu1 %v6813_v37, %s6262_s22 }
0x166d   :  { %1722 = vrot.lane.b32.xlu0 %v6815_v39, %s6262_s22 }
0x1670   :  { %1170 = vrot.lane.b32.xlu1 %v6714_v24, %s6263_s23 }
0x1671   :  { %1903 = vrot.lane.b32.xlu0 %v1886_v43, %s6263_s23 }
0x1674   :  { %1905 = vrot.lane.b32.xlu1 %v1889_v46, %s6263_s23 }
0x1675   :  { %1355 = vrot.lane.b32.xlu0 %v6748_v19, %s6264_s26 }
0x16d0   :  { %v2006_v47 = vpop.xlane.xlu0 %2005 }
0x16d1   :  { %6058 = vrcp.f32 %v2006_v47 }
0x16d4   :  { %v2009_v32 = vpop.xlane.xlu0 %2008  ;;  %v2012_v31 = vpop.xlane.xlu1 %2011 }
0x16d5   :  { %6060 = vrcp.f32 %v2009_v32 }
0x16d6   :  { %6062 = vrcp.f32 %v2012_v31 }
0x16d8   :  { %v2022_v36 = vpop.permute.xlu0 %2021  ;;  %v2024_v26 = vpop.permute.xlu1 %2023 }
0x16d9   :  { %v2033_v1 = vand.u32 %v2024_v26, %v6640_v14  ;;  %5514 = vmatprep.subr.bf16.mxu1 %v2022_v36 }
0x16da   :  { %5515 = vmatpush3.bf16.msra.mxu1 %v2022_v36 }
0x16db   :  { %5516 = vmatprep.subr.bf16.mxu1 %v2033_v1  ;;  %v6059_v20 = vpop.eup %6058 }
0x16dc   :  { %v1167_v24 = vpop.permute.xlu0 %1166  ;;  %v982_v0 = vpop.permute.xlu1 %981  ;;  %v2016_v39 = vmul.f32 %v6059_v20, %v6053_v15 }
0x16dd   :  { %991 = vst.msk [vmem:[#allocation3] sm:$0xff] %vm990_vm12, %v982_v0 }
0x16de   :  { %5517 = vmatpush3.bf16.msra.mxu1 %v2033_v1  ;;  %1176 = vst.msk [vmem:[#allocation3] sm:$0xff] %vm1175_vm13, %v1167_v24 }
0x16df   :  { %v6061_v19 = vpop.eup %6060  ;;  %5522 = vmatprep.subr.bf16.mxu1 %v6249_v5 }
0x16e0   :  { %v6063_v22 = vpop.eup %6062  ;;  %v1352_v14 = vpop.permute.xlu0 %1351  ;;  %v2017_v9 = vmul.f32 %v6061_v19, %v6055_v3 }
0x16e1   :  { %v984_v37 = vpop.permute.xlu1 %983  ;;  %1361 = vst.msk [vmem:[#allocation3] sm:$0xff] %vm1360_vm14, %v1352_v14  ;;  %v2018_v10 = vmul.f32 %v6063_v22, %v6057_v7 }
0x16e2   :  { %992 = vst.msk [vmem:[#allocation3 + $0x8] sm:$0xff] %vm990_vm12, %v984_v37  ;;  %v2019_v11 = vpack.c.bf16 %v2017_v9, %v2016_v39 }
0x16e3   :  { %v2020_v13 = vpack.c.bf16 %v2018_v10, %v2018_v10 }
0x16e4   :  { %5518 = vmatprep.mubr.msk.bf16.mxu1 %vm704_vm8, %v2019_v11  ;;  %v986_v16 = vpop.permute.xlu0 %985 }
0x16e5   :  { %v1169_v17 = vpop.permute.xlu1 %1168  ;;  %994 = vst.msk [vmem:[#allocation3 + $0x10] sm:$0x1] %vm993_vm15, %v986_v16  ;;  %5519 = vmatmul.mubr.msk.bf16.vlgmr.msra.gmra.mrb[48].mxu1 %vm704_vm8, %v2020_v13 }
0x16e6   :  { %1177 = vst.msk [vmem:[#allocation3 + $0x8] sm:$0xff] %vm1175_vm13, %v1169_v17  ;;  %5523 = vmatpush3.bf16.msra.mxu1 %v5918_v12  ;;  %5526 = vmatprep.mubr.msk.bf16.mxu1 %vm6250_vm5, %v6249_v5 }
0x16e7   :  { %5524 = vmatprep.subr.bf16.mxu1 %v6249_v5 }
0x16e8   :  { %v1723_v21 = vpop.permute.xlu0 %1722  ;;  %v2098_v43 = vld [vmem:[#allocation3] sm:$0xff] }
0x16e9   :  { %v1354_v23 = vpop.permute.xlu1 %1353  ;;  %1730 = vst.msk [vmem:[#allocation3 + $0x19] sm:$0xff] %vm990_vm12, %v1723_v21  ;;  %v5920_v21 = vld [vmem:[%s6345_s12] sm:$0xff]  }
0x16ea   :  { %1362 = vst.msk [vmem:[#allocation3 + $0x8] sm:$0xff] %vm1360_vm14, %v1354_v23  ;;  %5525 = vmatpush3.bf16.msra.mxu1 %v5919_v18  ;;  %5539 = vmatpush3.bf16.msra.mxu0 %v5920_v21  ;;  %v5921_v23 = vld [vmem:[%s6345_s12 + $0x8] sm:$0xff]   ;;  %s7599_s12 = sld [smem:[#allocation16_spill]] }
0x16eb   :  { %5554 = vmatprep.subr.bf16.mxu1 %v6249_v5  ;;  %5540 = vmatprep.subr.bf16.mxu0 %v6249_v5 }
0x16ec   :  { %v1904_v29 = vpop.permute.xlu0 %1903 }
0x16ed   :  { %v1721_v38 = vpop.permute.xlu1 %1720 }
0x16ee   :  { %1729 = vst.msk [vmem:[#allocation3 + $0x11] sm:$0xff] %vm990_vm12, %v1721_v38  ;;  %5541 = vmatpush3.bf16.msra.mxu0 %v5921_v23 }
0x16ef   :  { %1912 = vst.msk [vmem:[#allocation3 + $0x11] sm:$0xff] %vm1175_vm13, %v1904_v29  ;;  %5582 = vmatprep.subr.bf16.mxu0 %v6249_v5 }
0x16f0   :  { %v1356_v28 = vpop.permute.xlu0 %1355 }
0x16f1   :  { %v1171_v42 = vpop.permute.xlu1 %1170  ;;  %v2099_v45 = vld [vmem:[#allocation3 + $0x8] sm:$0xff] }
0x16f2   :  { %1179 = vst.msk [vmem:[#allocation3 + $0x10] sm:$0x1] %vm1178_vm0, %v1171_v42  ;;  %v2107_v46 = vpack.c.bf16 %v2099_v45, %v2098_v43 }
0x16f3   :  { %1364 = vst.msk [vmem:[#allocation3 + $0x10] sm:$0x1] %vm1363_vm1, %v1356_v28 }
0x16f4   :  { %5527 = vmatmul.mubr.msk.bf16.vlgmr.msra.gmra.mrb[52].mxu1 %vm348_vm3, %v2107_v46 }
0x16f5   :  { %v1906_v48 = vpop.permute.xlu1 %1905  ;;  %5530 = vmatprep.mubr.msk.bf16.mxu1 %vm6250_vm5, %v6249_v5 }
0x16f6   :  { %1913 = vst.msk [vmem:[#allocation3 + $0x19] sm:$0xff] %vm1175_vm13, %v1906_v48 }
0x17b8   :  { %v5520_v49 = vpop.f32.mrb[48].mxu1 }
0x17b9   :  { %v2069_v50 = vpop.f32.mrb[49].mxu1 }
0x17ba   :  { %2086 = vrot.lane.b32.xlu1 %v2069_v50, %s6264_s26  ;;  %v5521_v51 = vpop.f32.mrb[50].mxu1 }
0x17bb   :  { %v2072_v52 = vpop.f32.mrb[51].mxu1 }
0x17bc   :  { %2088 = vrot.lane.b32.xlu0 %v2072_v52, %s6264_s26 }
0x17be   :  { %1724 = vrot.lane.b32.xlu1 %v6811_v33, %s6262_s22 }
0x17c0   :  { %1907 = vrot.lane.b32.xlu0 %v6847_v34, %s6263_s23 }
0x17c2   :  { %2090 = vrot.lane.b32.xlu1 %v5520_v49, %s6264_s26 }
0x17c7   :  { %v2172_v53 = vpop.f32.mrb[52].mxu1 }
0x17c8   :  { %v5528_v54 = vpop.f32.mrb[53].mxu1  ;;  %v2173_v59 = vadd.f32 %v5098_v58, %v2172_v53 }
0x17c9   :  { %v2175_v55 = vpop.f32.mrb[54].mxu1 }
0x17ca   :  { %v5529_v56 = vpop.f32.mrb[55].mxu1  ;;  %v6918_v60 = vadd.f32 %v2173_v59, %v6530_v30  ;;  %v2176_v61 = vadd.f32 %v5098_v58, %v2175_v55 }
0x17cc   :  { %v2199_v62 = vsel %vm348_vm3, %v6918_v60, 0.0  ;;  %v6923_v33 = vadd.f32 %v2176_v61, %v6536_v35 }
0x17ce   :  { %v2202_v34 = vsel %vm348_vm3, %v6923_v33, 0.0 }
0x17df   :  { %2200 = vadd.xlane.f32.xlu0 %v2199_v62 }
0x17e6   :  { %2203 = vadd.xlane.f32.xlu1 %v2202_v34 }
0x182c   :  { %v2087_v63 = vpop.permute.xlu1 %2086 }
0x182d   :  { %2095 = vst.msk [vmem:[#allocation3 + $0x11] sm:$0xff] %vm1360_vm14, %v2087_v63 }
0x182e   :  { %v2089_v2 = vpop.permute.xlu0 %2088 }
0x182f   :  { %2096 = vst.msk [vmem:[#allocation3 + $0x19] sm:$0xff] %vm1360_vm14, %v2089_v2  ;;  %v5104_v2 = vld [vmem:[%s6335_s30] ss:$0 sm:$0xff]  ;;  %s7598_s30 = sld [smem:[#allocation9_spill]] }
0x1830   :  { %v1725_v30 = vpop.permute.xlu1 %1724 }
0x1831   :  { %1731 = vst.msk [vmem:[#allocation3 + $0x21] sm:$0x1] %vm993_vm15, %v1725_v30 }
0x1832   :  { %v1908_v25 = vpop.permute.xlu0 %1907 }
0x1833   :  { %1914 = vst.msk [vmem:[#allocation3 + $0x21] sm:$0x1] %vm1178_vm0, %v1908_v25 }
0x1834   :  { %v2091_v27 = vpop.permute.xlu1 %2090  ;;  %v2100_v35 = vld [vmem:[#allocation3 + $0x10] sm:$0xff] }
0x1835   :  { %2097 = vst.msk [vmem:[#allocation3 + $0x21] sm:$0x1] %vm1363_vm1, %v2091_v27 }
0x1836   :  { %v2101_v4 = vld [vmem:[#allocation3 + $0x18] sm:$0xff] }
0x1837   :  { %v2108_v15 = vpack.c.bf16 %v2101_v4, %v2100_v35  ;;  %v5105_v35 = vld [vmem:[%s7596_s19] ss:$0 sm:$0xff] }
0x1839   :  { %5531 = vmatmul.mubr.msk.bf16.gmra.mrb[56].mxu1 %vm348_vm3, %v2108_v15 }
0x183a   :  { %5534 = vmatprep.mubr.msk.bf16.mxu1 %vm6250_vm5, %v6249_v5 }
0x183c   :  { %v2102_v6 = vld [vmem:[#allocation3 + $0x20] sm:$0x3] }
0x183d   :  { %v2109_v3 = vpack.c.bf16 %v2102_v6, %v2102_v6 }
0x1841   :  { %5535 = vmatmul.mubr.msk.bf16.gmra.mrb[60].mxu1 %vm348_vm3, %v2109_v3 }
0x1842   :  { %5570 = vmatprep.mubr.msk.bf16.mxu1 %vm6250_vm5, %v6249_v5 }
0x186c   :  { %v2201_v7 = vpop.xlane.xlu0 %2200 }
0x186d   :  { %v2214_v41 = vmul.f32 0.03125, %v2201_v7  ;;  %v5922_v7 = vld [vmem:[%s7597_s24] sm:$0xff]  }
0x186e   :  { %5555 = vmatpush3.bf16.msra.mxu1 %v5922_v7 }
0x186f   :  { %v6939_v8 = vsub.f32 %v6918_v60, %v2214_v41  ;;  %5556 = vmatprep.subr.bf16.mxu1 %v6249_v5  ;;  %v5923_v41 = vld [vmem:[%s7597_s24 + $0x8] sm:$0xff]  }
0x1871   :  { %v2224_v47 = vmul.f32 %v6939_v8, %v6939_v8 }
0x1872   :  { %5557 = vmatpush3.bf16.msra.mxu1 %v5923_v41 }
0x1873   :  { %v2229_v32 = vsel %vm348_vm3, %v2224_v47, 0.0  ;;  %v2204_v1 = vpop.xlane.xlu1 %2203  ;;  %5558 = vmatprep.subr.bf16.mxu1 %v6249_v5  ;;  %v5925_v47 = vld [vmem:[%s7597_s24 + $0x18] sm:$0xff]  }
0x1874   :  { %2230 = vadd.xlane.f32.xlu1 %v2229_v32  ;;  %v2215_v22 = vmul.f32 0.03125, %v2204_v1  ;;  %v5926_v32 = vld [vmem:[%s7597_s24 + $0x20] sm:$0xff]  }
0x1876   :  { %v2220_v9 = vsub.f32 %v6923_v33, %v2215_v22 }
0x1878   :  { %v2225_v17 = vmul.f32 %v2220_v9, %v2220_v9 }
0x187a   :  { %v2232_v18 = vsel %vm348_vm3, %v2225_v17, 0.0 }
0x1901   :  { %v2231_v29 = vpop.xlane.xlu1 %2230 }
0x1902   :  { %v2244_v28 = vmul.f32 0.03125, %v2231_v29 }
0x1904   :  { %v2249_v48 = vadd.f32 1e-05, %v2244_v28 }
0x1906   :  { %6064 = vrsqrt.f32 %v2249_v48 }
0x190c   :  { %v2180_v31 = vpop.f32.mrb[56].mxu1 }
0x190d   :  { %v2181_v36 = vadd.f32 %v5098_v58, %v2180_v31  ;;  %v5532_v26 = vpop.f32.mrb[57].mxu1  ;;  %v5927_v31 = vld [vmem:[%s7597_s24 + $0x28] sm:$0xff]  }
0x190e   :  { %v2183_v24 = vpop.f32.mrb[58].mxu1 }
0x190f   :  { %v6945_v0 = vadd.f32 %v2181_v36, %v6542_v40  ;;  %v2184_v20 = vadd.f32 %v5098_v58, %v2183_v24  ;;  %v5533_v19 = vpop.f32.mrb[59].mxu1  ;;  %v5928_v36 = vld [vmem:[%s7597_s24 + $0x30] sm:$0xff]  }
0x1910   :  { %v6065_v34 = vpop.eup %6064 }
0x1911   :  { %v6948_v14 = vadd.f32 %v2184_v20, %v6548_v44  ;;  %v2205_v37 = vsel %vm348_vm3, %v6945_v0, 0.0  ;;  %v2259_v63 = vmul.f32 %v6065_v34, %v6939_v8  ;;  %v5924_v8 = vld [vmem:[%s7597_s24 + $0x10] sm:$0xff]   ;;  %v5929_v20 = vld [vmem:[%s7597_s24 + $0x38] sm:$0xff]  }
0x1912   :  { %2206 = vadd.xlane.f32.xlu0 %v2205_v37  ;;  %5559 = vmatpush3.bf16.msra.mxu1 %v5924_v8 }
0x1913   :  { %v2208_v40 = vsel %vm348_vm3, %v6948_v14, 0.0  ;;  %v2271_v25 = vmul.f32 %v5104_v2, %v2259_v63  ;;  %5560 = vmatprep.subr.bf16.mxu1 %v6249_v5 }
0x1914   :  { %v2188_v39 = vpop.f32.mrb[60].mxu1 }
0x1915   :  { %v2189_v10 = vadd.f32 %v5098_v58, %v2188_v39  ;;  %v5536_v11 = vpop.f32.mrb[61].mxu1  ;;  %v2283_v15 = vadd.f32 %v5105_v35, %v2271_v25  ;;  %v7017_v25 = vld [vmem:[%s7599_s12] sm:$0xff] }
0x1916   :  { %2209 = vadd.xlane.f32.xlu0 %v2208_v40  ;;  %v2191_v12 = vpop.f32.mrb[62].mxu1  ;;  %5561 = vmatpush3.bf16.msra.mxu1 %v5925_v47 }
0x1917   :  { %v6956_v13 = vadd.f32 %v2189_v10, %v6590_v57  ;;  %v5537_v44 = vpop.f32.mrb[63].mxu1  ;;  %5562 = vmatprep.subr.bf16.mxu1 %v6249_v5 }
0x1919   :  { %v2211_v16 = vsel %vm373_vm4, %v6956_v13, 0.0 }
0x191a   :  { %2212 = vadd.xlane.f32.xlu0 %v2211_v16  ;;  %5563 = vmatpush3.bf16.msra.mxu1 %v5926_v32 }
0x191b   :  { %5564 = vmatprep.subr.bf16.mxu1 %v6249_v5 }
0x191e   :  { %2233 = vadd.xlane.f32.xlu0 %v2232_v18  ;;  %5565 = vmatpush3.bf16.msra.mxu1 %v5927_v31 }
0x191f   :  { %5566 = vmatprep.subr.bf16.mxu1 %v6249_v5 }
0x1922   :  { %5567 = vmatpush3.bf16.msra.mxu1 %v5928_v36 }
0x1923   :  { %5568 = vmatprep.subr.bf16.mxu1 %v6249_v5 }
0x1926   :  { %5569 = vmatpush3.bf16.msra.mxu1 %v5929_v20 }
0x199f   :  { %v2207_v57 = vpop.xlane.xlu0 %2206 }
0x19a0   :  { %v2216_v38 = vmul.f32 0.03125, %v2207_v57 }
0x19a2   :  { %v6966_v42 = vsub.f32 %v6945_v0, %v2216_v38 }
0x19a3   :  { %v2210_v43 = vpop.xlane.xlu0 %2209 }
0x19a4   :  { %v2217_v45 = vmul.f32 0.03125, %v2210_v43  ;;  %v2226_v46 = vmul.f32 %v6966_v42, %v6966_v42  ;;  %v5106_v43 = vld [vmem:[%s7598_s30] ss:$0 sm:$0xff] }
0x19a6   :  { %v6971_v49 = vsub.f32 %v6948_v14, %v2217_v45  ;;  %v2235_v50 = vsel %vm348_vm3, %v2226_v46, 0.0 }
0x19a7   :  { %2236 = vadd.xlane.f32.xlu1 %v2235_v50  ;;  %v2213_v51 = vpop.xlane.xlu0 %2212 }
0x19a8   :  { %v2218_v52 = vmul.f32 0.03125, %v2213_v51  ;;  %v2227_v53 = vmul.f32 %v6971_v49, %v6971_v49 }
0x19aa   :  { %v6977_v54 = vsub.f32 %v6956_v13, %v2218_v52  ;;  %v2238_v55 = vsel %vm348_vm3, %v2227_v53, 0.0 }
0x19ab   :  { %2239 = vadd.xlane.f32.xlu0 %v2238_v55  ;;  %v2234_v56 = vpop.xlane.xlu0 %2233 }
0x19ac   :  { %v2245_v58 = vmul.f32 0.03125, %v2234_v56  ;;  %v2228_v59 = vmul.f32 %v6977_v54, %v6977_v54 }
0x19ae   :  { %v2250_v61 = vadd.f32 1e-05, %v2245_v58  ;;  %v2241_v62 = vsel %vm373_vm4, %v2228_v59, 0.0 }
0x19af   :  { %2242 = vadd.xlane.f32.xlu1 %v2241_v62 }
0x19b0   :  { %6066 = vrsqrt.f32 %v2250_v61 }
0x19ba   :  { %v6067_v30 = vpop.eup %6066 }
0x19bb   :  { %v2260_v27 = vmul.f32 %v6067_v30, %v2220_v9 }
0x19bd   :  { %v2272_v4 = vmul.f32 %v5104_v2, %v2260_v27  ;;  %v2815_v27 = vsel %vm348_vm3, %v7017_v25, 0.0 }
0x19be   :  { %2816 = vadd.xlane.f32.xlu0 %v2815_v27 }
0x19bf   :  { %v2284_v6 = vadd.f32 %v5105_v35, %v2272_v4 }
0x19c1   :  { %v2292_v3 = vpack.c.bf16 %v2284_v6, %v2283_v15  ;;  %v7027_v15 = vld [vmem:[%s7599_s12 + $0x10] sm:$0xff] }
0x19c2   :  { %v2821_v6 = vsel %vm348_vm3, %v7027_v15, 0.0 }
0x19c3   :  { %5543 = vmatmul.mubr.msk.bf16.vlgmr.msra.gmra.mrb[32].mxu0 %vm348_vm3, %v2292_v3  ;;  %2822 = vadd.xlane.f32.xlu0 %v2821_v6 }
0x19c4   :  { %5546 = vmatprep.mubr.msk.bf16.mxu0 %vm6250_vm5, %v6249_v5 }
0x1a34   :  { %v2237_v26 = vpop.xlane.xlu1 %2236 }
0x1a35   :  { %v2246_v1 = vmul.f32 0.03125, %v2237_v26 }
0x1a37   :  { %v2251_v24 = vadd.f32 1e-05, %v2246_v1 }
0x1a38   :  { %v2240_v19 = vpop.xlane.xlu0 %2239 }
0x1a39   :  { %6068 = vrsqrt.f32 %v2251_v24  ;;  %v2247_v22 = vmul.f32 0.03125, %v2240_v19 }
0x1a3b   :  { %v2252_v37 = vadd.f32 1e-05, %v2247_v22 }
0x1a3c   :  { %v2243_v39 = vpop.xlane.xlu1 %2242 }
0x1a3d   :  { %6070 = vrsqrt.f32 %v2252_v37  ;;  %v2248_v9 = vmul.f32 0.03125, %v2243_v39 }
0x1a3f   :  { %v2253_v10 = vadd.f32 1e-05, %v2248_v9 }
0x1a41   :  { %6072 = vrsqrt.f32 %v2253_v10 }
0x1a43   :  { %v6069_v11 = vpop.eup %6068 }
0x1a44   :  { %v2261_v40 = vmul.f32 %v6069_v11, %v6966_v42 }
0x1a46   :  { %v2273_v16 = vmul.f32 %v5104_v2, %v2261_v40 }
0x1a47   :  { %v6071_v12 = vpop.eup %6070 }
0x1a48   :  { %v2262_v44 = vmul.f32 %v6071_v12, %v6971_v49  ;;  %v2285_v21 = vadd.f32 %v5105_v35, %v2273_v16 }
0x1a4a   :  { %v2274_v17 = vmul.f32 %v5104_v2, %v2262_v44 }
0x1a4b   :  { %v6073_v18 = vpop.eup %6072 }
0x1a4c   :  { %v2286_v23 = vadd.f32 %v5105_v35, %v2274_v17  ;;  %v2263_v29 = vmul.f32 %v6073_v18, %v6977_v54 }
0x1a4e   :  { %v2293_v57 = vpack.c.bf16 %v2286_v23, %v2285_v21  ;;  %v2275_v38 = vmul.f32 %v5104_v2, %v2263_v29 }
0x1a50   :  { %5547 = vmatmul.mubr.msk.bf16.gmra.mrb[36].mxu0 %vm348_vm3, %v2293_v57  ;;  %v2287_v28 = vadd.f32 %v5105_v35, %v2275_v38  ;;  %v7022_v35 = vld [vmem:[%s7599_s12 + $0x8] sm:$0xff] }
0x1a51   :  { %5550 = vmatprep.mubr.msk.bf16.mxu0 %vm6250_vm5, %v6249_v5  ;;  %v2818_v4 = vsel %vm348_vm3, %v7022_v35, 0.0 }
0x1a52   :  { %v2294_v42 = vpack.c.bf16 %v2287_v28, %v2287_v28  ;;  %2819 = vadd.xlane.f32.xlu1 %v2818_v4 }
0x1a58   :  { %5551 = vmatmul.mubr.msk.bf16.gmra.mrb[40].mxu0 %vm348_vm3, %v2294_v42  ;;  %v5117_v42 = vld [vmem:[%s7600_s28] ss:$0 sm:$0xff] }
0x1a59   :  { %5586 = vmatprep.mubr.msk.bf16.mxu0 %vm6250_vm5, %v6249_v5 }
0x1a96   :  { %v2357_v45 = vpop.f32.mrb[32].mxu0 }
0x1a97   :  { %v2358_v46 = vadd.f32 %v5106_v43, %v2357_v45  ;;  %v5544_v48 = vpop.f32.mrb[33].mxu0 }
0x1a98   :  { %v2360_v49 = vpop.f32.mrb[34].mxu0 }
0x1a99   :  { %v5112_v50 = vmul.f32 -1.702, %v2358_v46  ;;  %v2361_v51 = vadd.f32 %v5106_v43, %v2360_v49  ;;  %v5545_v52 = vpop.f32.mrb[35].mxu0 }
0x1a9b   :  { %v2389_v53 = vmul.f32 1.442695, %v5112_v50  ;;  %v5113_v54 = vmul.f32 -1.702, %v2361_v51 }
0x1a9d   :  { %6074 = vpow2.f32 %v2389_v53  ;;  %v2391_v55 = vmul.f32 1.442695, %v5113_v54 }
0x1a9f   :  { %6076 = vpow2.f32 %v2391_v55  ;;  %v2817_v55 = vpop.xlane.xlu0 %2816 }
0x1aa7   :  { %v6075_v56 = vpop.eup %6074 }
0x1aa8   :  { %v2399_v58 = vadd.f32 1.0, %v6075_v56  ;;  %v2824_v56 = vmul.f32 0.03125, %v2817_v55 }
0x1aa9   :  { %v6077_v59 = vpop.eup %6076 }
0x1aaa   :  { %6078 = vrcp.f32 %v2399_v58  ;;  %v2400_v61 = vadd.f32 1.0, %v6077_v59  ;;  %v7039_v59 = vsub.f32 %v7017_v25, %v2824_v56 }
0x1aac   :  { %6080 = vrcp.f32 %v2400_v61  ;;  %v2830_v6 = vmul.f32 %v7039_v59, %v7039_v59 }
0x1ab4   :  { %v6079_v62 = vpop.eup %6078 }
0x1ab5   :  { %v2414_v63 = vmul.f32 %v6079_v62, %v2358_v46  ;;  %v2823_v62 = vpop.xlane.xlu0 %2822 }
0x1ab6   :  { %v6081_v34 = vpop.eup %6080 }
0x1ab7   :  { %v2415_v2 = vmul.f32 %v6081_v34, %v2361_v51 }
0x1ab9   :  { %v2435_v30 = vpack.c.bf16 %v2415_v2, %v2414_v63  ;;  %v2826_v63 = vmul.f32 0.03125, %v2823_v62 }
0x1abb   :  { %5571 = vmatmul.mubr.bf16.vlgmr.msra.gmra.mrb[64].mxu1 %v2435_v30 }
0x1abc   :  { %5574 = vmatprep.mubr.msk.bf16.mxu1 %vm6250_vm5, %v6249_v5 }
0x1adf   :  { %v2820_v58 = vpop.xlane.xlu1 %2819 }
0x1ae0   :  { %v2825_v27 = vmul.f32 0.03125, %v2820_v58 }
0x1b23   :  { %v2365_v3 = vpop.f32.mrb[36].mxu0 }
0x1b24   :  { %v2366_v7 = vadd.f32 %v5106_v43, %v2365_v3  ;;  %v5548_v41 = vpop.f32.mrb[37].mxu0 }
0x1b25   :  { %v2368_v8 = vpop.f32.mrb[38].mxu0 }
0x1b26   :  { %v5114_v47 = vmul.f32 -1.702, %v2366_v7  ;;  %v2369_v32 = vadd.f32 %v5106_v43, %v2368_v8  ;;  %v5549_v31 = vpop.f32.mrb[39].mxu0  ;;  %v7050_v8 = vsub.f32 %v7022_v35, %v2825_v27 }
0x1b27   :  { %v2833_v31 = vsel %vm348_vm3, %v2830_v6, 0.0 }
0x1b28   :  { %v2393_v36 = vmul.f32 1.442695, %v5114_v47  ;;  %v5115_v26 = vmul.f32 -1.702, %v2369_v32 }
0x1b2a   :  { %6082 = vpow2.f32 %v2393_v36  ;;  %v2395_v1 = vmul.f32 1.442695, %v5115_v26 }
0x1b2b   :  { %v2373_v24 = vpop.f32.mrb[40].mxu0 }
0x1b2c   :  { %6084 = vpow2.f32 %v2395_v1  ;;  %v2374_v20 = vadd.f32 %v5106_v43, %v2373_v24  ;;  %v5552_v19 = vpop.f32.mrb[41].mxu0 }
0x1b2d   :  { %v2376_v22 = vpop.f32.mrb[42].mxu0 }
0x1b2e   :  { %v5116_v37 = vmul.f32 -1.702, %v2374_v20  ;;  %v5553_v39 = vpop.f32.mrb[43].mxu0  ;;  %v2831_v22 = vmul.f32 %v7050_v8, %v7050_v8 }
0x1b30   :  { %v2397_v9 = vmul.f32 1.442695, %v5116_v37 }
0x1b32   :  { %6086 = vpow2.f32 %v2397_v9 }
0x1b34   :  { %v6083_v10 = vpop.eup %6082 }
0x1b35   :  { %v2401_v11 = vadd.f32 1.0, %v6083_v10  ;;  %v2836_v10 = vsel %vm348_vm3, %v2831_v22, 0.0 }
0x1b36   :  { %v6085_v40 = vpop.eup %6084 }
0x1b37   :  { %6088 = vrcp.f32 %v2401_v11  ;;  %v2402_v12 = vadd.f32 1.0, %v6085_v40 }
0x1b39   :  { %6090 = vrcp.f32 %v2402_v12 }
0x1b3c   :  { %v6087_v44 = vpop.eup %6086 }
0x1b3d   :  { %v2403_v16 = vadd.f32 1.0, %v6087_v44  ;;  %v5930_v44 = vld [vmem:[%s7601_s1] sm:$0xff]  }
0x1b3e   :  { %5611 = vmatprep.subr.bf16.mxu1 %v5930_v44 }
0x1b3f   :  { %6092 = vrcp.f32 %v2403_v16  ;;  %5612 = vmatpush3.bf16.msra.mxu1 %v5930_v44  ;;  %v5931_v16 = vld [vmem:[%s7602_s2] sm:$0xff]  }
0x1b40   :  { %5583 = vmatpush3.bf16.msra.mxu0 %v5931_v16 }
0x1b41   :  { %v6089_v17 = vpop.eup %6088  ;;  %5584 = vmatprep.subr.bf16.mxu0 %v6249_v5 }
0x1b42   :  { %v2416_v21 = vmul.f32 %v6089_v17, %v2366_v7  ;;  %v7046_v7 = vsub.f32 %v7027_v15, %v2826_v63  ;;  %v5932_v17 = vld [vmem:[%s7601_s1 + $0x8] sm:$0xff]  }
0x1b43   :  { %v6091_v18 = vpop.eup %6090  ;;  %5613 = vmatprep.subr.bf16.mxu1 %v5932_v17 }
0x1b44   :  { %v2417_v23 = vmul.f32 %v6091_v18, %v2369_v32  ;;  %v2832_v15 = vmul.f32 %v7046_v7, %v7046_v7  ;;  %5614 = vmatpush3.bf16.msra.mxu1 %v5932_v17  ;;  %v5933_v18 = vld [vmem:[%s7602_s2 + $0x8] sm:$0xff]  }
0x1b45   :  { %5625 = vmatprep.subr.bf16.mxu1 %v6249_v5  ;;  %5585 = vmatpush3.bf16.msra.mxu0 %v5933_v18 }
0x1b46   :  { %v2436_v29 = vpack.c.bf16 %v2417_v23, %v2416_v21  ;;  %v2839_v9 = vsel %vm348_vm3, %v2832_v15, 0.0 }
0x1b48   :  { %5575 = vmatmul.mubr.bf16.gmra.mrb[68].mxu1 %v2436_v29 }
0x1b49   :  { %v6093_v57 = vpop.eup %6092  ;;  %5578 = vmatprep.mubr.msk.bf16.mxu1 %vm6250_vm5, %v6249_v5 }
0x1b4a   :  { %v2418_v38 = vmul.f32 %v6093_v57, %v2374_v20 }
0x1b4c   :  { %v2437_v28 = vpack.c.bf16 %v2418_v38, %v2418_v38 }
0x1b50   :  { %5579 = vmatmul.mubr.bf16.gmra.mrb[72].mxu1 %v2437_v28 }
0x1b8e   :  { %v2527_v43 = vpop.f32.mrb[64].mxu1 }
0x1b8f   :  { %v2528_v45 = vadd.f32 %v5117_v42, %v2527_v43  ;;  %v5572_v46 = vpop.f32.mrb[65].mxu1 }
0x1b90   :  { %v2530_v48 = vpop.f32.mrb[66].mxu1 }
0x1b91   :  { %v2549_v49 = vadd.f32 %v2528_v45, %v6918_v60  ;;  %v2531_v50 = vadd.f32 %v5117_v42, %v2530_v48  ;;  %v5573_v51 = vpop.f32.mrb[67].mxu1 }
0x1b93   :  { %v2550_v52 = vadd.f32 %v2531_v50, %v6923_v33  ;;  %v2554_v53 = vsel %vm348_vm3, %v2549_v49, 0.0 }
0x1b94   :  { %2555 = vadd.xlane.f32.xlu1 %v2554_v53 }
0x1b95   :  { %v2557_v54 = vsel %vm348_vm3, %v2550_v52, 0.0 }
0x1b96   :  { %2558 = vadd.xlane.f32.xlu0 %v2557_v54 }
0x1c1b   :  { %v2535_v61 = vpop.f32.mrb[68].mxu1 }
0x1c1c   :  { %v2536_v34 = vadd.f32 %v5117_v42, %v2535_v61  ;;  %v5576_v60 = vpop.f32.mrb[69].mxu1 }
0x1c1d   :  { %v2538_v2 = vpop.f32.mrb[70].mxu1 }
0x1c1e   :  { %v2551_v33 = vadd.f32 %v2536_v34, %v6945_v0  ;;  %v2539_v30 = vadd.f32 %v5117_v42, %v2538_v2  ;;  %v5577_v4 = vpop.f32.mrb[71].mxu1 }
0x1c20   :  { %v2552_v3 = vadd.f32 %v2539_v30, %v6948_v14  ;;  %v2560_v25 = vsel %vm348_vm3, %v2551_v33, 0.0 }
0x1c21   :  { %2561 = vadd.xlane.f32.xlu1 %v2560_v25  ;;  %v2556_v41 = vpop.xlane.xlu1 %2555 }
0x1c22   :  { %v2563_v0 = vsel %vm348_vm3, %v2552_v3, 0.0  ;;  %v2569_v36 = vmul.f32 0.03125, %v2556_v41  ;;  %v5135_v41 = vld [vmem:[%s7603_s7] ss:$0 sm:$0xff] }
0x1c23   :  { %v2559_v47 = vpop.xlane.xlu0 %2558  ;;  %2564 = vadd.xlane.f32.xlu0 %v2563_v0  ;;  %v2543_v32 = vpop.f32.mrb[72].mxu1 }
0x1c24   :  { %v2570_v26 = vmul.f32 0.03125, %v2559_v47  ;;  %v2544_v14 = vadd.f32 %v5117_v42, %v2543_v32  ;;  %v5580_v1 = vpop.f32.mrb[73].mxu1  ;;  %v7061_v37 = vsub.f32 %v2549_v49, %v2569_v36 }
0x1c25   :  { %v2546_v24 = vpop.f32.mrb[74].mxu1  ;;  %v5136_v1 = vld [vmem:[%s7605_s11] ss:$0 sm:$0xff] }
0x1c26   :  { %v7056_v20 = vsub.f32 %v2550_v52, %v2570_v26  ;;  %v2553_v35 = vadd.f32 %v2544_v14, %v6956_v13  ;;  %v5581_v19 = vpop.f32.mrb[75].mxu1  ;;  %v2579_v11 = vmul.f32 %v7061_v37, %v7061_v37  ;;  %v5126_v14 = vld [vmem:[%s7604_s10] ss:$0 sm:$0xff] }
0x1c27   :  { %2834 = vadd.xlane.f32.xlu0 %v2833_v31 }
0x1c28   :  { %v2566_v39 = vsel %vm373_vm4, %v2553_v35, 0.0  ;;  %v2580_v13 = vmul.f32 %v7056_v20, %v7056_v20  ;;  %v2584_v12 = vsel %vm348_vm3, %v2579_v11, 0.0 }
0x1c29   :  { %2567 = vadd.xlane.f32.xlu1 %v2566_v39 }
0x1c2a   :  { %v2587_v40 = vsel %vm348_vm3, %v2580_v13, 0.0 }
0x1c2b   :  { %2840 = vadd.xlane.f32.xlu0 %v2839_v9 }
0x1c2d   :  { %2837 = vadd.xlane.f32.xlu1 %v2836_v10 }
0x1c2f   :  { %2588 = vadd.xlane.f32.xlu0 %v2587_v40 }
0x1c31   :  { %2585 = vadd.xlane.f32.xlu1 %v2584_v12 }
0x1cae   :  { %v2562_v21 = vpop.xlane.xlu1 %2561 }
0x1caf   :  { %v2571_v23 = vmul.f32 0.03125, %v2562_v21 }
0x1cb0   :  { %v2565_v29 = vpop.xlane.xlu0 %2564 }
0x1cb1   :  { %v7078_v57 = vsub.f32 %v2551_v33, %v2571_v23  ;;  %v2572_v38 = vmul.f32 0.03125, %v2565_v29 }
0x1cb3   :  { %v7080_v28 = vsub.f32 %v2552_v3, %v2572_v38  ;;  %v2581_v42 = vmul.f32 %v7078_v57, %v7078_v57 }
0x1cb4   :  { %v2835_v43 = vpop.xlane.xlu0 %2834 }
0x1cb5   :  { %v2842_v45 = vmul.f32 0.03125, %v2835_v43  ;;  %v2590_v46 = vsel %vm348_vm3, %v2581_v42, 0.0  ;;  %v2582_v48 = vmul.f32 %v7080_v28, %v7080_v28 }
0x1cb6   :  { %2591 = vadd.xlane.f32.xlu1 %v2590_v46  ;;  %v2568_v49 = vpop.xlane.xlu1 %2567 }
0x1cb7   :  { %v2845_v50 = vadd.f32 1e-05, %v2842_v45  ;;  %v2573_v51 = vmul.f32 0.03125, %v2568_v49  ;;  %v2593_v52 = vsel %vm348_vm3, %v2582_v48, 0.0 }
0x1cb8   :  { %2594 = vadd.xlane.f32.xlu0 %v2593_v52  ;;  %v2841_v53 = vpop.xlane.xlu0 %2840 }
0x1cb9   :  { %6094 = vrsqrt.f32 %v2845_v50  ;;  %v7088_v54 = vsub.f32 %v2553_v35, %v2573_v51  ;;  %v2844_v55 = vmul.f32 0.03125, %v2841_v53 }
0x1cba   :  { %v2838_v56 = vpop.xlane.xlu1 %2837 }
0x1cbb   :  { %v2847_v58 = vadd.f32 1e-05, %v2844_v55  ;;  %v2843_v61 = vmul.f32 0.03125, %v2838_v56  ;;  %v2583_v62 = vmul.f32 %v7088_v54, %v7088_v54 }
0x1cbc   :  { %v2589_v34 = vpop.xlane.xlu0 %2588 }
0x1cbd   :  { %6096 = vrsqrt.f32 %v2847_v58  ;;  %v2846_v60 = vadd.f32 1e-05, %v2843_v61  ;;  %v2600_v63 = vmul.f32 0.03125, %v2589_v34  ;;  %v2596_v2 = vsel %vm373_vm4, %v2583_v62, 0.0 }
0x1cbe   :  { %2597 = vadd.xlane.f32.xlu1 %v2596_v2  ;;  %v2586_v33 = vpop.xlane.xlu1 %2585  ;;  %vm2728_vm4 = vcmask 277504  }
0x1cbf   :  { %6098 = vrsqrt.f32 %v2846_v60  ;;  %v2605_v30 = vadd.f32 1e-05, %v2600_v63  ;;  %v2599_v27 = vmul.f32 0.03125, %v2586_v33 }
0x1cc1   :  { %6100 = vrsqrt.f32 %v2605_v30  ;;  %v2604_v4 = vadd.f32 1e-05, %v2599_v27 }
0x1cc3   :  { %v6095_v6 = vpop.eup %6094  ;;  %6102 = vrsqrt.f32 %v2604_v4 }
0x1cc4   :  { %v2851_v3 = vmul.f32 %v6095_v6, %v7039_v59 }
0x1cc6   :  { %v2861_v31 = vmul.f32 %v5135_v41, %v2851_v3 }
0x1cc7   :  { %v6097_v25 = vpop.eup %6096 }
0x1cc8   :  { %v2853_v0 = vmul.f32 %v6097_v25, %v7046_v7  ;;  %v2871_v39 = vadd.f32 %v5136_v1, %v2861_v31  ;;  %v5127_v7 = vld [vmem:[%s7606_s15] ss:$0 sm:$0xff] }
0x1cc9   :  { %v6099_v47 = vpop.eup %6098 }
0x1cca   :  { %v2852_v32 = vmul.f32 %v6099_v47, %v7050_v8  ;;  %v2863_v36 = vmul.f32 %v5135_v41, %v2853_v0 }
0x1ccb   :  { %v6101_v26 = vpop.eup %6100 }
0x1ccc   :  { %v2615_v15 = vmul.f32 %v6101_v26, %v7056_v20  ;;  %v2862_v24 = vmul.f32 %v5135_v41, %v2852_v32  ;;  %v2873_v19 = vadd.f32 %v5136_v1, %v2863_v36  ;;  %v6265_v20 = vmov 0.0|0.0  }
0x1ccd   :  { %v6103_v35 = vpop.eup %6102  ;;  %5821 = vmatprep.subr.bf16.mxu0 %v6265_v20 }
0x1cce   :  { %v2627_v22 = vmul.f32 %v5126_v14, %v2615_v15  ;;  %v2614_v59 = vmul.f32 %v6103_v35, %v7061_v37  ;;  %v2872_v9 = vadd.f32 %v5136_v1, %v2862_v24  ;;  %v2879_v11 = vpack.c.bf16 %v2873_v19, %v2873_v19 }
0x1cd0   :  { %v2626_v10 = vmul.f32 %v5126_v14, %v2614_v59  ;;  %v2878_v13 = vpack.c.bf16 %v2872_v9, %v2871_v39  ;;  %v2639_v8 = vadd.f32 %v5127_v7, %v2627_v22  ;;  %v2727_v22 = vld [vmem:[%s7608_s18] sm:$0x1] }
0x1cd2   :  { %v2638_v40 = vadd.f32 %v5127_v7, %v2626_v10  ;;  %5615 = vmatprep.mubr.msk.bf16.mxu1 %vm348_vm3, %v2878_v13 }
0x1cd3   :  { %5616 = vmatmul.mubr.msk.bf16.vlgmr.msra.gmra.mrb[76].mxu1 %vm348_vm3, %v2879_v11 }
0x1cd4   :  { %v2647_v12 = vpack.c.bf16 %v2639_v8, %v2638_v40  ;;  %5627 = vmatprep.mubr.msk.bf16.mxu1 %vm6250_vm5, %v6249_v5 }
0x1cd6   :  { %5587 = vmatmul.mubr.msk.bf16.vlgmr.msra.gmra.mrb[44].mxu0 %vm348_vm3, %v2647_v12 }
0x1cd7   :  { %5590 = vmatprep.mubr.msk.bf16.mxu0 %vm6250_vm5, %v6249_v5 }
0x1d43   :  { %v2592_v37 = vpop.xlane.xlu1 %2591 }
0x1d44   :  { %v2601_v44 = vmul.f32 0.03125, %v2592_v37 }
0x1d45   :  { %v2595_v16 = vpop.xlane.xlu0 %2594 }
0x1d46   :  { %v2606_v17 = vadd.f32 1e-05, %v2601_v44  ;;  %v2602_v18 = vmul.f32 0.03125, %v2595_v16 }
0x1d48   :  { %6104 = vrsqrt.f32 %v2606_v17  ;;  %v2607_v21 = vadd.f32 1e-05, %v2602_v18 }
0x1d4a   :  { %6106 = vrsqrt.f32 %v2607_v21 }
0x1d4b   :  { %v2598_v23 = vpop.xlane.xlu1 %2597 }
0x1d4c   :  { %v2603_v29 = vmul.f32 0.03125, %v2598_v23 }
0x1d4e   :  { %v2608_v38 = vadd.f32 1e-05, %v2603_v29 }
0x1d50   :  { %6108 = vrsqrt.f32 %v2608_v38 }
0x1d52   :  { %v6105_v42 = vpop.eup %6104 }
0x1d53   :  { %v2616_v43 = vmul.f32 %v6105_v42, %v7078_v57 }
0x1d54   :  { %v6107_v45 = vpop.eup %6106 }
0x1d55   :  { %v2617_v46 = vmul.f32 %v6107_v45, %v7080_v28  ;;  %v2628_v48 = vmul.f32 %v5126_v14, %v2616_v43  ;;  %v5137_v28 = vld [vmem:[%s7607_s16] ss:$0 sm:$0xff] }
0x1d57   :  { %v2629_v49 = vmul.f32 %v5126_v14, %v2617_v46  ;;  %v2640_v50 = vadd.f32 %v5127_v7, %v2628_v48 }
0x1d59   :  { %v2641_v51 = vadd.f32 %v5127_v7, %v2629_v49 }
0x1d5a   :  { %v6109_v52 = vpop.eup %6108 }
0x1d5b   :  { %v2648_v53 = vpack.c.bf16 %v2641_v51, %v2640_v50  ;;  %v2618_v55 = vmul.f32 %v6109_v52, %v7088_v54 }
0x1d5d   :  { %5591 = vmatmul.mubr.msk.bf16.gmra.mrb[48].mxu0 %vm348_vm3, %v2648_v53  ;;  %v2630_v56 = vmul.f32 %v5126_v14, %v2618_v55 }
0x1d5e   :  { %5594 = vmatprep.mubr.msk.bf16.mxu0 %vm6250_vm5, %v6249_v5 }
0x1d5f   :  { %v2642_v58 = vadd.f32 %v5127_v7, %v2630_v56 }
0x1d61   :  { %v2649_v57 = vpack.c.bf16 %v2642_v58, %v2642_v58 }
0x1d65   :  { %5595 = vmatmul.mubr.msk.bf16.gmra.mrb[52].mxu0 %vm348_vm3, %v2649_v57 }
0x1d66   :  { %5608 = vmatprep.mubr.msk.f32.mxu0 %vm6250_vm5, %v6249_v5 }
0x1da6   :  { %v5617_v61 = vpop.f32.mrb[76].mxu1 }
0x1da7   :  { %v2939_v62 = vpop.f32.mrb[77].mxu1  ;;  %v2948_v25 = vadd.f32 %v5617_v61, %v5137_v28  ;;  %v2806_v61 = vlaneseq }
0x1da8   :  { %v2940_v34 = vadd.f32 %v5137_v28, %v2939_v62  ;;  %v5618_v60 = vpop.f32.mrb[78].mxu1 }
0x1da9   :  { %v2705_v63 = vpop.f32.mrb[44].mxu0  ;;  %v2942_v54 = vpop.f32.mrb[79].mxu1  ;;  %v7149_v41 = vpack.c.bf16 %v2948_v25, %v2948_v25  ;;  %v2807_v62 = vshrl.u32 %v2806_v61, 7 }
0x1daa   :  { %v7120_v2 = vpack.c.bf16 %v2940_v34, %v2940_v34  ;;  %v5588_v33 = vpop.f32.mrb[45].mxu0  ;;  %v2943_v6 = vadd.f32 %v5137_v28, %v2942_v54  ;;  %v2809_v34 = vand.u32 127, %v2806_v61 }
0x1dab   :  { %v2708_v30 = vpop.f32.mrb[46].mxu0 }
0x1dac   :  { %v5822_v27 = vpack.c.bf16 %v2708_v30, %v2705_v63  ;;  %3069 = vrot.lane.b32.xlu1 %v7120_v2, %s6254_s13  ;;  %2955 = vrot.lane.b32.xlu0 %v7120_v2, %s6251_s0  ;;  %v5589_v4 = vpop.f32.mrb[47].mxu0  ;;  %v7135_v3 = vpack.c.bf16 %v2943_v6, %v2943_v6  ;;  %vm2810_vm8 = vcmp.gt.s32.totalorder %v2809_v34, %v2807_v62 }
0x1dad   :  { %v7250_v60 = vsel %vm2810_vm8, -1e+30, %v6249_v5 }
0x1dae   :  { %5823 = vmatpush3.bf16.msra.mxu0 %v5822_v27 }
0x1daf   :  { %5824 = vmatprep.subr.bf16.mxu0 %v6265_v20 }
0x1db0   :  { %3067 = vrot.lane.b32.xlu1 %v7120_v2, %s6253_s9  ;;  %3184 = vrot.lane.b32.xlu0 %v7120_v2, %s6257_s25 }
0x1db4   :  { %3186 = vrot.lane.b32.xlu1 %v7120_v2, %s6256_s21  ;;  %3301 = vrot.lane.b32.xlu0 %v7120_v2, %s6260_s8 }
0x1db8   :  { %3303 = vrot.lane.b32.xlu1 %v7120_v2, %s6259_s3  ;;  %3533 = vrot.lane.b32.xlu0 %v7135_v3, %s6254_s13 }
0x1dbc   :  { %3420 = vrot.lane.b32.xlu1 %v7135_v3, %s6251_s0  ;;  %3650 = vrot.lane.b32.xlu0 %v7135_v3, %s6256_s21 }
0x1dc0   :  { %3531 = vrot.lane.b32.xlu1 %v7135_v3, %s6253_s9  ;;  %3767 = vrot.lane.b32.xlu0 %v7135_v3, %s6259_s3 }
0x1dc4   :  { %3648 = vrot.lane.b32.xlu1 %v7135_v3, %s6257_s25  ;;  %3884 = vrot.lane.b32.xlu0 %v7149_v41, %s6251_s0  ;;  %s7609_s0 = sld [smem:[#allocation21_spill]] }
0x1dc8   :  { %3765 = vrot.lane.b32.xlu1 %v7135_v3, %s6260_s8  ;;  %3995 = vrot.lane.b32.xlu0 %v7149_v41, %s6253_s9  ;;  %s7611_s9 = sld [smem:[#allocation25_spill]] }
0x1dcc   :  { %3997 = vrot.lane.b32.xlu1 %v7149_v41, %s6254_s13  ;;  %4112 = vrot.lane.b32.xlu0 %v7149_v41, %s6257_s25  ;;  %s7612_s13 = sld [smem:[#allocation23_spill]]  ;;  %s7615_s25 = sld [smem:[#allocation26_spill]] }
0x1dd0   :  { %4114 = vrot.lane.b32.xlu1 %v7149_v41, %s6256_s21  ;;  %4229 = vrot.lane.b32.xlu0 %v7149_v41, %s6260_s8  ;;  %s7614_s21 = sld [smem:[#allocation27_spill]] }
0x1dd4   :  { %4231 = vrot.lane.b32.xlu1 %v7149_v41, %s6259_s3  ;;  %3131 = vrot.lane.b32.xlu0 %v7120_v2, %s6255_s17  ;;  %s7617_s3 = sld [smem:[#allocation29_spill]] }
0x1dd8   :  { %3017 = vrot.lane.b32.xlu1 %v7120_v2, %s6252_s5  ;;  %3248 = vrot.lane.b32.xlu0 %v7120_v2, %s6258_s29 }
0x1ddc   :  { %3365 = vrot.lane.b32.xlu1 %v7120_v2, %s6261_s14 }
0x1e1e   :  { %v3070_v0 = vpop.permute.xlu1 %3069  ;;  %v2956_v13 = vpop.permute.xlu0 %2955 }
0x1e1f   :  { %v2961_v11 = vsel %vm640_vm6, %v2956_v13, 0  ;;  %v3075_v12 = vsel %vm640_vm6, %v3070_v0, 0 }
0x1e22   :  { %v3068_v47 = vpop.permute.xlu1 %3067  ;;  %v3185_v18 = vpop.permute.xlu0 %3184 }
0x1e26   :  { %v3187_v32 = vpop.permute.xlu1 %3186  ;;  %v3302_v23 = vpop.permute.xlu0 %3301 }
0x1e27   :  { %v3192_v17 = vsel %vm640_vm6, %v3187_v32, 0 }
0x1e2a   :  { %v3304_v31 = vpop.permute.xlu1 %3303  ;;  %v3534_v38 = vpop.permute.xlu0 %3533 }
0x1e2b   :  { %v3309_v21 = vsel %vm640_vm6, %v3304_v31, 0  ;;  %v3539_v42 = vsel %vm640_vm6, %v3534_v38, 0 }
0x1e2e   :  { %v3421_v36 = vpop.permute.xlu1 %3420  ;;  %v3651_v43 = vpop.permute.xlu0 %3650 }
0x1e2f   :  { %v3426_v29 = vsel %vm640_vm6, %v3421_v36, 0  ;;  %v3656_v45 = vsel %vm640_vm6, %v3651_v43, 0 }
0x1e30   :  { %v2713_v26 = vpop.f32.mrb[48].mxu0 }
0x1e31   :  { %v5592_v14 = vpop.f32.mrb[49].mxu0 }
0x1e32   :  { %v2716_v1 = vpop.f32.mrb[50].mxu0  ;;  %v3532_v24 = vpop.permute.xlu1 %3531 }
0x1e33   :  { %v5825_v15 = vpack.c.bf16 %v2716_v1, %v2713_v26  ;;  %v5593_v35 = vpop.f32.mrb[51].mxu0  ;;  %v3768_v46 = vpop.permute.xlu0 %3767 }
0x1e34   :  { %v3773_v48 = vsel %vm640_vm6, %v3768_v46, 0 }
0x1e35   :  { %5826 = vmatpush3.bf16.msra.mxu0 %v5825_v15 }
0x1e36   :  { %5606 = vmatprep.subr.mxu0 %v6249_v5  ;;  %v3649_v19 = vpop.permute.xlu1 %3648 }
0x1e37   :  { %v3885_v49 = vpop.permute.xlu0 %3884 }
0x1e38   :  { %v2721_v59 = vpop.f32.mrb[52].mxu0  ;;  %v3890_v50 = vsel %vm640_vm6, %v3885_v49, 0 }
0x1e39   :  { %v5596_v39 = vpop.f32.mrb[53].mxu0  ;;  %5607 = vmatpush3.msk.msra.mxu0 %vm2732_vm2, %v2721_v59 }
0x1e3a   :  { %v2724_v9 = vpop.f32.mrb[54].mxu0  ;;  %5609 = vmatmul.mubr.msk.f32.vlgmr.msra.gmra.mrb[56].mxu0 %vm2728_vm4, %v2727_v22  ;;  %5619 = vmatprep.subr.bf16.mxu0 %v6249_v5  ;;  %v3766_v7 = vpop.permute.xlu1 %3765 }
0x1e3b   :  { %v5597_v10 = vpop.f32.mrb[55].mxu0  ;;  %5621 = vmatprep.mubr.msk.bf16.mxu0 %vm6250_vm5, %v6249_v5  ;;  %v3996_v52 = vpop.permute.xlu0 %3995 }
0x1e3e   :  { %v3998_v8 = vpop.permute.xlu1 %3997 }
0x1e3f   :  { %v4003_v51 = vsel %vm640_vm6, %v3998_v8, 0  ;;  %v4113_v55 = vpop.permute.xlu0 %4112 }
0x1e40   :  { %5620 = vmatpush3.bf16.xpose.msra.mxu0 %v2961_v11 }
0x1e41   :  { %5631 = vmatprep.subr.bf16.mxu0 %v6249_v5 }
0x1e42   :  { %v4115_v40 = vpop.permute.xlu1 %4114 }
0x1e43   :  { %v4120_v53 = vsel %vm640_vm6, %v4115_v40, 0  ;;  %v4230_v58 = vpop.permute.xlu0 %4229 }
0x1e46   :  { %v7185_v37 = vpop.permute.xlu1 %4231 }
0x1e47   :  { %5622 = vmatmul.mubr.msk.bf16.vlgmr.msra.gmra.mrb[60].mxu0 %vm640_vm6, %v7120_v2  ;;  %v4237_v56 = vsel %vm640_vm6, %v7185_v37, 0 }
0x1e48   :  { %5632 = vmatpush3.bf16.xpose.msra.mxu0 %v3075_v12  ;;  %5633 = vmatprep.mubr.msk.bf16.mxu0 %vm6250_vm5, %v6249_v5 }
0x1e49   :  { %5643 = vmatprep.subr.bf16.mxu0 %v6249_v5 }
0x1e4a   :  { %v3018_v44 = vpop.permute.xlu1 %3017 }
0x1e4b   :  { %v3024_v16 = vsel %vm3022_vm7, %v3018_v44, 0 }
0x1e4c   :  { %5626 = vmatpush3.bf16.msra.mxu1 %v3024_v16 }
0x1e4d   :  { %5637 = vmatprep.subr.bf16.mxu1 %v6249_v5 }
0x1e4f   :  { %5634 = vmatmul.mubr.msk.bf16.vlgmr.msra.gmra.mrb[64].mxu0 %vm640_vm6, %v3068_v47 }
0x1e50   :  { %5644 = vmatpush3.bf16.xpose.msra.mxu0 %v3192_v17  ;;  %5645 = vmatprep.mubr.msk.bf16.mxu0 %vm6250_vm5, %v6249_v5 }
0x1e51   :  { %5655 = vmatprep.subr.bf16.mxu0 %v6249_v5 }
0x1e57   :  { %5646 = vmatmul.mubr.msk.bf16.vlgmr.msra.gmra.mrb[68].mxu0 %vm640_vm6, %v3185_v18 }
0x1e58   :  { %5656 = vmatpush3.bf16.xpose.msra.mxu0 %v3309_v21  ;;  %5657 = vmatprep.mubr.msk.bf16.mxu0 %vm6250_vm5, %v6249_v5 }
0x1e59   :  { %5667 = vmatprep.subr.bf16.mxu0 %v6249_v5 }
0x1e5f   :  { %5658 = vmatmul.mubr.msk.bf16.vlgmr.msra.gmra.mrb[72].mxu0 %vm640_vm6, %v3302_v23 }
0x1e60   :  { %5668 = vmatpush3.bf16.xpose.msra.mxu0 %v3426_v29  ;;  %5669 = vmatprep.mubr.msk.bf16.mxu0 %vm6250_vm5, %v6249_v5 }
0x1e61   :  { %5679 = vmatprep.subr.bf16.mxu0 %v6249_v5 }
0x1e67   :  { %5670 = vmatmul.mubr.msk.bf16.vlgmr.msra.gmra.mrb[76].mxu0 %vm640_vm6, %v7135_v3 }
0x1e68   :  { %5680 = vmatpush3.bf16.xpose.msra.mxu0 %v3539_v42  ;;  %5681 = vmatprep.mubr.msk.bf16.mxu0 %vm6250_vm5, %v6249_v5 }
0x1e69   :  { %5691 = vmatprep.subr.bf16.mxu0 %v6249_v5 }
0x1e6f   :  { %5682 = vmatmul.mubr.msk.bf16.vlgmr.msra.gmra.mrb[80].mxu0 %vm640_vm6, %v3532_v24 }
0x1e70   :  { %5692 = vmatpush3.bf16.xpose.msra.mxu0 %v3656_v45  ;;  %5693 = vmatprep.mubr.msk.bf16.mxu0 %vm6250_vm5, %v6249_v5 }
0x1e71   :  { %5703 = vmatprep.subr.bf16.mxu0 %v6249_v5 }
0x1e77   :  { %5694 = vmatmul.mubr.msk.bf16.vlgmr.msra.gmra.mrb[84].mxu0 %vm640_vm6, %v3649_v19 }
0x1e78   :  { %5704 = vmatpush3.bf16.xpose.msra.mxu0 %v3773_v48  ;;  %5705 = vmatprep.mubr.msk.bf16.mxu0 %vm6250_vm5, %v6249_v5 }
0x1e79   :  { %5715 = vmatprep.subr.bf16.mxu0 %v6249_v5 }
0x1e7f   :  { %5706 = vmatmul.mubr.msk.bf16.vlgmr.msra.gmra.mrb[88].mxu0 %vm640_vm6, %v3766_v7 }
0x1e80   :  { %5716 = vmatpush3.bf16.xpose.msra.mxu0 %v3890_v50  ;;  %5717 = vmatprep.mubr.msk.bf16.mxu0 %vm6250_vm5, %v6249_v5 }
0x1e81   :  { %5727 = vmatprep.subr.bf16.mxu0 %v6249_v5 }
0x1e87   :  { %5718 = vmatmul.mubr.msk.bf16.vlgmr.msra.gmra.mrb[92].mxu0 %vm640_vm6, %v7149_v41 }
0x1e88   :  { %5728 = vmatpush3.bf16.xpose.msra.mxu0 %v4003_v51  ;;  %5729 = vmatprep.mubr.msk.bf16.mxu0 %vm6250_vm5, %v6249_v5 }
0x1e89   :  { %5739 = vmatprep.subr.bf16.mxu0 %v6249_v5 }
0x1e8f   :  { %5730 = vmatmul.mubr.msk.bf16.vlgmr.msra.gmra.mrb[96].mxu0 %vm640_vm6, %v3996_v52 }
0x1e90   :  { %5740 = vmatpush3.bf16.xpose.msra.mxu0 %v4120_v53  ;;  %5741 = vmatprep.mubr.msk.bf16.mxu0 %vm6250_vm5, %v6249_v5 }
0x1e91   :  { %5751 = vmatprep.subr.bf16.mxu0 %v6249_v5 }
0x1e97   :  { %5742 = vmatmul.mubr.msk.bf16.vlgmr.msra.gmra.mrb[100].mxu0 %vm640_vm6, %v4113_v55 }
0x1e98   :  { %5752 = vmatpush3.bf16.xpose.msra.mxu0 %v4237_v56  ;;  %5753 = vmatprep.mubr.msk.bf16.mxu0 %vm6250_vm5, %v6249_v5 }
0x1e9f   :  { %5754 = vmatmul.mubr.msk.bf16.vlgmr.msra.gmra.mrb[104].mxu0 %vm640_vm6, %v4230_v58 }
0x1f0d   :  { %v7247_v57 = vpop.f32.mrb[56].mxu0 }
0x1f0e   :  { %v5610_v28 = vpop.f32.mrb[57].mxu0 }
0x1f1a   :  { %v2997_v63 = vpop.f32.mrb[60].mxu0 }
0x1f1b   :  { %v3003_v54 = vmul.f32 0.35355338, %v2997_v63  ;;  %v5623_v2 = vpop.f32.mrb[61].mxu0 }
0x1f1c   :  { %v3000_v33 = vpop.f32.mrb[62].mxu0 }
0x1f1d   :  { %v7253_v30 = vadd.f32 %v3003_v54, %v7250_v60  ;;  %v5624_v27 = vpop.f32.mrb[63].mxu0 }
0x1f1f   :  { %v3005_v4 = vsel %vm640_vm6, %v7253_v30, -inf }
0x1f20   :  { %3006 = vmax.xlane.f32.xlu1 %v3005_v4 }
0x1f22   :  { %v3111_v6 = vpop.f32.mrb[64].mxu0 }
0x1f23   :  { %v3117_v25 = vmul.f32 0.35355338, %v3111_v6  ;;  %v5635_v0 = vpop.f32.mrb[65].mxu0 }
0x1f24   :  { %v3114_v47 = vpop.f32.mrb[66].mxu0 }
0x1f25   :  { %v7258_v32 = vadd.f32 %v3117_v25, %v7250_v60  ;;  %v5636_v31 = vpop.f32.mrb[67].mxu0 }
0x1f27   :  { %v3119_v36 = vsel %vm640_vm6, %v7258_v32, -inf }
0x1f28   :  { %3120 = vmax.xlane.f32.xlu0 %v3119_v36 }
0x1f2a   :  { %v3228_v26 = vpop.f32.mrb[68].mxu0 }
0x1f2b   :  { %v5647_v14 = vpop.f32.mrb[69].mxu0  ;;  %v3234_v43 = vmul.f32 0.35355338, %v3228_v26 }
0x1f2c   :  { %v3231_v1 = vpop.f32.mrb[70].mxu0 }
0x1f2d   :  { %v5648_v15 = vpop.f32.mrb[71].mxu0  ;;  %v7275_v48 = vadd.f32 %v3234_v43, %v7250_v60 }
0x1f2f   :  { %v3236_v58 = vsel %vm640_vm6, %v7275_v48, -inf }
0x1f32   :  { %v3345_v24 = vpop.f32.mrb[72].mxu0 }
0x1f33   :  { %v5659_v35 = vpop.f32.mrb[73].mxu0  ;;  %v3351_v49 = vmul.f32 0.35355338, %v3345_v24 }
0x1f34   :  { %v3348_v19 = vpop.f32.mrb[74].mxu0 }
0x1f35   :  { %v5660_v22 = vpop.f32.mrb[75].mxu0  ;;  %v7278_v53 = vadd.f32 %v3351_v49, %v7250_v60 }
0x1f37   :  { %v3353_v54 = vsel %vm640_vm6, %v7278_v53, -inf }
0x1f3a   :  { %v3462_v59 = vpop.f32.mrb[76].mxu0 }
0x1f3b   :  { %v3468_v39 = vmul.f32 0.35355338, %v3462_v59  ;;  %v5671_v9 = vpop.f32.mrb[77].mxu0 }
0x1f3c   :  { %v3465_v7 = vpop.f32.mrb[78].mxu0 }
0x1f3d   :  { %v7263_v10 = vadd.f32 %v3468_v39, %v7250_v60  ;;  %v5672_v13 = vpop.f32.mrb[79].mxu0 }
0x1f3e   :  { %3482 = vrot.lane.b32.xlu0 %v7135_v3, %s6252_s5 }
0x1f3f   :  { %v3470_v11 = vsel %vm640_vm6, %v7263_v10, -inf }
0x1f40   :  { %3471 = vmax.xlane.f32.xlu1 %v3470_v11 }
0x1f42   :  { %v3575_v8 = vpop.f32.mrb[80].mxu0 }
0x1f43   :  { %v5683_v40 = vpop.f32.mrb[81].mxu0  ;;  %v3581_v55 = vmul.f32 0.35355338, %v3575_v8  ;;  %v7318_v8 = vpop.permute.xlu1 %3365 }
0x1f44   :  { %v3578_v12 = vpop.f32.mrb[82].mxu0  ;;  %v7320_v40 = vpop.permute.xlu0 %3131 }
0x1f45   :  { %v5684_v37 = vpop.f32.mrb[83].mxu0  ;;  %v7288_v34 = vadd.f32 %v3581_v55, %v7250_v60 }
0x1f47   :  { %v3583_v25 = vsel %vm640_vm6, %v7288_v34, -inf }
0x1f4a   :  { %v3692_v44 = vpop.f32.mrb[84].mxu0 }
0x1f4b   :  { %v3698_v16 = vmul.f32 0.35355338, %v3692_v44  ;;  %v5695_v17 = vpop.f32.mrb[85].mxu0 }
0x1f4c   :  { %v3695_v18 = vpop.f32.mrb[86].mxu0 }
0x1f4d   :  { %v7270_v21 = vadd.f32 %v3698_v16, %v7250_v60  ;;  %v5696_v23 = vpop.f32.mrb[87].mxu0  ;;  %v7323_v16 = vpop.permute.xlu0 %3248 }
0x1f4f   :  { %v3700_v29 = vsel %vm640_vm6, %v7270_v21, -inf }
0x1f50   :  { %3701 = vmax.xlane.f32.xlu1 %v3700_v29 }
0x1f52   :  { %v3809_v38 = vpop.f32.mrb[88].mxu0 }
0x1f53   :  { %v5707_v42 = vpop.f32.mrb[89].mxu0  ;;  %v3815_v63 = vmul.f32 0.35355338, %v3809_v38 }
0x1f54   :  { %v3812_v45 = vpop.f32.mrb[90].mxu0 }
0x1f55   :  { %v5708_v46 = vpop.f32.mrb[91].mxu0  ;;  %v7293_v27 = vadd.f32 %v3815_v63, %v7250_v60 }
0x1f57   :  { %v3817_v31 = vsel %vm640_vm6, %v7293_v27, -inf }
0x1f5a   :  { %v3926_v50 = vpop.f32.mrb[92].mxu0 }
0x1f5b   :  { %v3932_v51 = vmul.f32 0.35355338, %v3926_v50  ;;  %v5719_v52 = vpop.f32.mrb[93].mxu0 }
0x1f5c   :  { %v3929_v56 = vpop.f32.mrb[94].mxu0 }
0x1f5d   :  { %v7283_v28 = vadd.f32 %v3932_v51, %v7250_v60  ;;  %3237 = vmax.xlane.f32.xlu0 %v3236_v58  ;;  %v5720_v61 = vpop.f32.mrb[95].mxu0 }
0x1f5f   :  { %v3934_v62 = vsel %vm640_vm6, %v7283_v28, -inf }
0x1f60   :  { %3935 = vmax.xlane.f32.xlu1 %v3934_v62 }
0x1f61   :  { %3354 = vmax.xlane.f32.xlu0 %v3353_v54 }
0x1f62   :  { %v4039_v2 = vpop.f32.mrb[96].mxu0 }
0x1f63   :  { %v5731_v33 = vpop.f32.mrb[97].mxu0  ;;  %v4045_v4 = vmul.f32 0.35355338, %v4039_v2 }
0x1f64   :  { %v4042_v6 = vpop.f32.mrb[98].mxu0 }
0x1f65   :  { %3584 = vmax.xlane.f32.xlu0 %v3583_v25  ;;  %v5732_v0 = vpop.f32.mrb[99].mxu0  ;;  %v7298_v47 = vadd.f32 %v4045_v4, %v7250_v60 }
0x1f67   :  { %v4047_v1 = vsel %vm640_vm6, %v7298_v47, -inf }
0x1f69   :  { %3818 = vmax.xlane.f32.xlu0 %v3817_v31 }
0x1f6a   :  { %v4156_v36 = vpop.f32.mrb[100].mxu0 }
0x1f6b   :  { %v5743_v26 = vpop.f32.mrb[101].mxu0  ;;  %v4162_v59 = vmul.f32 0.35355338, %v4156_v36 }
0x1f6c   :  { %v4159_v14 = vpop.f32.mrb[102].mxu0 }
0x1f6d   :  { %4048 = vmax.xlane.f32.xlu0 %v4047_v1  ;;  %v5744_v15 = vpop.f32.mrb[103].mxu0  ;;  %v7309_v39 = vadd.f32 %v4162_v59, %v7250_v60 }
0x1f6f   :  { %v4164_v13 = vsel %vm640_vm6, %v7309_v39, -inf }
0x1f71   :  { %3712 = vrot.lane.b32.xlu1 %v7135_v3, %s6258_s29 }
0x1f72   :  { %v4273_v24 = vpop.f32.mrb[104].mxu0 }
0x1f73   :  { %v5755_v35 = vpop.f32.mrb[105].mxu0  ;;  %v4279_v9 = vmul.f32 0.35355338, %v4273_v24 }
0x1f74   :  { %v4276_v19 = vpop.f32.mrb[106].mxu0 }
0x1f75   :  { %v5756_v22 = vpop.f32.mrb[107].mxu0  ;;  %v7312_v7 = vadd.f32 %v4279_v9, %v7250_v60 }
0x1f77   :  { %v4281_v11 = vsel %vm640_vm6, %v7312_v7, -inf }
0x1f83   :  { %3595 = vrot.lane.b32.xlu0 %v7135_v3, %s6255_s17 }
0x1f95   :  { %4165 = vmax.xlane.f32.xlu1 %v4164_v13 }
0x1f99   :  { %4282 = vmax.xlane.f32.xlu1 %v4281_v11 }
0x1fad   :  { %v3007_v12 = vpop.xlane.xlu1 %3006 }
0x1fae   :  { %v3008_v37 = vsub.f32 %v7253_v30, %v3007_v12 }
0x1fb0   :  { %v3009_v44 = vmul.f32 1.442695, %v3008_v37 }
0x1fb2   :  { %6110 = vpow2.f32 %v3009_v44 }
0x1fb5   :  { %v3121_v60 = vpop.xlane.xlu0 %3120 }
0x1fb6   :  { %v3122_v17 = vsub.f32 %v7258_v32, %v3121_v60 }
0x1fb8   :  { %v3123_v18 = vmul.f32 1.442695, %v3122_v17 }
0x1fb9   :  { %v7334_v42 = vpop.permute.xlu0 %3482 }
0x1fba   :  { %6112 = vpow2.f32 %v3123_v18 }
0x1fbc   :  { %v7326_v23 = vpop.eup %6110 }
0x1fbd   :  { %v3011_v29 = vsel %vm640_vm6, %v7326_v23, 0.0 }
0x1fbe   :  { %3012 = vadd.xlane.f32.xlu0 %v3011_v29 }
0x1fc4   :  { %v7330_v38 = vpop.eup %6112 }
0x1fc5   :  { %v3125_v30 = vsel %vm640_vm6, %v7330_v38, 0.0 }
0x1fc6   :  { %3126 = vadd.xlane.f32.xlu0 %v3125_v30 }
0x1fcd   :  { %v3472_v43 = vpop.xlane.xlu1 %3471 }
0x1fce   :  { %v3473_v46 = vsub.f32 %v7263_v10, %v3472_v43 }
0x1fd0   :  { %v3474_v55 = vmul.f32 1.442695, %v3473_v46 }
0x1fdd   :  { %v3702_v50 = vpop.xlane.xlu1 %3701 }
0x1fde   :  { %v3703_v56 = vsub.f32 %v7270_v21, %v3702_v50 }
0x1fe0   :  { %v3704_v63 = vmul.f32 1.442695, %v3703_v56 }
0x1fea   :  { %v3238_v45 = vpop.xlane.xlu0 %3237 }
0x1feb   :  { %v3239_v32 = vsub.f32 %v7275_v48, %v3238_v45  ;;  %v3137_v45 = vsel %vm3022_vm7, %v7320_v40, 0 }
0x1fed   :  { %v3240_v49 = vmul.f32 1.442695, %v3239_v32  ;;  %v3936_v14 = vpop.xlane.xlu1 %3935 }
0x1fee   :  { %v3355_v51 = vpop.xlane.xlu0 %3354  ;;  %v3937_v15 = vsub.f32 %v7283_v28, %v3936_v14 }
0x1fef   :  { %6114 = vpow2.f32 %v3240_v49  ;;  %v3356_v52 = vsub.f32 %v7278_v53, %v3355_v51  ;;  %v3254_v49 = vsel %vm3022_vm7, %v7323_v16, 0 }
0x1ff0   :  { %v3938_v35 = vmul.f32 1.442695, %v3937_v15 }
0x1ff1   :  { %v3357_v58 = vmul.f32 1.442695, %v3356_v52  ;;  %v7368_v1 = vpop.permute.xlu1 %3712 }
0x1ff2   :  { %v3585_v61 = vpop.xlane.xlu0 %3584 }
0x1ff3   :  { %6116 = vpow2.f32 %v3357_v58  ;;  %v3586_v62 = vsub.f32 %v7288_v34, %v3585_v61  ;;  %v3371_v61 = vsel %vm3022_vm7, %v7318_v8, 0 }
0x1ff4   :  { %6118 = vpow2.f32 %v3474_v55 }
0x1ff5   :  { %v3587_v54 = vmul.f32 1.442695, %v3586_v62 }
0x1ff6   :  { %v3819_v48 = vpop.xlane.xlu0 %3818 }
0x1ff7   :  { %6120 = vpow2.f32 %v3587_v54  ;;  %v3820_v10 = vsub.f32 %v7293_v27, %v3819_v48  ;;  %v3488_v48 = vsel %vm3022_vm7, %v7334_v42, 0 }
0x1ff8   :  { %6122 = vpow2.f32 %v3704_v63 }
0x1ff9   :  { %v7342_v2 = vpop.eup %6114  ;;  %v3821_v33 = vmul.f32 1.442695, %v3820_v10 }
0x1ffa   :  { %v3242_v53 = vsel %vm640_vm6, %v7342_v2, 0.0  ;;  %v4049_v19 = vpop.xlane.xlu0 %4048 }
0x1ffb   :  { %3243 = vadd.xlane.f32.xlu1 %v3242_v53  ;;  %6124 = vpow2.f32 %v3821_v33  ;;  %v4050_v22 = vsub.f32 %v7298_v47, %v4049_v19 }
0x1ffc   :  { %6126 = vpow2.f32 %v3938_v35 }
0x1ffd   :  { %v7346_v21 = vpop.eup %6116  ;;  %v4051_v9 = vmul.f32 1.442695, %v4050_v22 }
0x1ffe   :  { %v3359_v34 = vsel %vm640_vm6, %v7346_v21, 0.0  ;;  %v7350_v4 = vpop.eup %6118 }
0x1fff   :  { %3360 = vadd.xlane.f32.xlu0 %v3359_v34  ;;  %v3476_v25 = vsel %vm640_vm6, %v7350_v4, 0.0  ;;  %6128 = vpow2.f32 %v4051_v9 }
0x2001   :  { %v7352_v6 = vpop.eup %6120 }
0x2002   :  { %v3589_v27 = vsel %vm640_vm6, %v7352_v6, 0.0  ;;  %v7358_v0 = vpop.eup %6122 }
0x2003   :  { %3590 = vadd.xlane.f32.xlu1 %v3589_v27  ;;  %3477 = vadd.xlane.f32.xlu0 %v3476_v25  ;;  %v3706_v31 = vsel %vm640_vm6, %v7358_v0, 0.0  ;;  %v3718_v27 = vsel %vm3022_vm7, %v7368_v1, 0 }
0x2005   :  { %v7362_v36 = vpop.eup %6124 }
0x2006   :  { %v3823_v26 = vsel %vm640_vm6, %v7362_v36, 0.0  ;;  %v7375_v12 = vpop.eup %6126 }
0x2007   :  { %3707 = vadd.xlane.f32.xlu0 %v3706_v31 }
0x2009   :  { %v7379_v28 = vpop.eup %6128 }
0x200a   :  { %v4053_v37 = vsel %vm640_vm6, %v7379_v28, 0.0 }
0x200b   :  { %3824 = vadd.xlane.f32.xlu0 %v3823_v26 }
0x2014   :  { %3946 = vrot.lane.b32.xlu1 %v7149_v41, %s6252_s5  ;;  %s7610_s5 = sld [smem:[#allocation22_spill]] }
0x2021   :  { %3829 = vrot.lane.b32.xlu0 %v7135_v3, %s6261_s14  ;;  %v3940_v3 = vsel %vm640_vm6, %v7375_v12, 0.0 }
0x2022   :  { %v4166_v24 = vpop.xlane.xlu1 %4165 }
0x2023   :  { %v4167_v29 = vsub.f32 %v7309_v39, %v4166_v24 }
0x2025   :  { %v4168_v32 = vmul.f32 1.442695, %v4167_v29 }
0x2026   :  { %v4283_v59 = vpop.xlane.xlu1 %4282 }
0x2027   :  { %v4284_v13 = vsub.f32 %v7312_v7, %v4283_v59  ;;  %v3596_v7 = vpop.permute.xlu0 %3595 }
0x2028   :  { %v3601_v53 = vsel %vm3022_vm7, %v3596_v7, 0 }
0x2029   :  { %v4285_v11 = vmul.f32 1.442695, %v4284_v13 }
0x202b   :  { %6130 = vpow2.f32 %v4285_v11 }
0x2035   :  { %v7383_v44 = vpop.eup %6130 }
0x2036   :  { %v4287_v47 = vsel %vm640_vm6, %v7383_v44, 0.0 }
0x2038   :  { %3941 = vadd.xlane.f32.xlu1 %v3940_v3 }
0x2040   :  { %4054 = vadd.xlane.f32.xlu0 %v4053_v37 }
0x2044   :  { %4288 = vadd.xlane.f32.xlu0 %v4287_v47 }
0x2049   :  { %4059 = vrot.lane.b32.xlu1 %v7149_v41, %s6255_s17  ;;  %s7613_s17 = sld [smem:[#allocation24_spill]] }
0x204b   :  { %v3013_v60 = vpop.xlane.xlu0 %3012 }
0x204c   :  { %6132 = vrcp.f32 %v3013_v60 }
0x2053   :  { %v3127_v17 = vpop.xlane.xlu0 %3126 }
0x2054   :  { %6134 = vrcp.f32 %v3127_v17 }
0x2055   :  { %6136 = vpow2.f32 %v4168_v32 }
0x2056   :  { %v6133_v18 = vpop.eup %6132 }
0x2057   :  { %v3015_v30 = vmul.f32 %v6133_v18, %v7326_v23 }
0x2059   :  { %v3016_v43 = vpack.c.bf16 %v3015_v30, %v3015_v30 }
0x205a   :  { %4176 = vrot.lane.b32.xlu0 %v7149_v41, %s6258_s29  ;;  %s7616_s29 = sld [smem:[#allocation28_spill]] }
0x205b   :  { %5628 = vmatmul.mubr.msk.bf16.vlgmr.msra.gmra.mrb[80].mxu1 %vm640_vm6, %v3016_v43 }
0x205c   :  { %5638 = vmatpush3.bf16.msra.mxu1 %v3137_v45  ;;  %5639 = vmatprep.mubr.msk.bf16.mxu1 %vm6250_vm5, %v6249_v5 }
0x205d   :  { %5649 = vmatprep.subr.bf16.mxu1 %v6249_v5 }
0x205e   :  { %v6135_v46 = vpop.eup %6134 }
0x205f   :  { %v3129_v39 = vmul.f32 %v6135_v46, %v7330_v38  ;;  %v7406_v40 = vpop.eup %6136 }
0x2060   :  { %v4170_v50 = vsel %vm640_vm6, %v7406_v40, 0.0 }
0x2061   :  { %v3130_v23 = vpack.c.bf16 %v3129_v39, %v3129_v39 }
0x2063   :  { %5640 = vmatmul.mubr.msk.bf16.vlgmr.msra.gmra.mrb[84].mxu1 %vm640_vm6, %v3130_v23 }
0x2064   :  { %5650 = vmatpush3.bf16.msra.mxu1 %v3254_v49  ;;  %5651 = vmatprep.mubr.msk.bf16.mxu1 %vm6250_vm5, %v6249_v5 }
0x2065   :  { %5661 = vmatprep.subr.bf16.mxu1 %v6249_v5 }
0x206d   :  { %4171 = vadd.xlane.f32.xlu1 %v4170_v50 }
0x207e   :  { %4293 = vrot.lane.b32.xlu1 %v7149_v41, %s6261_s14 }
0x2088   :  { %v3244_v38 = vpop.xlane.xlu1 %3243 }
0x2089   :  { %6138 = vrcp.f32 %v3244_v38 }
0x208c   :  { %v3361_v16 = vpop.xlane.xlu0 %3360 }
0x208d   :  { %6140 = vrcp.f32 %v3361_v16 }
0x2090   :  { %v3478_v51 = vpop.xlane.xlu0 %3477  ;;  %v3591_v62 = vpop.xlane.xlu1 %3590 }
0x2091   :  { %6142 = vrcp.f32 %v3478_v51 }
0x2092   :  { %6144 = vrcp.f32 %v3591_v62 }
0x2093   :  { %v6139_v52 = vpop.eup %6138 }
0x2094   :  { %v3246_v55 = vmul.f32 %v6139_v52, %v7342_v2  ;;  %v3708_v10 = vpop.xlane.xlu0 %3707  ;;  %v3947_v15 = vpop.permute.xlu1 %3946 }
0x2095   :  { %6146 = vrcp.f32 %v3708_v10 }
0x2096   :  { %v3247_v56 = vpack.c.bf16 %v3246_v55, %v3246_v55 }
0x2097   :  { %v6141_v58 = vpop.eup %6140 }
0x2098   :  { %5652 = vmatmul.mubr.msk.bf16.vlgmr.msra.gmra.mrb[88].mxu1 %vm640_vm6, %v3247_v56  ;;  %v3363_v41 = vmul.f32 %v6141_v58, %v7346_v21  ;;  %v3825_v21 = vpop.xlane.xlu0 %3824 }
0x2099   :  { %5662 = vmatpush3.bf16.msra.mxu1 %v3371_v61  ;;  %5663 = vmatprep.mubr.msk.bf16.mxu1 %vm6250_vm5, %v6249_v5  ;;  %6148 = vrcp.f32 %v3825_v21 }
0x209a   :  { %5673 = vmatprep.subr.bf16.mxu1 %v6249_v5  ;;  %v3364_v63 = vpack.c.bf16 %v3363_v41, %v3363_v41 }
0x209b   :  { %v6143_v54 = vpop.eup %6142 }
0x209c   :  { %v3480_v8 = vmul.f32 %v6143_v54, %v7350_v4  ;;  %v6145_v33 = vpop.eup %6144 }
0x209d   :  { %v3593_v42 = vmul.f32 %v6145_v33, %v7352_v6  ;;  %v3830_v6 = vpop.permute.xlu0 %3829 }
0x209e   :  { %v3481_v2 = vpack.c.bf16 %v3480_v8, %v3480_v8  ;;  %v3835_v14 = vsel %vm3022_vm7, %v3830_v6, 0 }
0x209f   :  { %v3594_v34 = vpack.c.bf16 %v3593_v42, %v3593_v42  ;;  %v6147_v4 = vpop.eup %6146 }
0x20a0   :  { %5664 = vmatmul.mubr.msk.bf16.vlgmr.msra.gmra.mrb[92].mxu1 %vm640_vm6, %v3364_v63  ;;  %v3710_v25 = vmul.f32 %v6147_v4, %v7358_v0  ;;  %v3952_v0 = vsel %vm3022_vm7, %v3947_v15, 0 }
0x20a1   :  { %5674 = vmatpush3.bf16.msra.mxu1 %v3488_v48  ;;  %5675 = vmatprep.mubr.msk.bf16.mxu1 %vm6250_vm5, %v6249_v5 }
0x20a2   :  { %5685 = vmatprep.subr.bf16.mxu1 %v6249_v5  ;;  %v3711_v31 = vpack.c.bf16 %v3710_v25, %v3710_v25 }
0x20a3   :  { %v6149_v26 = vpop.eup %6148 }
0x20a4   :  { %v3827_v1 = vmul.f32 %v6149_v26, %v7362_v36 }
0x20a6   :  { %v3828_v24 = vpack.c.bf16 %v3827_v1, %v3827_v1 }
0x20a8   :  { %5676 = vmatmul.mubr.msk.bf16.vlgmr.msra.gmra.mrb[96].mxu1 %vm640_vm6, %v3481_v2 }
0x20a9   :  { %5686 = vmatpush3.bf16.msra.mxu1 %v3601_v53  ;;  %5687 = vmatprep.mubr.msk.bf16.mxu1 %vm6250_vm5, %v6249_v5 }
0x20aa   :  { %5697 = vmatprep.subr.bf16.mxu1 %v6249_v5 }
0x20b0   :  { %5688 = vmatmul.mubr.msk.bf16.vlgmr.msra.gmra.mrb[100].mxu1 %vm640_vm6, %v3594_v34 }
0x20b1   :  { %5698 = vmatpush3.bf16.msra.mxu1 %v3718_v27  ;;  %5699 = vmatprep.mubr.msk.bf16.mxu1 %vm6250_vm5, %v6249_v5 }
0x20b2   :  { %5709 = vmatprep.subr.bf16.mxu1 %v6249_v5 }
0x20b8   :  { %5700 = vmatmul.mubr.msk.bf16.vlgmr.msra.gmra.mrb[104].mxu1 %vm640_vm6, %v3711_v31 }
0x20b9   :  { %5710 = vmatpush3.bf16.msra.mxu1 %v3835_v14  ;;  %5711 = vmatprep.mubr.msk.bf16.mxu1 %vm6250_vm5, %v6249_v5 }
0x20ba   :  { %5721 = vmatprep.subr.bf16.mxu1 %v6249_v5 }
0x20c0   :  { %5712 = vmatmul.mubr.msk.bf16.vlgmr.msra.gmra.mrb[108].mxu1 %vm640_vm6, %v3828_v24 }
0x20c1   :  { %5722 = vmatpush3.bf16.msra.mxu1 %v3952_v0  ;;  %5723 = vmatprep.mubr.msk.bf16.mxu1 %vm6250_vm5, %v6249_v5 }
0x20c2   :  { %5733 = vmatprep.subr.bf16.mxu1 %v6249_v5 }
0x20c5   :  { %v3942_v35 = vpop.xlane.xlu1 %3941 }
0x20c6   :  { %6150 = vrcp.f32 %v3942_v35 }
0x20c9   :  { %v4060_v59 = vpop.permute.xlu1 %4059 }
0x20ca   :  { %v4065_v11 = vsel %vm3022_vm7, %v4060_v59, 0 }
0x20cd   :  { %v4055_v19 = vpop.xlane.xlu0 %4054 }
0x20ce   :  { %6152 = vrcp.f32 %v4055_v19 }
0x20d0   :  { %v6151_v22 = vpop.eup %6150 }
0x20d1   :  { %v3944_v36 = vmul.f32 %v6151_v22, %v7375_v12  ;;  %v4289_v13 = vpop.xlane.xlu0 %4288  ;;  %v5934_v22 = vld [vmem:[%s7609_s0] sm:$0xff]  }
0x20d2   :  { %5763 = vmatprep.subr.bf16.mxu0 %v5934_v22 }
0x20d3   :  { %v3945_v9 = vpack.c.bf16 %v3944_v36, %v3944_v36  ;;  %v5935_v36 = vld [vmem:[%s7609_s0 + $0x8] sm:$0xff]   ;;  %5764 = vmatpush3.bf16.msra.mxu0 %v5934_v22 }
0x20d4   :  { %5765 = vmatprep.subr.bf16.mxu0 %v5935_v36 }
0x20d5   :  { %5724 = vmatmul.mubr.msk.bf16.vlgmr.msra.gmra.mrb[112].mxu1 %vm640_vm6, %v3945_v9  ;;  %v4177_v47 = vpop.permute.xlu0 %4176 }
0x20d6   :  { %5734 = vmatpush3.bf16.msra.mxu1 %v4065_v11  ;;  %5735 = vmatprep.mubr.msk.bf16.mxu1 %vm6250_vm5, %v6249_v5  ;;  %v4182_v12 = vsel %vm3022_vm7, %v4177_v47, 0 }
0x20d7   :  { %5745 = vmatprep.subr.bf16.mxu1 %v6249_v5  ;;  %5766 = vmatpush3.bf16.msra.mxu0 %v5935_v36 }
0x20d8   :  { %v6153_v3 = vpop.eup %6152 }
0x20d9   :  { %v4057_v37 = vmul.f32 %v6153_v3, %v7379_v28 }
0x20db   :  { %v4058_v7 = vpack.c.bf16 %v4057_v37, %v4057_v37 }
0x20dd   :  { %5736 = vmatmul.mubr.msk.bf16.vlgmr.msra.gmra.mrb[116].mxu1 %vm640_vm6, %v4058_v7 }
0x20de   :  { %5746 = vmatpush3.bf16.msra.mxu1 %v4182_v12  ;;  %5747 = vmatprep.mubr.msk.bf16.mxu1 %vm6250_vm5, %v6249_v5 }
0x20df   :  { %5757 = vmatprep.subr.bf16.mxu1 %v6249_v5 }
0x20fa   :  { %v4172_v60 = vpop.xlane.xlu1 %4171 }
0x20fb   :  { %6154 = vrcp.f32 %v4172_v60 }
0x20fc   :  { %6156 = vrcp.f32 %v4289_v13 }
0x20fe   :  { %v4294_v29 = vpop.permute.xlu1 %4293 }
0x20ff   :  { %v4299_v43 = vsel %vm3022_vm7, %v4294_v29, 0 }
0x2105   :  { %v6155_v17 = vpop.eup %6154 }
0x2106   :  { %v4174_v18 = vmul.f32 %v6155_v17, %v7406_v40  ;;  %v6157_v30 = vpop.eup %6156 }
0x2107   :  { %v4291_v45 = vmul.f32 %v6157_v30, %v7383_v44 }
0x2108   :  { %v4175_v28 = vpack.c.bf16 %v4174_v18, %v4174_v18 }
0x2109   :  { %v4292_v32 = vpack.c.bf16 %v4291_v45, %v4291_v45 }
0x210a   :  { %5748 = vmatmul.mubr.msk.bf16.vlgmr.msra.gmra.mrb[120].mxu1 %vm640_vm6, %v4175_v28 }
0x210b   :  { %5758 = vmatpush3.bf16.msra.mxu1 %v4299_v43  ;;  %5759 = vmatprep.mubr.msk.bf16.mxu1 %vm6250_vm5, %v6249_v5 }
0x2112   :  { %5760 = vmatmul.mubr.msk.bf16.vlgmr.msra.gmra.mrb[124].mxu1 %vm640_vm6, %v4292_v32 }
0x212e   :  { %v3060_v46 = vpop.f32.mrb[80].mxu1 }
0x212f   :  { %3066 = vst.msk [vmem:[#allocation4] sm:$0xff] %vm640_vm6, %v3060_v46  ;;  %v5629_v39 = vpop.f32.mrb[81].mxu1 }
0x2130   :  { %v3063_v23 = vpop.f32.mrb[82].mxu1 }
0x2131   :  { %v5630_v49 = vpop.f32.mrb[83].mxu1 }
0x2132   :  { %v5166_v49 = vld [vmem:[%s7610_s5] ss:$0 sm:$0xff] }
0x2136   :  { %v3173_v40 = vpop.f32.mrb[84].mxu1 }
0x2137   :  { %v5641_v50 = vpop.f32.mrb[85].mxu1  ;;  %3180 = vrot.lane.b32.xlu1 %v3173_v40, %s6262_s22 }
0x2138   :  { %v3176_v38 = vpop.f32.mrb[86].mxu1 }
0x2139   :  { %v5642_v16 = vpop.f32.mrb[87].mxu1 }
0x216b   :  { %v3290_v51 = vpop.f32.mrb[88].mxu1 }
0x216c   :  { %3297 = vrot.lane.b32.xlu1 %v3290_v51, %s6263_s23  ;;  %v5653_v52 = vpop.f32.mrb[89].mxu1 }
0x216d   :  { %v3293_v44 = vpop.f32.mrb[90].mxu1 }
0x216e   :  { %v5654_v55 = vpop.f32.mrb[91].mxu1  ;;  %v6182_v44 = vld [vmem:[%s7599_s12] sm:$0xff] }
0x2173   :  { %v3407_v56 = vpop.f32.mrb[92].mxu1 }
0x2174   :  { %3414 = vrot.lane.b32.xlu0 %v3407_v56, %s6264_s26  ;;  %v5665_v58 = vpop.f32.mrb[93].mxu1 }
0x2175   :  { %v3410_v61 = vpop.f32.mrb[94].mxu1  ;;  %v6183_v58 = vld [vmem:[%s7599_s12 + $0x10] sm:$0xff] }
0x2176   :  { %v5666_v41 = vpop.f32.mrb[95].mxu1 }
0x2177   :  { %v6184_v41 = vld [vmem:[%s7599_s12 + $0x8] sm:$0xff] }
0x217b   :  { %v3524_v62 = vpop.f32.mrb[96].mxu1 }
0x217c   :  { %3530 = vst.msk [vmem:[#allocation4 + $0x8] sm:$0xff] %vm640_vm6, %v3524_v62  ;;  %v5677_v63 = vpop.f32.mrb[97].mxu1 }
0x217d   :  { %v3527_v54 = vpop.f32.mrb[98].mxu1 }
0x217e   :  { %v5678_v48 = vpop.f32.mrb[99].mxu1 }
0x2183   :  { %v3637_v8 = vpop.f32.mrb[100].mxu1 }
0x2184   :  { %3644 = vrot.lane.b32.xlu1 %v3637_v8, %s6262_s22  ;;  %v5689_v10 = vpop.f32.mrb[101].mxu1 }
0x2185   :  { %v3640_v2 = vpop.f32.mrb[102].mxu1 }
0x2186   :  { %v5690_v33 = vpop.f32.mrb[103].mxu1 }
0x218b   :  { %v3754_v53 = vpop.f32.mrb[104].mxu1 }
0x218c   :  { %3761 = vrot.lane.b32.xlu1 %v3754_v53, %s6263_s23  ;;  %v5701_v42 = vpop.f32.mrb[105].mxu1 }
0x218d   :  { %v3757_v21 = vpop.f32.mrb[106].mxu1 }
0x218e   :  { %v5702_v34 = vpop.f32.mrb[107].mxu1 }
0x2193   :  { %v3871_v4 = vpop.f32.mrb[108].mxu1 }
0x2194   :  { %3878 = vrot.lane.b32.xlu1 %v3871_v4, %s6264_s26  ;;  %v5713_v27 = vpop.f32.mrb[109].mxu1 }
0x2195   :  { %v3874_v25 = vpop.f32.mrb[110].mxu1 }
0x2196   :  { %v5714_v6 = vpop.f32.mrb[111].mxu1 }
0x21a8   :  { %v3988_v31 = vpop.f32.mrb[112].mxu1 }
0x21a9   :  { %3994 = vst.msk [vmem:[#allocation4 + $0x10] sm:$0xff] %vm640_vm6, %v3988_v31  ;;  %v5725_v26 = vpop.f32.mrb[113].mxu1  ;;  %v3181_v14 = vpop.permute.xlu1 %3180  ;;  %vm4777_vm6 = vcmask 195584  }
0x21aa   :  { %3183 = vst.msk [vmem:[#allocation4] sm:$0xff] %vm990_vm12, %v3181_v14  ;;  %v3991_v1 = vpop.f32.mrb[114].mxu1 }
0x21ab   :  { %v5726_v15 = vpop.f32.mrb[115].mxu1  ;;  %v5936_v1 = vld [vmem:[%s7611_s9] sm:$0xff]  }
0x21ac   :  { %v5937_v15 = vld [vmem:[%s7611_s9 + $0x8] sm:$0xff]   ;;  %5771 = vmatprep.subr.bf16.mxu1 %v5936_v1 }
0x21ad   :  { %5772 = vmatpush3.bf16.msra.mxu1 %v5936_v1 }
0x21ae   :  { %5773 = vmatprep.subr.bf16.mxu1 %v5937_v15 }
0x21b0   :  { %v4101_v24 = vpop.f32.mrb[116].mxu1 }
0x21b1   :  { %4108 = vrot.lane.b32.xlu1 %v4101_v24, %s6262_s22  ;;  %v5737_v0 = vpop.f32.mrb[117].mxu1  ;;  %5774 = vmatpush3.bf16.msra.mxu1 %v5937_v15 }
0x21b2   :  { %v4104_v35 = vpop.f32.mrb[118].mxu1  ;;  %5827 = vmatprep.subr.bf16.mxu1 %v6265_v20 }
0x21b3   :  { %v5738_v19 = vpop.f32.mrb[119].mxu1 }
0x21dd   :  { %v4218_v59 = vpop.f32.mrb[120].mxu1 }
0x21de   :  { %4225 = vrot.lane.b32.xlu0 %v4218_v59, %s6263_s23  ;;  %v5749_v9 = vpop.f32.mrb[121].mxu1  ;;  %v3298_v13 = vpop.permute.xlu1 %3297 }
0x21df   :  { %3300 = vst.msk [vmem:[#allocation4] sm:$0xff] %vm1175_vm13, %v3298_v13  ;;  %v4221_v11 = vpop.f32.mrb[122].mxu1 }
0x21e0   :  { %v5750_v3 = vpop.f32.mrb[123].mxu1 }
0x21e5   :  { %v4335_v37 = vpop.f32.mrb[124].mxu1 }
0x21e6   :  { %v3415_v47 = vpop.permute.xlu0 %3414  ;;  %4342 = vrot.lane.b32.xlu1 %v4335_v37, %s6264_s26  ;;  %v5761_v7 = vpop.f32.mrb[125].mxu1  ;;  %v5171_v37 = vld [vmem:[%s7612_s13] ss:$0 sm:$0xff] }
0x21e7   :  { %3417 = vst.msk [vmem:[#allocation4] sm:$0xff] %vm1360_vm14, %v3415_v47  ;;  %v4338_v12 = vpop.f32.mrb[126].mxu1 }
0x21e8   :  { %v5762_v60 = vpop.f32.mrb[127].mxu1 }
0x21ee   :  { %v4346_v28 = vld [vmem:[#allocation4] sm:$0xff] }
0x21f6   :  { %v3645_v17 = vpop.permute.xlu1 %3644 }
0x21f7   :  { %3647 = vst.msk [vmem:[#allocation4 + $0x8] sm:$0xff] %vm990_vm12, %v3645_v17  ;;  %v5172_v17 = vld [vmem:[%s7613_s17] ss:$0 sm:$0xff] }
0x21fe   :  { %v3762_v18 = vpop.permute.xlu1 %3761 }
0x21ff   :  { %3764 = vst.msk [vmem:[#allocation4 + $0x8] sm:$0xff] %vm1175_vm13, %v3762_v18 }
0x2206   :  { %v3879_v29 = vpop.permute.xlu1 %3878 }
0x2207   :  { %3881 = vst.msk [vmem:[#allocation4 + $0x8] sm:$0xff] %vm1360_vm14, %v3879_v29 }
0x220e   :  { %v4347_v30 = vld [vmem:[#allocation4 + $0x8] sm:$0xff] }
0x220f   :  { %v4353_v43 = vpack.c.bf16 %v4347_v30, %v4346_v28 }
0x2211   :  { %5767 = vmatprep.mubr.msk.bf16.mxu0 %vm348_vm3, %v4353_v43 }
0x2223   :  { %v4109_v45 = vpop.permute.xlu1 %4108 }
0x2224   :  { %4111 = vst.msk [vmem:[#allocation4 + $0x10] sm:$0xff] %vm990_vm12, %v4109_v45 }
0x2250   :  { %v4226_v32 = vpop.permute.xlu0 %4225 }
0x2251   :  { %4228 = vst.msk [vmem:[#allocation4 + $0x10] sm:$0xff] %vm1175_vm13, %v4226_v32 }
0x2258   :  { %v4343_v46 = vpop.permute.xlu1 %4342 }
0x2259   :  { %4345 = vst.msk [vmem:[#allocation4 + $0x10] sm:$0xff] %vm1360_vm14, %v4343_v46  ;;  %v5938_v46 = vld [vmem:[%s7614_s21] sm:$0xff]  }
0x225a   :  { %5779 = vmatprep.subr.bf16.mxu0 %v5938_v46 }
0x2260   :  { %v4348_v39 = vld [vmem:[#allocation4 + $0x10] sm:$0xff] }
0x2261   :  { %v4354_v23 = vpack.c.bf16 %v4348_v39, %v4348_v39  ;;  %v5939_v39 = vld [vmem:[%s7614_s21 + $0x8] sm:$0xff]  }
0x2263   :  { %5768 = vmatmul.mubr.msk.bf16.vlgmr.msra.gmra.mrb[108].mxu0 %vm348_vm3, %v4354_v23  ;;  %v5940_v23 = vld [vmem:[%s7614_s21 + $0x10] sm:$0xff]  }
0x2264   :  { %5780 = vmatpush3.bf16.msra.mxu0 %v5938_v46 }
0x2265   :  { %5781 = vmatprep.subr.bf16.mxu0 %v5939_v39 }
0x2268   :  { %5782 = vmatpush3.bf16.msra.mxu0 %v5939_v39 }
0x2269   :  { %5783 = vmatprep.subr.bf16.mxu0 %v5940_v23 }
0x226c   :  { %5784 = vmatpush3.bf16.msra.mxu0 %v5940_v23 }
0x2336   :  { %v5769_v40 = vpop.f32.mrb[108].mxu0 }
0x2337   :  { %v4414_v50 = vpop.f32.mrb[109].mxu0  ;;  %v4423_v38 = vadd.f32 %v5769_v40, %v5166_v49  ;;  %v5942_v40 = vld [vmem:[%s7614_s21 + $0x20] sm:$0xff]  }
0x2338   :  { %v4415_v16 = vadd.f32 %v5166_v49, %v4414_v50  ;;  %v5770_v51 = vpop.f32.mrb[110].mxu0  ;;  %v5943_v50 = vld [vmem:[%s7614_s21 + $0x28] sm:$0xff]  }
0x2339   :  { %v4417_v52 = vpop.f32.mrb[111].mxu0  ;;  %v7500_v61 = vadd.f32 %v6183_v58, %v4423_v38  ;;  %v5944_v38 = vld [vmem:[%s7614_s21 + $0x30] sm:$0xff]   ;;  %v5173_v51 = vld [vmem:[%s7615_s25] ss:$0 sm:$0xff] }
0x233a   :  { %v7497_v55 = vadd.f32 %v6182_v44, %v4415_v16  ;;  %v4418_v56 = vadd.f32 %v5166_v49, %v4417_v52  ;;  %v5941_v49 = vld [vmem:[%s7614_s21 + $0x18] sm:$0xff]  }
0x233b   :  { %v4437_v48 = vsel %vm348_vm3, %v7500_v61, 0.0  ;;  %5785 = vmatprep.subr.bf16.mxu0 %v5941_v49  ;;  %v5945_v16 = vld [vmem:[%s7614_s21 + $0x38] sm:$0xff]  }
0x233c   :  { %v7503_v62 = vadd.f32 %v6184_v41, %v4418_v56  ;;  %v4431_v63 = vsel %vm348_vm3, %v7497_v55, 0.0  ;;  %5786 = vmatpush3.bf16.msra.mxu0 %v5941_v49 }
0x233d   :  { %4432 = vadd.xlane.f32.xlu0 %v4431_v63  ;;  %5787 = vmatprep.subr.bf16.mxu0 %v5942_v40 }
0x233e   :  { %v4434_v54 = vsel %vm348_vm3, %v7503_v62, 0.0 }
0x233f   :  { %4435 = vadd.xlane.f32.xlu1 %v4434_v54 }
0x2340   :  { %5788 = vmatpush3.bf16.msra.mxu0 %v5942_v40 }
0x2341   :  { %4438 = vadd.xlane.f32.xlu0 %v4437_v48  ;;  %5789 = vmatprep.subr.bf16.mxu0 %v5943_v50 }
0x2344   :  { %5790 = vmatpush3.bf16.msra.mxu0 %v5943_v50 }
0x2345   :  { %5791 = vmatprep.subr.bf16.mxu0 %v5944_v38 }
0x2348   :  { %5792 = vmatpush3.bf16.msra.mxu0 %v5944_v38 }
0x2349   :  { %5793 = vmatprep.subr.bf16.mxu0 %v5945_v16 }
0x234c   :  { %5794 = vmatpush3.bf16.msra.mxu0 %v5945_v16 }
0x23ca   :  { %v4433_v8 = vpop.xlane.xlu0 %4432 }
0x23cb   :  { %v4440_v10 = vmul.f32 0.03125, %v4433_v8 }
0x23cc   :  { %v4436_v2 = vpop.xlane.xlu1 %4435 }
0x23cd   :  { %v4443_v33 = vsub.f32 %v7497_v55, %v4440_v10  ;;  %v4441_v53 = vmul.f32 0.03125, %v4436_v2 }
0x23ce   :  { %v4439_v42 = vpop.xlane.xlu0 %4438 }
0x23cf   :  { %v4444_v21 = vsub.f32 %v7503_v62, %v4441_v53  ;;  %v4442_v34 = vmul.f32 0.03125, %v4439_v42  ;;  %v4446_v4 = vmul.f32 %v4443_v33, %v4443_v33 }
0x23d1   :  { %v4445_v27 = vsub.f32 %v7500_v61, %v4442_v34  ;;  %v4449_v25 = vsel %vm348_vm3, %v4446_v4, 0.0  ;;  %v4447_v6 = vmul.f32 %v4444_v21, %v4444_v21 }
0x23d2   :  { %4450 = vadd.xlane.f32.xlu0 %v4449_v25 }
0x23d3   :  { %v4448_v31 = vmul.f32 %v4445_v27, %v4445_v27  ;;  %v4452_v26 = vsel %vm348_vm3, %v4447_v6, 0.0 }
0x23d5   :  { %v4455_v14 = vsel %vm348_vm3, %v4448_v31, 0.0 }
0x23d6   :  { %4453 = vadd.xlane.f32.xlu0 %v4452_v26  ;;  %4456 = vadd.xlane.f32.xlu1 %v4455_v14 }
0x245f   :  { %v4451_v24 = vpop.xlane.xlu0 %4450 }
0x2460   :  { %v4458_v0 = vmul.f32 0.03125, %v4451_v24 }
0x2462   :  { %v4461_v35 = vadd.f32 1e-05, %v4458_v0 }
0x2463   :  { %v4457_v19 = vpop.xlane.xlu1 %4456  ;;  %v4454_v22 = vpop.xlane.xlu0 %4453 }
0x2464   :  { %6158 = vrsqrt.f32 %v4461_v35  ;;  %v4460_v36 = vmul.f32 0.03125, %v4457_v19  ;;  %v4459_v59 = vmul.f32 0.03125, %v4454_v22  ;;  %v5181_v35 = vld [vmem:[%s7616_s29] ss:$0 sm:$0xff] }
0x2466   :  { %v4463_v9 = vadd.f32 1e-05, %v4460_v36  ;;  %v4462_v13 = vadd.f32 1e-05, %v4459_v59 }
0x2468   :  { %6160 = vrsqrt.f32 %v4463_v9 }
0x2469   :  { %6162 = vrsqrt.f32 %v4462_v13 }
0x246e   :  { %v6159_v11 = vpop.eup %6158 }
0x246f   :  { %v4467_v3 = vmul.f32 %v6159_v11, %v4443_v33 }
0x2471   :  { %v4477_v60 = vmul.f32 %v5171_v37, %v4467_v3 }
0x2472   :  { %v6161_v47 = vpop.eup %6160 }
0x2473   :  { %v6163_v7 = vpop.eup %6162  ;;  %v4469_v20 = vmul.f32 %v6161_v47, %v4445_v27  ;;  %v4487_v30 = vadd.f32 %v5172_v17, %v4477_v60 }
0x2474   :  { %v4468_v12 = vmul.f32 %v6163_v7, %v4444_v21 }
0x2475   :  { %v4479_v18 = vmul.f32 %v5171_v37, %v4469_v20 }
0x2476   :  { %v4478_v29 = vmul.f32 %v5171_v37, %v4468_v12 }
0x2477   :  { %v4489_v28 = vadd.f32 %v5172_v17, %v4479_v18 }
0x2478   :  { %v4488_v43 = vadd.f32 %v5172_v17, %v4478_v29 }
0x2479   :  { %v4495_v45 = vpack.c.bf16 %v4489_v28, %v4489_v28 }
0x247a   :  { %v4494_v32 = vpack.c.bf16 %v4488_v43, %v4487_v30 }
0x247c   :  { %5775 = vmatprep.mubr.msk.bf16.mxu1 %vm348_vm3, %v4494_v32 }
0x247d   :  { %5776 = vmatmul.mubr.msk.bf16.vlgmr.msra.gmra.mrb[128].mxu1 %vm348_vm3, %v4495_v45 }
0x247e   :  { %5805 = vmatprep.mubr.msk.f32.mxu1 %vm6250_vm5, %v6249_v5 }
0x2550   :  { %v5777_v52 = vpop.f32.mrb[128].mxu1 }
0x2551   :  { %v4564_v44 = vadd.f32 %v5777_v52, %v5173_v51  ;;  %v4555_v56 = vpop.f32.mrb[129].mxu1 }
0x2552   :  { %v4556_v58 = vadd.f32 %v5173_v51, %v4555_v56  ;;  %v5778_v41 = vpop.f32.mrb[130].mxu1 }
0x2553   :  { %v5180_v63 = vmul.f32 -1.702, %v4564_v44  ;;  %v4558_v54 = vpop.f32.mrb[131].mxu1  ;;  %v5190_v41 = vld [vmem:[%s7617_s3] ss:$0 sm:$0xff] }
0x2554   :  { %v5178_v48 = vmul.f32 -1.702, %v4556_v58  ;;  %v4559_v8 = vadd.f32 %v5173_v51, %v4558_v54 }
0x2555   :  { %v4579_v10 = vmul.f32 1.442695, %v5180_v63 }
0x2556   :  { %v4575_v2 = vmul.f32 1.442695, %v5178_v48  ;;  %v5179_v33 = vmul.f32 -1.702, %v4559_v8 }
0x2557   :  { %6164 = vpow2.f32 %v4579_v10 }
0x2558   :  { %6166 = vpow2.f32 %v4575_v2  ;;  %v4577_v53 = vmul.f32 1.442695, %v5179_v33  ;;  %v5191_v2 = vld [vmem:[%s6455_s27] ss:$0 sm:$0xff] }
0x255a   :  { %6168 = vpow2.f32 %v4577_v53 }
0x2561   :  { %v6165_v42 = vpop.eup %6164 }
0x2562   :  { %v6167_v21 = vpop.eup %6166  ;;  %v4583_v34 = vadd.f32 1.0, %v6165_v42 }
0x2563   :  { %v4581_v4 = vadd.f32 1.0, %v6167_v21 }
0x2564   :  { %v6169_v27 = vpop.eup %6168  ;;  %6170 = vrcp.f32 %v4583_v34 }
0x2565   :  { %6172 = vrcp.f32 %v4581_v4  ;;  %v4582_v25 = vadd.f32 1.0, %v6169_v27 }
0x2567   :  { %6174 = vrcp.f32 %v4582_v25  ;;  %v4776_v25 = vld [vmem:[%s6465_s6] sm:$0x7]  ;;  %s6266_s6 = smov [#allocation5]  }
0x2568   :  { %s4995_s27 = sshll.u32 %s6266_s6, 4  ;;  %s4996_s27 = int_to_ptr.vmem [resolvable:$true] %s4995_s27 }
0x2569   :  { %s6189_s8 = scalar_lea.vmem %s4996_s27, 32  ;;  %p6190_p1 = scmp.lt.s32.totalorder %s4996_s27, %s4996_s27 }
0x256e   :  { %v6171_v6 = vpop.eup %6170 }
0x256f   :  { %v6173_v31 = vpop.eup %6172  ;;  %v4592_v14 = vmul.f32 %v6171_v6, %v4564_v44  ;;  %v5946_v6 = vld [vmem:[%s6460_s4] sm:$0xff]  }
0x2570   :  { %v4590_v1 = vmul.f32 %v6173_v31, %v4556_v58  ;;  %v5947_v31 = vld [vmem:[%s6460_s4 + $0x8] sm:$0xff]   ;;  %s6185_s4 = scalar_lea.vmem %s4996_s27, 16 }
0x2571   :  { %v6175_v26 = vpop.eup %6174  ;;  %v4610_v0 = vpack.c.bf16 %v4592_v14, %v4592_v14  ;;  %p6186_p0 = scmp.ne.s32.totalorder %s4996_s27, %s6185_s4  ;;  %p6191_p2 = scmp.lt.s32.totalorder %s6189_s8, %s6185_s4 }
0x2572   :  { %v4591_v15 = vmul.f32 %v6175_v26, %v4559_v8 }
0x2573   :  { %p6192_p3 = por %p6191_p2, %p6190_p1 }
0x2574   :  { %v4609_v24 = vpack.c.bf16 %v4591_v15, %v4590_v1 }
0x2575   :  { %p6193_p4 = pnand %p6192_p3, %p6186_p0 }
0x2576   :  { %5795 = vmatprep.mubr.bf16.mxu0 %v4609_v24 }
0x2577   :  { %5796 = vmatmul.mubr.bf16.vlgmr.msra.gmra.mrb[112].mxu0 %v4610_v0 }
0x264a   :  { %v5797_v19 = vpop.f32.mrb[112].mxu0 }
0x264b   :  { %v4700_v22 = vpop.f32.mrb[113].mxu0  ;;  %v4709_v36 = vadd.f32 %v5797_v19, %v5181_v35 }
0x264c   :  { %v4701_v59 = vadd.f32 %v5181_v35, %v4700_v22  ;;  %v5798_v9 = vpop.f32.mrb[114].mxu0 }
0x264d   :  { %v4703_v13 = vpop.f32.mrb[115].mxu0  ;;  %v4716_v37 = vadd.f32 %v4709_v36, %v7500_v61 }
0x264e   :  { %v4714_v11 = vadd.f32 %v4701_v59, %v7497_v55  ;;  %v4704_v3 = vadd.f32 %v5181_v35, %v4703_v13 }
0x264f   :  { %v4723_v12 = vsel %vm348_vm3, %v4716_v37, 0.0 }
0x2650   :  { %v4715_v47 = vadd.f32 %v4704_v3, %v7503_v62  ;;  %v4717_v7 = vsel %vm348_vm3, %v4714_v11, 0.0 }
0x2651   :  { %4718 = vadd.xlane.f32.xlu0 %v4717_v7 }
0x2652   :  { %v4720_v20 = vsel %vm348_vm3, %v4715_v47, 0.0 }
0x2653   :  { %4721 = vadd.xlane.f32.xlu1 %v4720_v20 }
0x2655   :  { %4724 = vadd.xlane.f32.xlu0 %v4723_v12 }
0x26de   :  { %v4719_v60 = vpop.xlane.xlu0 %4718 }
0x26df   :  { %v4726_v17 = vmul.f32 0.03125, %v4719_v60 }
0x26e0   :  { %v4722_v18 = vpop.xlane.xlu1 %4721 }
0x26e1   :  { %v4729_v29 = vsub.f32 %v4714_v11, %v4726_v17  ;;  %v4727_v28 = vmul.f32 0.03125, %v4722_v18 }
0x26e2   :  { %v4725_v55 = vpop.xlane.xlu0 %4724 }
0x26e3   :  { %v4730_v30 = vsub.f32 %v4715_v47, %v4727_v28  ;;  %v4728_v43 = vmul.f32 0.03125, %v4725_v55  ;;  %v4732_v61 = vmul.f32 %v4729_v29, %v4729_v29 }
0x26e5   :  { %v4731_v45 = vsub.f32 %v4716_v37, %v4728_v43  ;;  %v4735_v62 = vsel %vm348_vm3, %v4732_v61, 0.0  ;;  %v4733_v32 = vmul.f32 %v4730_v30, %v4730_v30 }
0x26e6   :  { %4736 = vadd.xlane.f32.xlu1 %v4735_v62 }
0x26e7   :  { %v4738_v46 = vsel %vm348_vm3, %v4733_v32, 0.0  ;;  %v4734_v39 = vmul.f32 %v4731_v45, %v4731_v45 }
0x26e8   :  { %4739 = vadd.xlane.f32.xlu0 %v4738_v46 }
0x26e9   :  { %v4741_v23 = vsel %vm348_vm3, %v4734_v39, 0.0 }
0x26ea   :  { %4742 = vadd.xlane.f32.xlu1 %v4741_v23 }
0x2773   :  { %v4737_v49 = vpop.xlane.xlu1 %4736 }
0x2774   :  { %v4744_v40 = vmul.f32 0.03125, %v4737_v49 }
0x2775   :  { %v4740_v50 = vpop.xlane.xlu0 %4739 }
0x2776   :  { %v4747_v38 = vadd.f32 1e-05, %v4744_v40  ;;  %v4745_v16 = vmul.f32 0.03125, %v4740_v50 }
0x2777   :  { %v4743_v51 = vpop.xlane.xlu1 %4742 }
0x2778   :  { %6176 = vrsqrt.f32 %v4747_v38  ;;  %v4748_v52 = vadd.f32 1e-05, %v4745_v16  ;;  %v4746_v44 = vmul.f32 0.03125, %v4743_v51 }
0x277a   :  { %6178 = vrsqrt.f32 %v4748_v52  ;;  %v4749_v56 = vadd.f32 1e-05, %v4746_v44 }
0x277c   :  { %6180 = vrsqrt.f32 %v4749_v56 }
0x2782   :  { %v6177_v58 = vpop.eup %6176 }
0x2783   :  { %v4753_v63 = vmul.f32 %v6177_v58, %v4729_v29 }
0x2784   :  { %v6179_v54 = vpop.eup %6178 }
0x2785   :  { %v4754_v48 = vmul.f32 %v6179_v54, %v4730_v30  ;;  %v4763_v8 = vmul.f32 %v5190_v41, %v4753_v63 }
0x2786   :  { %v6181_v10 = vpop.eup %6180 }
0x2787   :  { %v4764_v33 = vmul.f32 %v5190_v41, %v4754_v48  ;;  %v4755_v53 = vmul.f32 %v6181_v10, %v4731_v45  ;;  %v4773_v42 = vadd.f32 %v5191_v2, %v4763_v8 }
0x2789   :  { %v4774_v21 = vadd.f32 %v5191_v2, %v4764_v33  ;;  %v4765_v4 = vmul.f32 %v5190_v41, %v4755_v53 }
0x278b   :  { %v5828_v34 = vpack.c.bf16 %v4774_v21, %v4773_v42  ;;  %v4775_v27 = vadd.f32 %v5191_v2, %v4765_v4 }
0x278d   :  { %5829 = vmatpush3.bf16.msra.mxu1 %v5828_v34 }
0x278e   :  { %5803 = vmatprep.subr.mxu1 %v6249_v5 }
0x2791   :  { %5804 = vmatpush3.msra.mxu1 %v4775_v27 }
0x2792   :  { %5806 = vmatmul.mubr.msk.f32.vlgmr.msra.gmra.mrb[132].mxu1 %vm4777_vm6, %v4776_v25  ;;  %5808 = vmatprep.subr.bf16.mxu1 %v6249_v5 }
0x2793   :  { %5809 = vmatpush3.bf16.msra.mxu1 %v5946_v6  ;;  %5812 = vmatprep.mubr.msk.bf16.mxu1 %vm6250_vm5, %v6249_v5 }
0x2794   :  { %5810 = vmatprep.subr.bf16.mxu1 %v6249_v5 }
0x2797   :  { %5811 = vmatpush3.bf16.msra.mxu1 %v5947_v31 }
0x2798   :  { %5816 = vmatprep.subr.mxu1 %v6249_v5 }
0x2865   :  { %v4847_v26 = vpop.f32.mrb[132].mxu1 }
0x2866   :  { %v4855_v14 = vpack.c.bf16 %v4847_v26, %v4847_v26  ;;  %v5807_v1 = vpop.f32.mrb[133].mxu1 }
0x2868   :  { %5813 = vmatmul.mubr.msk.bf16.vlgmr.msra.gmra.mrb[136].mxu1 %vm348_vm3, %v4855_v14 }
0x2869   :  { %5818 = vmatprep.mubr.msk.f32.mxu1 %vm6250_vm5, %v6249_v5 }
0x293b   :  { %v4905_v15 = vpop.f32.mrb[136].mxu1 }
0x293c   :  { %v5814_v24 = vpop.f32.mrb[137].mxu1  ;;  %5817 = vmatpush3.xpose.msk.msra.mxu1 %vm348_vm3, %v4905_v15 }
0x293d   :  { %v4908_v0 = vpop.f32.mrb[138].mxu1 }
0x293e   :  { %v5815_v35 = vpop.f32.mrb[139].mxu1 }
0x293f   :  { %5819 = vmatmul.mubr.msk.f32.vlgmr.msra.gmra.mrb[134].mxu1 %vm348_vm3, %v7247_v57 }
0x2a12   :  { %v4983_v19 = vpop.f32.mrb[134].mxu1 }
0x2a13   :  { %4988 = vst.msk [vmem:[#allocation5] sm:$0x1] %vm4987_vm9, %v4983_v19  ;;  %v5820_v22 = vpop.f32.mrb[135].mxu1 }
0x2a14   :  { %6196 = shalt.err (!%p6193_p4)
}
0x2a15   :  { %s6197_s14 = scalar_lea.hbm %s6470_s20, 16 }
0x2a16   :  { %p6198_p5 = scmp.ne.s32.totalorder %s6470_s20, %s6197_s14  ;;  %p6201_p6 = scmp.lt.u32.totalorder %s6197_s14, %s6470_s20 }
0x2a18   :  { %p6203_p7 = pnand %p6201_p6, %p6198_p5 }
0x2a1a   :  { %6206 = shalt.err (!%p6203_p7)
}
0x2a1b   :  { %4998 = dma.vmem_to_hbm [thread:$0]  %s4996_s27, 16, %s6470_s20, [#allocation6]  }
0x2a1c   :  { %6207 = dma.done.wait [#allocation6], 16  }
0x2a1d   :  { %6208 = vsyncadd [#allocation6], 4294967280 }
0x2a1e   :  { %5002 = vsyncpa [#allocation6], 1 }

</bundles_post_ra>
